<compile_context>
chip_gen: v5e
topology: v5e:2x2
jax: 0.10.0
libtpu: 0.0.40
codegen_flags: <defaults>
</compile_context>

<pallas_src>
import functools

import jax
import jax.numpy as jnp
from jax.experimental import pallas as pl
from jax.experimental.pallas import tpu as pltpu  # noqa: F401  (not needed at this size)


# -----------------------------------------------------------------------------
# Packed-layout helpers (wrapper-side: free reshapes + one tiny zero-pad)
# -----------------------------------------------------------------------------
def pack(x_nhwc):
    """(N, H, W, C) -> lane-dense (N*H, W*C)."""
    n, h, w, c = x_nhwc.shape
    return x_nhwc.reshape(n * h, w * c)


def pad_packed(x2d, n, h, w, c):
    """Packed state -> zero-padded packed input for a 3x3 conv: (N*(H+2), (W+2)*C)."""
    x = x2d.reshape(n, h, w, c)
    xp = jnp.pad(x, ((0, 0), (1, 1), (1, 1), (0, 0)))
    return xp.reshape(n * (h + 2), (w + 2) * c)


# -----------------------------------------------------------------------------
# Weight construction for the packed layout (done once, outside the jitted fwd)
# -----------------------------------------------------------------------------
def _fold_bn(gamma, beta, running_mean, running_var, eps=1e-5):
    scale = gamma / jnp.sqrt(running_var + eps)
    shift = beta - running_mean * scale
    return scale, shift


def _bn_scale_shift(kg, kb, c_out, w_sp):
    gamma = 1.0 + 0.1 * jax.random.normal(kg, (c_out,), jnp.float32)
    beta = 0.1 * jax.random.normal(kb, (c_out,), jnp.float32)
    running_mean = jnp.zeros((c_out,), jnp.float32)   # eval-mode fold; a real
    running_var = jnp.ones((c_out,), jnp.float32)     # checkpoint's stats fold identically
    scale, shift = _fold_bn(gamma, beta, running_mean, running_var)
    return (jnp.tile(scale, w_sp).reshape(1, w_sp * c_out),
            jnp.tile(shift, w_sp).reshape(1, w_sp * c_out))


def _block_diag_1x1(w, w_sp):
    """(Cin, Cout) -> (W*Cin, W*Cout) block-diagonal weight for the packed layout."""
    c_in, c_out = w.shape
    eye = jnp.eye(w_sp, dtype=w.dtype)
    return jnp.einsum("wv,io->wivo", eye, w).reshape(w_sp * c_in, w_sp * c_out)


def _banded_3x3(w3, w_sp):
    """w3: (ky, kx, Cin, Cout) -> (3, (W+2)*Cin, W*Cout) banded block-Toeplitz
    weights: band[ky][(u*Cin+ci), (v*Cout+o)] = w3[ky, u-v, ci, o] for 0<=u-v<=2."""
    _, _, c_in, c_out = w3.shape
    wp = w_sp + 2
    u = jnp.arange(wp)[:, None, None]
    kx = jnp.arange(3)[None, :, None]
    v = jnp.arange(w_sp)[None, None, :]
    sel = (u == v + kx).astype(w3.dtype)                       # (Wp, 3, W)
    band = jnp.einsum("ukv,ykio->yuivo", sel, w3)              # (3, Wp, Cin, W, Cout)
    return band.reshape(3, wp * c_in, w_sp * c_out)


def make_conv1x1_bn_params(key, c_in, c_out, w_sp):
    kw, kg, kb = jax.random.split(key, 3)
    w = 0.1 * jax.random.normal(kw, (c_in, c_out), jnp.float32)
    scale, shift = _bn_scale_shift(kg, kb, c_out, w_sp)
    return {"w": _block_diag_1x1(w, w_sp).astype(jnp.bfloat16),
            "scale": scale, "shift": shift}


def make_conv3x3_bn_params(key, c_in, c_out, w_sp):
    kw, kg, kb = jax.random.split(key, 3)
    # Stored as (ky, kx, Cin, Cout) == torch weight (Cout, Cin, kH, kW) permuted
    # (2, 3, 1, 0); the conv is computed as cross-correlation, same as torch.
    w3 = 0.1 * jax.random.normal(kw, (3, 3, c_in, c_out), jnp.float32)
    scale, shift = _bn_scale_shift(kg, kb, c_out, w_sp)
    return {"w": _banded_3x3(w3, w_sp).astype(jnp.bfloat16),
            "scale": scale, "shift": shift}


def make_channel_reduction_params(key, c_per_state, n_states, c_out, w_sp):
    kw, kg, kb = jax.random.split(key, 3)
    w = 0.1 * jax.random.normal(kw, (n_states * c_per_state, c_out), jnp.float32)
    scale, shift = _bn_scale_shift(kg, kb, c_out, w_sp)
    # K-split: one block-diagonal slice per input state (removes the concat).
    wbd = jnp.stack(
        [_block_diag_1x1(w[s * c_per_state:(s + 1) * c_per_state], w_sp)
         for s in range(n_states)], axis=0).astype(jnp.bfloat16)
    return {"w": wbd, "scale": scale, "shift": shift}


# -----------------------------------------------------------------------------
# Kernel 1: fused preprocess -- three ReLU -> 1x1 conv -> BN in one body
# -----------------------------------------------------------------------------
def _preprocess3_kernel(x0, x1, x2, w0, w1, w2, sc0, sc1, sc2, sh0, sh1, sh2,
                        o0, o1, o2):
    for x_ref, w_ref, sc_ref, sh_ref, o_ref in (
            (x0, w0, sc0, sh0, o0),
            (x1, w1, sc1, sh1, o1),
            (x2, w2, sc2, sh2, o2)):
        x = jnp.maximum(x_ref[...], 0.0).astype(jnp.bfloat16)
        y = jnp.dot(x, w_ref[...], preferred_element_type=jnp.float32)
        o_ref[...] = y * sc_ref[...] + sh_ref[...]


def preprocess3(xs, plist):
    r, wcin = xs[0].shape
    wcout = plist[0]["scale"].shape[1]
    args = (list(xs)
            + [p["w"] for p in plist]
            + [p["scale"] for p in plist]
            + [p["shift"] for p in plist])
    in_specs = ([pl.BlockSpec((r, wcin), lambda i: (0, 0))] * 3
                + [pl.BlockSpec((wcin, wcout), lambda i: (0, 0))] * 3
                + [pl.BlockSpec((1, wcout), lambda i: (0, 0))] * 6)
    return pl.pallas_call(
        _preprocess3_kernel,
        out_shape=tuple(jax.ShapeDtypeStruct((r, wcout), jnp.float32)
                        for _ in range(3)),
        grid=(1,),
        in_specs=in_specs,
        out_specs=tuple(pl.BlockSpec((r, wcout), lambda i: (0, 0))
                        for _ in range(3)),
    )(*args)


# -----------------------------------------------------------------------------
# Kernel 2: one fused kernel per DARTS step (3 ops + 3-way sum, no add3 kernel)
# -----------------------------------------------------------------------------
def _make_step_kernel(op_names, n, h, w, c):
    hp = h + 2

    def kernel(*refs):
        idx = 0
        total = None
        for name in op_names:
            if name == "skip_connect":                       # Identity (stride 1)
                x_ref = refs[idx]; idx += 1
                contrib = x_ref[...]
            elif name == "nor_conv_1x1":
                x_ref, w_ref, sc_ref, sh_ref = refs[idx:idx + 4]; idx += 4
                x = jnp.maximum(x_ref[...], 0.0).astype(jnp.bfloat16)
                y = jnp.dot(x, w_ref[...], preferred_element_type=jnp.float32)
                contrib = y * sc_ref[...] + sh_ref[...]
            elif name == "nor_conv_3x3":
                xp_ref, w_ref, sc_ref, sh_ref = refs[idx:idx + 4]; idx += 4
                per_img = []
                for img in range(n):
                    acc = None
                    for ky in range(3):
                        rows = xp_ref[img * hp + ky:img * hp + ky + h, :]
                        rows = jnp.maximum(rows, 0.0).astype(jnp.bfloat16)
                        part = jnp.dot(rows, w_ref[ky],
                                       preferred_element_type=jnp.float32)
                        acc = part if acc is None else acc + part
                    per_img.append(acc)
                y = per_img[0] if n == 1 else jnp.concatenate(per_img, axis=0)
                contrib = y * sc_ref[...] + sh_ref[...]
            else:
                # TODO(synk): pools / sep / dil convs / Zero / FactorizedReduce
                raise NotImplementedError(name)
            total = contrib if total is None else total + contrib
        refs[idx][...] = total

    return kernel


def run_step(step_geno, op_params, states, n, h, w, c):
    r = n * h
    hp, wp = h + 2, w + 2
    wc = w * c
    args, in_specs, names = [], [], []
    for (name, pre_idx), p in zip(step_geno, op_params):
        names.append(name)
        x = states[pre_idx]
        if name == "skip_connect":
            args.append(x)
            in_specs.append(pl.BlockSpec((r, wc), lambda i: (0, 0)))
        elif name == "nor_conv_1x1":
            args += [x, p["w"], p["scale"], p["shift"]]
            in_specs += [pl.BlockSpec((r, wc), lambda i: (0, 0)),
                         pl.BlockSpec((wc, wc), lambda i: (0, 0)),
                         pl.BlockSpec((1, wc), lambda i: (0, 0)),
                         pl.BlockSpec((1, wc), lambda i: (0, 0))]
        elif name == "nor_conv_3x3":
            args += [pad_packed(x, n, h, w, c), p["w"], p["scale"], p["shift"]]
            in_specs += [pl.BlockSpec((n * hp, wp * c), lambda i: (0, 0)),
                         pl.BlockSpec((3, wp * c, wc), lambda i: (0, 0, 0)),
                         pl.BlockSpec((1, wc), lambda i: (0, 0)),
                         pl.BlockSpec((1, wc), lambda i: (0, 0))]
        else:
            raise NotImplementedError(name)
    return pl.pallas_call(
        _make_step_kernel(tuple(names), n, h, w, c),
        out_shape=jax.ShapeDtypeStruct((r, wc), jnp.float32),
        grid=(1,),
        in_specs=in_specs,
        out_specs=pl.BlockSpec((r, wc), lambda i: (0, 0)),
    )(*args)


# -----------------------------------------------------------------------------
# Kernel 3: channel reduction -- ReLU-1x1-BN of concat(states) as a K-split sum
# -----------------------------------------------------------------------------
def _make_cr_kernel(n_states):
    def kernel(*refs):
        w_ref = refs[n_states]
        sc_ref = refs[n_states + 1]
        sh_ref = refs[n_states + 2]
        o_ref = refs[n_states + 3]
        acc = None
        for s in range(n_states):
            x = jnp.maximum(refs[s][...], 0.0).astype(jnp.bfloat16)
            y = jnp.dot(x, w_ref[s], preferred_element_type=jnp.float32)
            acc = y if acc is None else acc + y
        o_ref[...] = acc * sc_ref[...] + sh_ref[...]
    return kernel


def channel_reduction(states, p, n, h, w, c, c_out):
    r = n * h
    wc = w * c
    wco = w * c_out
    ns = len(states)
    in_specs = ([pl.BlockSpec((r, wc), lambda i: (0, 0))] * ns
                + [pl.BlockSpec((ns, wc, wco), lambda i: (0, 0, 0)),
                   pl.BlockSpec((1, wco), lambda i: (0, 0)),
                   pl.BlockSpec((1, wco), lambda i: (0, 0))])
    return pl.pallas_call(
        _make_cr_kernel(ns),
        out_shape=jax.ShapeDtypeStruct((r, wco), jnp.float32),
        grid=(1,),
        in_specs=in_specs,
        out_specs=pl.BlockSpec((r, wco), lambda i: (0, 0)),
    )(*states, p["w"], p["scale"], p["shift"])


# -----------------------------------------------------------------------------
# FusedHeadCell forward
# -----------------------------------------------------------------------------
def fused_head_cell(wl, niri, nirii, params, *, geno, step, n, h, w, stem_c, c,
                    multiplier):
    del stem_c  # implied by the input shapes
    xs = [pack(x) for x in (wl, niri, nirii)]
    s0, s1, s2 = preprocess3(xs, [params["pre0"], params["pre1"], params["pre2"]])
    states = [s0, s1, s2]
    offset = 0
    for _ in range(step):
        step_geno = geno[offset:offset + 3]
        op_params = params["ops"][offset:offset + 3]
        states.append(run_step(step_geno, op_params, states, n, h, w, c))
        offset += 3
    out2d = channel_reduction(states, params["cr"], n, h, w, c, c * multiplier)
    return out2d.reshape(n, h, w, c * multiplier)   # NHWC (reference is NCHW)


if __name__ == "__main__":
    key = jax.random.PRNGKey(0)
    N, H, W = 2, 16, 16
    stem_C, C = 8, 8
    step, multiplier = 2, 2
    droppath = 0.0  # inference: DropPath disabled

    # genotype: (op_name, predecessor_state_index) x 3 per step
    geno = [
        ("nor_conv_1x1", 0), ("skip_connect", 1), ("nor_conv_3x3", 2),
        ("nor_conv_3x3", 3), ("nor_conv_1x1", 1), ("skip_connect", 0),
    ]

    keys = jax.random.split(key, 16)
    params = {
        "pre0": make_conv1x1_bn_params(keys[0], stem_C, C, W),
        "pre1": make_conv1x1_bn_params(keys[1], stem_C, C, W),
        "pre2": make_conv1x1_bn_params(keys[2], stem_C, C, W),
    }
    op_params = []
    for idx, (op_name, _) in enumerate(geno):
        if op_name == "nor_conv_1x1":
            op_params.append(make_conv1x1_bn_params(keys[3 + idx], C, C, W))
        elif op_name == "nor_conv_3x3":
            op_params.append(make_conv3x3_bn_params(keys[3 + idx], C, C, W))
        else:
            op_params.append(None)
    params["ops"] = op_params
    params["cr"] = make_channel_reduction_params(keys[9], C, 3 + step,
                                                 C * multiplier, W)

    # forward inputs (NHWC; PyTorch reference would be NCHW (2, 8, 16, 16))
    wl = jax.random.normal(keys[10], (N, H, W, stem_C), jnp.float32)
    niri = jax.random.normal(keys[11], (N, H, W, stem_C), jnp.float32)
    nirii = jax.random.normal(keys[12], (N, H, W, stem_C), jnp.float32)

    fwd = jax.jit(functools.partial(
        fused_head_cell, geno=tuple(geno), step=step, n=N, h=H, w=W,
        stem_c=stem_C, c=C, multiplier=multiplier))
    out = fwd(wl, niri, nirii, params)
    jax.block_until_ready(out)
    assert out.shape == (N, H, W, C * multiplier), out.shape
    print("KERNEL_OK")
</pallas_src>

<mosaic_0001>
module attributes {stable_mosaic.version = 11 : i64} {
  func.func @_preprocess3_kernel(%arg0: i32, %arg1: memref<32x128xf32, #tpu.memory_space<vmem>>, %arg2: memref<32x128xf32, #tpu.memory_space<vmem>>, %arg3: memref<32x128xf32, #tpu.memory_space<vmem>>, %arg4: memref<128x128xbf16, #tpu.memory_space<vmem>>, %arg5: memref<128x128xbf16, #tpu.memory_space<vmem>>, %arg6: memref<128x128xbf16, #tpu.memory_space<vmem>>, %arg7: memref<1x128xf32, #tpu.memory_space<vmem>>, %arg8: memref<1x128xf32, #tpu.memory_space<vmem>>, %arg9: memref<1x128xf32, #tpu.memory_space<vmem>>, %arg10: memref<1x128xf32, #tpu.memory_space<vmem>>, %arg11: memref<1x128xf32, #tpu.memory_space<vmem>>, %arg12: memref<1x128xf32, #tpu.memory_space<vmem>>, %arg13: memref<32x128xf32, #tpu.memory_space<vmem>>, %arg14: memref<32x128xf32, #tpu.memory_space<vmem>>, %arg15: memref<32x128xf32, #tpu.memory_space<vmem>>) attributes {dimension_semantics = [#tpu.dimension_semantics<arbitrary>], iteration_bounds = array<i64: 1>, scalar_prefetch = 0 : i64, scratch_operands = 0 : i64, tpu.core_type = #tpu.core_type<tc>, window_params = [{pipeline_mode = #tpu.pipeline_mode<synchronous>, transform_indices = @transform_0, window_bounds = array<i64: 32, 128>}, {pipeline_mode = #tpu.pipeline_mode<synchronous>, transform_indices = @transform_1, window_bounds = array<i64: 32, 128>}, {pipeline_mode = #tpu.pipeline_mode<synchronous>, transform_indices = @transform_2, window_bounds = array<i64: 32, 128>}, {pipeline_mode = #tpu.pipeline_mode<synchronous>, transform_indices = @transform_3, window_bounds = array<i64: 128, 128>}, {pipeline_mode = #tpu.pipeline_mode<synchronous>, transform_indices = @transform_4, window_bounds = array<i64: 128, 128>}, {pipeline_mode = #tpu.pipeline_mode<synchronous>, transform_indices = @transform_5, window_bounds = array<i64: 128, 128>}, {pipeline_mode = #tpu.pipeline_mode<synchronous>, transform_indices = @transform_6, window_bounds = array<i64: 1, 128>}, {pipeline_mode = #tpu.pipeline_mode<synchronous>, transform_indices = @transform_7, window_bounds = array<i64: 1, 128>}, {pipeline_mode = #tpu.pipeline_mode<synchronous>, transform_indices = @transform_8, window_bounds = array<i64: 1, 128>}, {pipeline_mode = #tpu.pipeline_mode<synchronous>, transform_indices = @transform_9, window_bounds = array<i64: 1, 128>}, {pipeline_mode = #tpu.pipeline_mode<synchronous>, transform_indices = @transform_10, window_bounds = array<i64: 1, 128>}, {pipeline_mode = #tpu.pipeline_mode<synchronous>, transform_indices = @transform_11, window_bounds = array<i64: 1, 128>}, {pipeline_mode = #tpu.pipeline_mode<synchronous>, transform_indices = @transform_12, window_bounds = array<i64: 32, 128>}, {pipeline_mode = #tpu.pipeline_mode<synchronous>, transform_indices = @transform_13, window_bounds = array<i64: 32, 128>}, {pipeline_mode = #tpu.pipeline_mode<synchronous>, transform_indices = @transform_14, window_bounds = array<i64: 32, 128>}]} {
    %c0 = arith.constant 0 : index
    %c0_0 = arith.constant 0 : index
    %0 = vector.load %arg1[%c0, %c0_0] : memref<32x128xf32, #tpu.memory_space<vmem>>, vector<32x128xf32>
    %cst = arith.constant 0.000000e+00 : f32
    %1 = vector.broadcast %cst : f32 to vector<32x128xf32>
    %2 = arith.maximumf %0, %1 : vector<32x128xf32>
    %3 = arith.truncf %2 : vector<32x128xf32> to vector<32x128xbf16>
    %c0_1 = arith.constant 0 : index
    %c0_2 = arith.constant 0 : index
    %4 = vector.load %arg4[%c0_1, %c0_2] : memref<128x128xbf16, #tpu.memory_space<vmem>>, vector<128x128xbf16>
    %cst_3 = arith.constant dense<0.000000e+00> : vector<32x128xf32>
    %5 = tpu.matmul %3, %4, %cst_3 {dimension_numbers = #tpu.dot_dimension_numbers<[1], [0], [0], [1], [0, 0, 1, 1], [], []>} : vector<32x128xbf16>, vector<128x128xbf16>, vector<32x128xf32> -> vector<32x128xf32>
    %c0_4 = arith.constant 0 : index
    %c0_5 = arith.constant 0 : index
    %6 = vector.load %arg7[%c0_4, %c0_5] : memref<1x128xf32, #tpu.memory_space<vmem>>, vector<1x128xf32>
    %7 = vector.broadcast %6 : vector<1x128xf32> to vector<32x128xf32>
    %8 = arith.mulf %5, %7 : vector<32x128xf32>
    %c0_6 = arith.constant 0 : index
    %c0_7 = arith.constant 0 : index
    %9 = vector.load %arg10[%c0_6, %c0_7] : memref<1x128xf32, #tpu.memory_space<vmem>>, vector<1x128xf32>
    %10 = vector.broadcast %9 : vector<1x128xf32> to vector<32x128xf32>
    %11 = arith.addf %8, %10 : vector<32x128xf32>
    %c0_8 = arith.constant 0 : index
    %c0_9 = arith.constant 0 : index
    %12 = vector.load %arg13[%c0_8, %c0_9] : memref<32x128xf32, #tpu.memory_space<vmem>>, vector<32x128xf32>
    tpu.vector_store %arg13[%c0_8, %c0_9], %11 {strides = array<i32>} : memref<32x128xf32, #tpu.memory_space<vmem>>, vector<32x128xf32>,
    %c0_10 = arith.constant 0 : index
    %c0_11 = arith.constant 0 : index
    %13 = vector.load %arg2[%c0_10, %c0_11] : memref<32x128xf32, #tpu.memory_space<vmem>>, vector<32x128xf32>
    %cst_12 = arith.constant 0.000000e+00 : f32
    %14 = vector.broadcast %cst_12 : f32 to vector<32x128xf32>
    %15 = arith.maximumf %13, %14 : vector<32x128xf32>
    %16 = arith.truncf %15 : vector<32x128xf32> to vector<32x128xbf16>
    %c0_13 = arith.constant 0 : index
    %c0_14 = arith.constant 0 : index
    %17 = vector.load %arg5[%c0_13, %c0_14] : memref<128x128xbf16, #tpu.memory_space<vmem>>, vector<128x128xbf16>
    %cst_15 = arith.constant dense<0.000000e+00> : vector<32x128xf32>
    %18 = tpu.matmul %16, %17, %cst_15 {dimension_numbers = #tpu.dot_dimension_numbers<[1], [0], [0], [1], [0, 0, 1, 1], [], []>} : vector<32x128xbf16>, vector<128x128xbf16>, vector<32x128xf32> -> vector<32x128xf32>
    %c0_16 = arith.constant 0 : index
    %c0_17 = arith.constant 0 : index
    %19 = vector.load %arg8[%c0_16, %c0_17] : memref<1x128xf32, #tpu.memory_space<vmem>>, vector<1x128xf32>
    %20 = vector.broadcast %19 : vector<1x128xf32> to vector<32x128xf32>
    %21 = arith.mulf %18, %20 : vector<32x128xf32>
    %c0_18 = arith.constant 0 : index
    %c0_19 = arith.constant 0 : index
    %22 = vector.load %arg11[%c0_18, %c0_19] : memref<1x128xf32, #tpu.memory_space<vmem>>, vector<1x128xf32>
    %23 = vector.broadcast %22 : vector<1x128xf32> to vector<32x128xf32>
    %24 = arith.addf %21, %23 : vector<32x128xf32>
    %c0_20 = arith.constant 0 : index
    %c0_21 = arith.constant 0 : index
    %25 = vector.load %arg14[%c0_20, %c0_21] : memref<32x128xf32, #tpu.memory_space<vmem>>, vector<32x128xf32>
    tpu.vector_store %arg14[%c0_20, %c0_21], %24 {strides = array<i32>} : memref<32x128xf32, #tpu.memory_space<vmem>>, vector<32x128xf32>,
    %c0_22 = arith.constant 0 : index
    %c0_23 = arith.constant 0 : index
    %26 = vector.load %arg3[%c0_22, %c0_23] : memref<32x128xf32, #tpu.memory_space<vmem>>, vector<32x128xf32>
    %cst_24 = arith.constant 0.000000e+00 : f32
    %27 = vector.broadcast %cst_24 : f32 to vector<32x128xf32>
    %28 = arith.maximumf %26, %27 : vector<32x128xf32>
    %29 = arith.truncf %28 : vector<32x128xf32> to vector<32x128xbf16>
    %c0_25 = arith.constant 0 : index
    %c0_26 = arith.constant 0 : index
    %30 = vector.load %arg6[%c0_25, %c0_26] : memref<128x128xbf16, #tpu.memory_space<vmem>>, vector<128x128xbf16>
    %cst_27 = arith.constant dense<0.000000e+00> : vector<32x128xf32>
    %31 = tpu.matmul %29, %30, %cst_27 {dimension_numbers = #tpu.dot_dimension_numbers<[1], [0], [0], [1], [0, 0, 1, 1], [], []>} : vector<32x128xbf16>, vector<128x128xbf16>, vector<32x128xf32> -> vector<32x128xf32>
    %c0_28 = arith.constant 0 : index
    %c0_29 = arith.constant 0 : index
    %32 = vector.load %arg9[%c0_28, %c0_29] : memref<1x128xf32, #tpu.memory_space<vmem>>, vector<1x128xf32>
    %33 = vector.broadcast %32 : vector<1x128xf32> to vector<32x128xf32>
    %34 = arith.mulf %31, %33 : vector<32x128xf32>
    %c0_30 = arith.constant 0 : index
    %c0_31 = arith.constant 0 : index
    %35 = vector.load %arg12[%c0_30, %c0_31] : memref<1x128xf32, #tpu.memory_space<vmem>>, vector<1x128xf32>
    %36 = vector.broadcast %35 : vector<1x128xf32> to vector<32x128xf32>
    %37 = arith.addf %34, %36 : vector<32x128xf32>
    %c0_32 = arith.constant 0 : index
    %c0_33 = arith.constant 0 : index
    %38 = vector.load %arg15[%c0_32, %c0_33] : memref<32x128xf32, #tpu.memory_space<vmem>>, vector<32x128xf32>
    tpu.vector_store %arg15[%c0_32, %c0_33], %37 {strides = array<i32>} : memref<32x128xf32, #tpu.memory_space<vmem>>, vector<32x128xf32>,
    return
  }
  func.func @transform_0(%arg0: i32) -> (i32, i32) {
    %c0_i32 = arith.constant 0 : i32
    %c0_i32_0 = arith.constant 0 : i32
    %c0_i32_1 = arith.constant 0 : i32
    return %c0_i32, %c0_i32_0 : i32, i32
  }
  func.func @transform_1(%arg0: i32) -> (i32, i32) {
    %c0_i32 = arith.constant 0 : i32
    %c0_i32_0 = arith.constant 0 : i32
    %c0_i32_1 = arith.constant 0 : i32
    return %c0_i32, %c0_i32_0 : i32, i32
  }
  func.func @transform_2(%arg0: i32) -> (i32, i32) {
    %c0_i32 = arith.constant 0 : i32
    %c0_i32_0 = arith.constant 0 : i32
    %c0_i32_1 = arith.constant 0 : i32
    return %c0_i32, %c0_i32_0 : i32, i32
  }
  func.func @transform_3(%arg0: i32) -> (i32, i32) {
    %c0_i32 = arith.constant 0 : i32
    %c0_i32_0 = arith.constant 0 : i32
    %c0_i32_1 = arith.constant 0 : i32
    return %c0_i32, %c0_i32_0 : i32, i32
  }
  func.func @transform_4(%arg0: i32) -> (i32, i32) {
    %c0_i32 = arith.constant 0 : i32
    %c0_i32_0 = arith.constant 0 : i32
    %c0_i32_1 = arith.constant 0 : i32
    return %c0_i32, %c0_i32_0 : i32, i32
  }
  func.func @transform_5(%arg0: i32) -> (i32, i32) {
    %c0_i32 = arith.constant 0 : i32
    %c0_i32_0 = arith.constant 0 : i32
    %c0_i32_1 = arith.constant 0 : i32
    return %c0_i32, %c0_i32_0 : i32, i32
  }
  func.func @transform_6(%arg0: i32) -> (i32, i32) {
    %c0_i32 = arith.constant 0 : i32
    %c0_i32_0 = arith.constant 0 : i32
    %c0_i32_1 = arith.constant 0 : i32
    return %c0_i32, %c0_i32_0 : i32, i32
  }
  func.func @transform_7(%arg0: i32) -> (i32, i32) {
    %c0_i32 = arith.constant 0 : i32
    %c0_i32_0 = arith.constant 0 : i32
    %c0_i32_1 = arith.constant 0 : i32
    return %c0_i32, %c0_i32_0 : i32, i32
  }
  func.func @transform_8(%arg0: i32) -> (i32, i32) {
    %c0_i32 = arith.constant 0 : i32
    %c0_i32_0 = arith.constant 0 : i32
    %c0_i32_1 = arith.constant 0 : i32
    return %c0_i32, %c0_i32_0 : i32, i32
  }
  func.func @transform_9(%arg0: i32) -> (i32, i32) {
    %c0_i32 = arith.constant 0 : i32
    %c0_i32_0 = arith.constant 0 : i32
    %c0_i32_1 = arith.constant 0 : i32
    return %c0_i32, %c0_i32_0 : i32, i32
  }
  func.func @transform_10(%arg0: i32) -> (i32, i32) {
    %c0_i32 = arith.constant 0 : i32
    %c0_i32_0 = arith.constant 0 : i32
    %c0_i32_1 = arith.constant 0 : i32
    return %c0_i32, %c0_i32_0 : i32, i32
  }
  func.func @transform_11(%arg0: i32) -> (i32, i32) {
    %c0_i32 = arith.constant 0 : i32
    %c0_i32_0 = arith.constant 0 : i32
    %c0_i32_1 = arith.constant 0 : i32
    return %c0_i32, %c0_i32_0 : i32, i32
  }
  func.func @transform_12(%arg0: i32) -> (i32, i32) {
    %c0_i32 = arith.constant 0 : i32
    %c0_i32_0 = arith.constant 0 : i32
    %c0_i32_1 = arith.constant 0 : i32
    return %c0_i32, %c0_i32_0 : i32, i32
  }
  func.func @transform_13(%arg0: i32) -> (i32, i32) {
    %c0_i32 = arith.constant 0 : i32
    %c0_i32_0 = arith.constant 0 : i32
    %c0_i32_1 = arith.constant 0 : i32
    return %c0_i32, %c0_i32_0 : i32, i32
  }
  func.func @transform_14(%arg0: i32) -> (i32, i32) {
    %c0_i32 = arith.constant 0 : i32
    %c0_i32_0 = arith.constant 0 : i32
    %c0_i32_1 = arith.constant 0 : i32
    return %c0_i32, %c0_i32_0 : i32, i32
  }
}

module attributes {stable_mosaic.version = 11 : i64} {
  func.func @kernel(%arg0: i32, %arg1: memref<32x128xf32, #tpu.memory_space<vmem>>, %arg2: memref<128x128xbf16, #tpu.memory_space<vmem>>, %arg3: memref<1x128xf32, #tpu.memory_space<vmem>>, %arg4: memref<1x128xf32, #tpu.memory_space<vmem>>, %arg5: memref<32x128xf32, #tpu.memory_space<vmem>>, %arg6: memref<36x144xf32, #tpu.memory_space<vmem>>, %arg7: memref<3x144x128xbf16, #tpu.memory_space<vmem>>, %arg8: memref<1x128xf32, #tpu.memory_space<vmem>>, %arg9: memref<1x128xf32, #tpu.memory_space<vmem>>, %arg10: memref<32x128xf32, #tpu.memory_space<vmem>>) attributes {dimension_semantics = [#tpu.dimension_semantics<arbitrary>], iteration_bounds = array<i64: 1>, scalar_prefetch = 0 : i64, scratch_operands = 0 : i64, tpu.core_type = #tpu.core_type<tc>, window_params = [{pipeline_mode = #tpu.pipeline_mode<synchronous>, transform_indices = @transform_0, window_bounds = array<i64: 32, 128>}, {pipeline_mode = #tpu.pipeline_mode<synchronous>, transform_indices = @transform_1, window_bounds = array<i64: 128, 128>}, {pipeline_mode = #tpu.pipeline_mode<synchronous>, transform_indices = @transform_2, window_bounds = array<i64: 1, 128>}, {pipeline_mode = #tpu.pipeline_mode<synchronous>, transform_indices = @transform_3, window_bounds = array<i64: 1, 128>}, {pipeline_mode = #tpu.pipeline_mode<synchronous>, transform_indices = @transform_4, window_bounds = array<i64: 32, 128>}, {pipeline_mode = #tpu.pipeline_mode<synchronous>, transform_indices = @transform_5, window_bounds = array<i64: 36, 144>}, {pipeline_mode = #tpu.pipeline_mode<synchronous>, transform_indices = @transform_6, window_bounds = array<i64: 3, 144, 128>}, {pipeline_mode = #tpu.pipeline_mode<synchronous>, transform_indices = @transform_7, window_bounds = array<i64: 1, 128>}, {pipeline_mode = #tpu.pipeline_mode<synchronous>, transform_indices = @transform_8, window_bounds = array<i64: 1, 128>}, {pipeline_mode = #tpu.pipeline_mode<synchronous>, transform_indices = @transform_9, window_bounds = array<i64: 32, 128>}]} {
    %c0 = arith.constant 0 : index
    %c0_0 = arith.constant 0 : index
    %0 = vector.load %arg1[%c0, %c0_0] : memref<32x128xf32, #tpu.memory_space<vmem>>, vector<32x128xf32>
    %cst = arith.constant 0.000000e+00 : f32
    %1 = vector.broadcast %cst : f32 to vector<32x128xf32>
    %2 = arith.maximumf %0, %1 : vector<32x128xf32>
    %3 = arith.truncf %2 : vector<32x128xf32> to vector<32x128xbf16>
    %c0_1 = arith.constant 0 : index
    %c0_2 = arith.constant 0 : index
    %4 = vector.load %arg2[%c0_1, %c0_2] : memref<128x128xbf16, #tpu.memory_space<vmem>>, vector<128x128xbf16>
    %cst_3 = arith.constant dense<0.000000e+00> : vector<32x128xf32>
    %5 = tpu.matmul %3, %4, %cst_3 {dimension_numbers = #tpu.dot_dimension_numbers<[1], [0], [0], [1], [0, 0, 1, 1], [], []>} : vector<32x128xbf16>, vector<128x128xbf16>, vector<32x128xf32> -> vector<32x128xf32>
    %c0_4 = arith.constant 0 : index
    %c0_5 = arith.constant 0 : index
    %6 = vector.load %arg3[%c0_4, %c0_5] : memref<1x128xf32, #tpu.memory_space<vmem>>, vector<1x128xf32>
    %7 = vector.broadcast %6 : vector<1x128xf32> to vector<32x128xf32>
    %8 = arith.mulf %5, %7 : vector<32x128xf32>
    %c0_6 = arith.constant 0 : index
    %c0_7 = arith.constant 0 : index
    %9 = vector.load %arg4[%c0_6, %c0_7] : memref<1x128xf32, #tpu.memory_space<vmem>>, vector<1x128xf32>
    %10 = vector.broadcast %9 : vector<1x128xf32> to vector<32x128xf32>
    %11 = arith.addf %8, %10 : vector<32x128xf32>
    %c0_8 = arith.constant 0 : index
    %c0_9 = arith.constant 0 : index
    %12 = vector.load %arg5[%c0_8, %c0_9] : memref<32x128xf32, #tpu.memory_space<vmem>>, vector<32x128xf32>
    %13 = arith.addf %11, %12 : vector<32x128xf32>
    %c0_10 = arith.constant 0 : index
    %c0_11 = arith.constant 0 : index
    %14 = vector.load %arg6[%c0_10, %c0_11] : memref<36x144xf32, #tpu.memory_space<vmem>>, vector<16x144xf32>
    %cst_12 = arith.constant 0.000000e+00 : f32
    %15 = vector.broadcast %cst_12 : f32 to vector<16x144xf32>
    %16 = arith.maximumf %14, %15 : vector<16x144xf32>
    %17 = arith.truncf %16 : vector<16x144xf32> to vector<16x144xbf16>
    %c0_13 = arith.constant 0 : index
    %c0_14 = arith.constant 0 : index
    %c0_15 = arith.constant 0 : index
    %18 = vector.load %arg7[%c0_13, %c0_14, %c0_15] : memref<3x144x128xbf16, #tpu.memory_space<vmem>>, vector<1x144x128xbf16>
    %19 = vector.shape_cast %18 : vector<1x144x128xbf16> to vector<144x128xbf16>
    %cst_16 = arith.constant dense<0.000000e+00> : vector<16x128xf32>
    %20 = tpu.matmul %17, %19, %cst_16 {dimension_numbers = #tpu.dot_dimension_numbers<[1], [0], [0], [1], [0, 0, 1, 1], [], []>} : vector<16x144xbf16>, vector<144x128xbf16>, vector<16x128xf32> -> vector<16x128xf32>
    %c1 = arith.constant 1 : index
    %c0_17 = arith.constant 0 : index
    %21 = vector.load %arg6[%c1, %c0_17] : memref<36x144xf32, #tpu.memory_space<vmem>>, vector<16x144xf32>
    %cst_18 = arith.constant 0.000000e+00 : f32
    %22 = vector.broadcast %cst_18 : f32 to vector<16x144xf32>
    %23 = arith.maximumf %21, %22 : vector<16x144xf32>
    %24 = arith.truncf %23 : vector<16x144xf32> to vector<16x144xbf16>
    %c1_19 = arith.constant 1 : index
    %c0_20 = arith.constant 0 : index
    %c0_21 = arith.constant 0 : index
    %25 = vector.load %arg7[%c1_19, %c0_20, %c0_21] : memref<3x144x128xbf16, #tpu.memory_space<vmem>>, vector<1x144x128xbf16>
    %26 = vector.shape_cast %25 : vector<1x144x128xbf16> to vector<144x128xbf16>
    %cst_22 = arith.constant dense<0.000000e+00> : vector<16x128xf32>
    %27 = tpu.matmul %24, %26, %cst_22 {dimension_numbers = #tpu.dot_dimension_numbers<[1], [0], [0], [1], [0, 0, 1, 1], [], []>} : vector<16x144xbf16>, vector<144x128xbf16>, vector<16x128xf32> -> vector<16x128xf32>
    %28 = arith.addf %20, %27 : vector<16x128xf32>
    %c2 = arith.constant 2 : index
    %c0_23 = arith.constant 0 : index
    %29 = vector.load %arg6[%c2, %c0_23] : memref<36x144xf32, #tpu.memory_space<vmem>>, vector<16x144xf32>
    %cst_24 = arith.constant 0.000000e+00 : f32
    %30 = vector.broadcast %cst_24 : f32 to vector<16x144xf32>
    %31 = arith.maximumf %29, %30 : vector<16x144xf32>
    %32 = arith.truncf %31 : vector<16x144xf32> to vector<16x144xbf16>
    %c2_25 = arith.constant 2 : index
    %c0_26 = arith.constant 0 : index
    %c0_27 = arith.constant 0 : index
    %33 = vector.load %arg7[%c2_25, %c0_26, %c0_27] : memref<3x144x128xbf16, #tpu.memory_space<vmem>>, vector<1x144x128xbf16>
    %34 = vector.shape_cast %33 : vector<1x144x128xbf16> to vector<144x128xbf16>
    %cst_28 = arith.constant dense<0.000000e+00> : vector<16x128xf32>
    %35 = tpu.matmul %32, %34, %cst_28 {dimension_numbers = #tpu.dot_dimension_numbers<[1], [0], [0], [1], [0, 0, 1, 1], [], []>} : vector<16x144xbf16>, vector<144x128xbf16>, vector<16x128xf32> -> vector<16x128xf32>
    %36 = arith.addf %28, %35 : vector<16x128xf32>
    %c18 = arith.constant 18 : index
    %c0_29 = arith.constant 0 : index
    %37 = vector.load %arg6[%c18, %c0_29] : memref<36x144xf32, #tpu.memory_space<vmem>>, vector<16x144xf32>
    %cst_30 = arith.constant 0.000000e+00 : f32
    %38 = vector.broadcast %cst_30 : f32 to vector<16x144xf32>
    %39 = arith.maximumf %37, %38 : vector<16x144xf32>
    %40 = arith.truncf %39 : vector<16x144xf32> to vector<16x144xbf16>
    %c0_31 = arith.constant 0 : index
    %c0_32 = arith.constant 0 : index
    %c0_33 = arith.constant 0 : index
    %41 = vector.load %arg7[%c0_31, %c0_32, %c0_33] : memref<3x144x128xbf16, #tpu.memory_space<vmem>>, vector<1x144x128xbf16>
    %42 = vector.shape_cast %41 : vector<1x144x128xbf16> to vector<144x128xbf16>
    %cst_34 = arith.constant dense<0.000000e+00> : vector<16x128xf32>
    %43 = tpu.matmul %40, %42, %cst_34 {dimension_numbers = #tpu.dot_dimension_numbers<[1], [0], [0], [1], [0, 0, 1, 1], [], []>} : vector<16x144xbf16>, vector<144x128xbf16>, vector<16x128xf32> -> vector<16x128xf32>
    %c19 = arith.constant 19 : index
    %c0_35 = arith.constant 0 : index
    %44 = vector.load %arg6[%c19, %c0_35] : memref<36x144xf32, #tpu.memory_space<vmem>>, vector<16x144xf32>
    %cst_36 = arith.constant 0.000000e+00 : f32
    %45 = vector.broadcast %cst_36 : f32 to vector<16x144xf32>
    %46 = arith.maximumf %44, %45 : vector<16x144xf32>
    %47 = arith.truncf %46 : vector<16x144xf32> to vector<16x144xbf16>
    %c1_37 = arith.constant 1 : index
    %c0_38 = arith.constant 0 : index
    %c0_39 = arith.constant 0 : index
    %48 = vector.load %arg7[%c1_37, %c0_38, %c0_39] : memref<3x144x128xbf16, #tpu.memory_space<vmem>>, vector<1x144x128xbf16>
    %49 = vector.shape_cast %48 : vector<1x144x128xbf16> to vector<144x128xbf16>
    %cst_40 = arith.constant dense<0.000000e+00> : vector<16x128xf32>
    %50 = tpu.matmul %47, %49, %cst_40 {dimension_numbers = #tpu.dot_dimension_numbers<[1], [0], [0], [1], [0, 0, 1, 1], [], []>} : vector<16x144xbf16>, vector<144x128xbf16>, vector<16x128xf32> -> vector<16x128xf32>
    %51 = arith.addf %43, %50 : vector<16x128xf32>
    %c20 = arith.constant 20 : index
    %c0_41 = arith.constant 0 : index
    %52 = vector.load %arg6[%c20, %c0_41] : memref<36x144xf32, #tpu.memory_space<vmem>>, vector<16x144xf32>
    %cst_42 = arith.constant 0.000000e+00 : f32
    %53 = vector.broadcast %cst_42 : f32 to vector<16x144xf32>
    %54 = arith.maximumf %52, %53 : vector<16x144xf32>
    %55 = arith.truncf %54 : vector<16x144xf32> to vector<16x144xbf16>
    %c2_43 = arith.constant 2 : index
    %c0_44 = arith.constant 0 : index
    %c0_45 = arith.constant 0 : index
    %56 = vector.load %arg7[%c2_43, %c0_44, %c0_45] : memref<3x144x128xbf16, #tpu.memory_space<vmem>>, vector<1x144x128xbf16>
    %57 = vector.shape_cast %56 : vector<1x144x128xbf16> to vector<144x128xbf16>
    %cst_46 = arith.constant dense<0.000000e+00> : vector<16x128xf32>
    %58 = tpu.matmul %55, %57, %cst_46 {dimension_numbers = #tpu.dot_dimension_numbers<[1], [0], [0], [1], [0, 0, 1, 1], [], []>} : vector<16x144xbf16>, vector<144x128xbf16>, vector<16x128xf32> -> vector<16x128xf32>
    %59 = arith.addf %51, %58 : vector<16x128xf32>
    %60 = tpu.concatenate %36, %59 in 0 : vector<16x128xf32>, vector<16x128xf32> -> vector<32x128xf32>
    %c0_47 = arith.constant 0 : index
    %c0_48 = arith.constant 0 : index
    %61 = vector.load %arg8[%c0_47, %c0_48] : memref<1x128xf32, #tpu.memory_space<vmem>>, vector<1x128xf32>
    %62 = vector.broadcast %61 : vector<1x128xf32> to vector<32x128xf32>
    %63 = arith.mulf %60, %62 : vector<32x128xf32>
    %c0_49 = arith.constant 0 : index
    %c0_50 = arith.constant 0 : index
    %64 = vector.load %arg9[%c0_49, %c0_50] : memref<1x128xf32, #tpu.memory_space<vmem>>, vector<1x128xf32>
    %65 = vector.broadcast %64 : vector<1x128xf32> to vector<32x128xf32>
    %66 = arith.addf %63, %65 : vector<32x128xf32>
    %67 = arith.addf %13, %66 : vector<32x128xf32>
    %c0_51 = arith.constant 0 : index
    %c0_52 = arith.constant 0 : index
    %68 = vector.load %arg10[%c0_51, %c0_52] : memref<32x128xf32, #tpu.memory_space<vmem>>, vector<32x128xf32>
    tpu.vector_store %arg10[%c0_51, %c0_52], %67 {strides = array<i32>} : memref<32x128xf32, #tpu.memory_space<vmem>>, vector<32x128xf32>,
    return
  }
  func.func @transform_0(%arg0: i32) -> (i32, i32) {
    %c0_i32 = arith.constant 0 : i32
    %c0_i32_0 = arith.constant 0 : i32
    %c0_i32_1 = arith.constant 0 : i32
    return %c0_i32, %c0_i32_0 : i32, i32
  }
  func.func @transform_1(%arg0: i32) -> (i32, i32) {
    %c0_i32 = arith.constant 0 : i32
    %c0_i32_0 = arith.constant 0 : i32
    %c0_i32_1 = arith.constant 0 : i32
    return %c0_i32, %c0_i32_0 : i32, i32
  }
  func.func @transform_2(%arg0: i32) -> (i32, i32) {
    %c0_i32 = arith.constant 0 : i32
    %c0_i32_0 = arith.constant 0 : i32
    %c0_i32_1 = arith.constant 0 : i32
    return %c0_i32, %c0_i32_0 : i32, i32
  }
  func.func @transform_3(%arg0: i32) -> (i32, i32) {
    %c0_i32 = arith.constant 0 : i32
    %c0_i32_0 = arith.constant 0 : i32
    %c0_i32_1 = arith.constant 0 : i32
    return %c0_i32, %c0_i32_0 : i32, i32
  }
  func.func @transform_4(%arg0: i32) -> (i32, i32) {
    %c0_i32 = arith.constant 0 : i32
    %c0_i32_0 = arith.constant 0 : i32
    %c0_i32_1 = arith.constant 0 : i32
    return %c0_i32, %c0_i32_0 : i32, i32
  }
  func.func @transform_5(%arg0: i32) -> (i32, i32) {
    %c0_i32 = arith.constant 0 : i32
    %c0_i32_0 = arith.constant 0 : i32
    %c0_i32_1 = arith.constant 0 : i32
    return %c0_i32, %c0_i32_0 : i32, i32
  }
  func.func @transform_6(%arg0: i32) -> (i32, i32, i32) {
    %c0_i32 = arith.constant 0 : i32
    %c0_i32_0 = arith.constant 0 : i32
    %c0_i32_1 = arith.constant 0 : i32
    %c0_i32_2 = arith.constant 0 : i32
    return %c0_i32, %c0_i32_0, %c0_i32_1 : i32, i32, i32
  }
  func.func @transform_7(%arg0: i32) -> (i32, i32) {
    %c0_i32 = arith.constant 0 : i32
    %c0_i32_0 = arith.constant 0 : i32
    %c0_i32_1 = arith.constant 0 : i32
    return %c0_i32, %c0_i32_0 : i32, i32
  }
  func.func @transform_8(%arg0: i32) -> (i32, i32) {
    %c0_i32 = arith.constant 0 : i32
    %c0_i32_0 = arith.constant 0 : i32
    %c0_i32_1 = arith.constant 0 : i32
    return %c0_i32, %c0_i32_0 : i32, i32
  }
  func.func @transform_9(%arg0: i32) -> (i32, i32) {
    %c0_i32 = arith.constant 0 : i32
    %c0_i32_0 = arith.constant 0 : i32
    %c0_i32_1 = arith.constant 0 : i32
    return %c0_i32, %c0_i32_0 : i32, i32
  }
}

module attributes {stable_mosaic.version = 11 : i64} {
  func.func @kernel(%arg0: i32, %arg1: memref<36x144xf32, #tpu.memory_space<vmem>>, %arg2: memref<3x144x128xbf16, #tpu.memory_space<vmem>>, %arg3: memref<1x128xf32, #tpu.memory_space<vmem>>, %arg4: memref<1x128xf32, #tpu.memory_space<vmem>>, %arg5: memref<32x128xf32, #tpu.memory_space<vmem>>, %arg6: memref<128x128xbf16, #tpu.memory_space<vmem>>, %arg7: memref<1x128xf32, #tpu.memory_space<vmem>>, %arg8: memref<1x128xf32, #tpu.memory_space<vmem>>, %arg9: memref<32x128xf32, #tpu.memory_space<vmem>>, %arg10: memref<32x128xf32, #tpu.memory_space<vmem>>) attributes {dimension_semantics = [#tpu.dimension_semantics<arbitrary>], iteration_bounds = array<i64: 1>, scalar_prefetch = 0 : i64, scratch_operands = 0 : i64, tpu.core_type = #tpu.core_type<tc>, window_params = [{pipeline_mode = #tpu.pipeline_mode<synchronous>, transform_indices = @transform_0, window_bounds = array<i64: 36, 144>}, {pipeline_mode = #tpu.pipeline_mode<synchronous>, transform_indices = @transform_1, window_bounds = array<i64: 3, 144, 128>}, {pipeline_mode = #tpu.pipeline_mode<synchronous>, transform_indices = @transform_2, window_bounds = array<i64: 1, 128>}, {pipeline_mode = #tpu.pipeline_mode<synchronous>, transform_indices = @transform_3, window_bounds = array<i64: 1, 128>}, {pipeline_mode = #tpu.pipeline_mode<synchronous>, transform_indices = @transform_4, window_bounds = array<i64: 32, 128>}, {pipeline_mode = #tpu.pipeline_mode<synchronous>, transform_indices = @transform_5, window_bounds = array<i64: 128, 128>}, {pipeline_mode = #tpu.pipeline_mode<synchronous>, transform_indices = @transform_6, window_bounds = array<i64: 1, 128>}, {pipeline_mode = #tpu.pipeline_mode<synchronous>, transform_indices = @transform_7, window_bounds = array<i64: 1, 128>}, {pipeline_mode = #tpu.pipeline_mode<synchronous>, transform_indices = @transform_8, window_bounds = array<i64: 32, 128>}, {pipeline_mode = #tpu.pipeline_mode<synchronous>, transform_indices = @transform_9, window_bounds = array<i64: 32, 128>}]} {
    %c0 = arith.constant 0 : index
    %c0_0 = arith.constant 0 : index
    %0 = vector.load %arg1[%c0, %c0_0] : memref<36x144xf32, #tpu.memory_space<vmem>>, vector<16x144xf32>
    %cst = arith.constant 0.000000e+00 : f32
    %1 = vector.broadcast %cst : f32 to vector<16x144xf32>
    %2 = arith.maximumf %0, %1 : vector<16x144xf32>
    %3 = arith.truncf %2 : vector<16x144xf32> to vector<16x144xbf16>
    %c0_1 = arith.constant 0 : index
    %c0_2 = arith.constant 0 : index
    %c0_3 = arith.constant 0 : index
    %4 = vector.load %arg2[%c0_1, %c0_2, %c0_3] : memref<3x144x128xbf16, #tpu.memory_space<vmem>>, vector<1x144x128xbf16>
    %5 = vector.shape_cast %4 : vector<1x144x128xbf16> to vector<144x128xbf16>
    %cst_4 = arith.constant dense<0.000000e+00> : vector<16x128xf32>
    %6 = tpu.matmul %3, %5, %cst_4 {dimension_numbers = #tpu.dot_dimension_numbers<[1], [0], [0], [1], [0, 0, 1, 1], [], []>} : vector<16x144xbf16>, vector<144x128xbf16>, vector<16x128xf32> -> vector<16x128xf32>
    %c1 = arith.constant 1 : index
    %c0_5 = arith.constant 0 : index
    %7 = vector.load %arg1[%c1, %c0_5] : memref<36x144xf32, #tpu.memory_space<vmem>>, vector<16x144xf32>
    %cst_6 = arith.constant 0.000000e+00 : f32
    %8 = vector.broadcast %cst_6 : f32 to vector<16x144xf32>
    %9 = arith.maximumf %7, %8 : vector<16x144xf32>
    %10 = arith.truncf %9 : vector<16x144xf32> to vector<16x144xbf16>
    %c1_7 = arith.constant 1 : index
    %c0_8 = arith.constant 0 : index
    %c0_9 = arith.constant 0 : index
    %11 = vector.load %arg2[%c1_7, %c0_8, %c0_9] : memref<3x144x128xbf16, #tpu.memory_space<vmem>>, vector<1x144x128xbf16>
    %12 = vector.shape_cast %11 : vector<1x144x128xbf16> to vector<144x128xbf16>
    %cst_10 = arith.constant dense<0.000000e+00> : vector<16x128xf32>
    %13 = tpu.matmul %10, %12, %cst_10 {dimension_numbers = #tpu.dot_dimension_numbers<[1], [0], [0], [1], [0, 0, 1, 1], [], []>} : vector<16x144xbf16>, vector<144x128xbf16>, vector<16x128xf32> -> vector<16x128xf32>
    %14 = arith.addf %6, %13 : vector<16x128xf32>
    %c2 = arith.constant 2 : index
    %c0_11 = arith.constant 0 : index
    %15 = vector.load %arg1[%c2, %c0_11] : memref<36x144xf32, #tpu.memory_space<vmem>>, vector<16x144xf32>
    %cst_12 = arith.constant 0.000000e+00 : f32
    %16 = vector.broadcast %cst_12 : f32 to vector<16x144xf32>
    %17 = arith.maximumf %15, %16 : vector<16x144xf32>
    %18 = arith.truncf %17 : vector<16x144xf32> to vector<16x144xbf16>
    %c2_13 = arith.constant 2 : index
    %c0_14 = arith.constant 0 : index
    %c0_15 = arith.constant 0 : index
    %19 = vector.load %arg2[%c2_13, %c0_14, %c0_15] : memref<3x144x128xbf16, #tpu.memory_space<vmem>>, vector<1x144x128xbf16>
    %20 = vector.shape_cast %19 : vector<1x144x128xbf16> to vector<144x128xbf16>
    %cst_16 = arith.constant dense<0.000000e+00> : vector<16x128xf32>
    %21 = tpu.matmul %18, %20, %cst_16 {dimension_numbers = #tpu.dot_dimension_numbers<[1], [0], [0], [1], [0, 0, 1, 1], [], []>} : vector<16x144xbf16>, vector<144x128xbf16>, vector<16x128xf32> -> vector<16x128xf32>
    %22 = arith.addf %14, %21 : vector<16x128xf32>
    %c18 = arith.constant 18 : index
    %c0_17 = arith.constant 0 : index
    %23 = vector.load %arg1[%c18, %c0_17] : memref<36x144xf32, #tpu.memory_space<vmem>>, vector<16x144xf32>
    %cst_18 = arith.constant 0.000000e+00 : f32
    %24 = vector.broadcast %cst_18 : f32 to vector<16x144xf32>
    %25 = arith.maximumf %23, %24 : vector<16x144xf32>
    %26 = arith.truncf %25 : vector<16x144xf32> to vector<16x144xbf16>
    %c0_19 = arith.constant 0 : index
    %c0_20 = arith.constant 0 : index
    %c0_21 = arith.constant 0 : index
    %27 = vector.load %arg2[%c0_19, %c0_20, %c0_21] : memref<3x144x128xbf16, #tpu.memory_space<vmem>>, vector<1x144x128xbf16>
    %28 = vector.shape_cast %27 : vector<1x144x128xbf16> to vector<144x128xbf16>
    %cst_22 = arith.constant dense<0.000000e+00> : vector<16x128xf32>
    %29 = tpu.matmul %26, %28, %cst_22 {dimension_numbers = #tpu.dot_dimension_numbers<[1], [0], [0], [1], [0, 0, 1, 1], [], []>} : vector<16x144xbf16>, vector<144x128xbf16>, vector<16x128xf32> -> vector<16x128xf32>
    %c19 = arith.constant 19 : index
    %c0_23 = arith.constant 0 : index
    %30 = vector.load %arg1[%c19, %c0_23] : memref<36x144xf32, #tpu.memory_space<vmem>>, vector<16x144xf32>
    %cst_24 = arith.constant 0.000000e+00 : f32
    %31 = vector.broadcast %cst_24 : f32 to vector<16x144xf32>
    %32 = arith.maximumf %30, %31 : vector<16x144xf32>
    %33 = arith.truncf %32 : vector<16x144xf32> to vector<16x144xbf16>
    %c1_25 = arith.constant 1 : index
    %c0_26 = arith.constant 0 : index
    %c0_27 = arith.constant 0 : index
    %34 = vector.load %arg2[%c1_25, %c0_26, %c0_27] : memref<3x144x128xbf16, #tpu.memory_space<vmem>>, vector<1x144x128xbf16>
    %35 = vector.shape_cast %34 : vector<1x144x128xbf16> to vector<144x128xbf16>
    %cst_28 = arith.constant dense<0.000000e+00> : vector<16x128xf32>
    %36 = tpu.matmul %33, %35, %cst_28 {dimension_numbers = #tpu.dot_dimension_numbers<[1], [0], [0], [1], [0, 0, 1, 1], [], []>} : vector<16x144xbf16>, vector<144x128xbf16>, vector<16x128xf32> -> vector<16x128xf32>
    %37 = arith.addf %29, %36 : vector<16x128xf32>
    %c20 = arith.constant 20 : index
    %c0_29 = arith.constant 0 : index
    %38 = vector.load %arg1[%c20, %c0_29] : memref<36x144xf32, #tpu.memory_space<vmem>>, vector<16x144xf32>
    %cst_30 = arith.constant 0.000000e+00 : f32
    %39 = vector.broadcast %cst_30 : f32 to vector<16x144xf32>
    %40 = arith.maximumf %38, %39 : vector<16x144xf32>
    %41 = arith.truncf %40 : vector<16x144xf32> to vector<16x144xbf16>
    %c2_31 = arith.constant 2 : index
    %c0_32 = arith.constant 0 : index
    %c0_33 = arith.constant 0 : index
    %42 = vector.load %arg2[%c2_31, %c0_32, %c0_33] : memref<3x144x128xbf16, #tpu.memory_space<vmem>>, vector<1x144x128xbf16>
    %43 = vector.shape_cast %42 : vector<1x144x128xbf16> to vector<144x128xbf16>
    %cst_34 = arith.constant dense<0.000000e+00> : vector<16x128xf32>
    %44 = tpu.matmul %41, %43, %cst_34 {dimension_numbers = #tpu.dot_dimension_numbers<[1], [0], [0], [1], [0, 0, 1, 1], [], []>} : vector<16x144xbf16>, vector<144x128xbf16>, vector<16x128xf32> -> vector<16x128xf32>
    %45 = arith.addf %37, %44 : vector<16x128xf32>
    %46 = tpu.concatenate %22, %45 in 0 : vector<16x128xf32>, vector<16x128xf32> -> vector<32x128xf32>
    %c0_35 = arith.constant 0 : index
    %c0_36 = arith.constant 0 : index
    %47 = vector.load %arg3[%c0_35, %c0_36] : memref<1x128xf32, #tpu.memory_space<vmem>>, vector<1x128xf32>
    %48 = vector.broadcast %47 : vector<1x128xf32> to vector<32x128xf32>
    %49 = arith.mulf %46, %48 : vector<32x128xf32>
    %c0_37 = arith.constant 0 : index
    %c0_38 = arith.constant 0 : index
    %50 = vector.load %arg4[%c0_37, %c0_38] : memref<1x128xf32, #tpu.memory_space<vmem>>, vector<1x128xf32>
    %51 = vector.broadcast %50 : vector<1x128xf32> to vector<32x128xf32>
    %52 = arith.addf %49, %51 : vector<32x128xf32>
    %c0_39 = arith.constant 0 : index
    %c0_40 = arith.constant 0 : index
    %53 = vector.load %arg5[%c0_39, %c0_40] : memref<32x128xf32, #tpu.memory_space<vmem>>, vector<32x128xf32>
    %cst_41 = arith.constant 0.000000e+00 : f32
    %54 = vector.broadcast %cst_41 : f32 to vector<32x128xf32>
    %55 = arith.maximumf %53, %54 : vector<32x128xf32>
    %56 = arith.truncf %55 : vector<32x128xf32> to vector<32x128xbf16>
    %c0_42 = arith.constant 0 : index
    %c0_43 = arith.constant 0 : index
    %57 = vector.load %arg6[%c0_42, %c0_43] : memref<128x128xbf16, #tpu.memory_space<vmem>>, vector<128x128xbf16>
    %cst_44 = arith.constant dense<0.000000e+00> : vector<32x128xf32>
    %58 = tpu.matmul %56, %57, %cst_44 {dimension_numbers = #tpu.dot_dimension_numbers<[1], [0], [0], [1], [0, 0, 1, 1], [], []>} : vector<32x128xbf16>, vector<128x128xbf16>, vector<32x128xf32> -> vector<32x128xf32>
    %c0_45 = arith.constant 0 : index
    %c0_46 = arith.constant 0 : index
    %59 = vector.load %arg7[%c0_45, %c0_46] : memref<1x128xf32, #tpu.memory_space<vmem>>, vector<1x128xf32>
    %60 = vector.broadcast %59 : vector<1x128xf32> to vector<32x128xf32>
    %61 = arith.mulf %58, %60 : vector<32x128xf32>
    %c0_47 = arith.constant 0 : index
    %c0_48 = arith.constant 0 : index
    %62 = vector.load %arg8[%c0_47, %c0_48] : memref<1x128xf32, #tpu.memory_space<vmem>>, vector<1x128xf32>
    %63 = vector.broadcast %62 : vector<1x128xf32> to vector<32x128xf32>
    %64 = arith.addf %61, %63 : vector<32x128xf32>
    %65 = arith.addf %52, %64 : vector<32x128xf32>
    %c0_49 = arith.constant 0 : index
    %c0_50 = arith.constant 0 : index
    %66 = vector.load %arg9[%c0_49, %c0_50] : memref<32x128xf32, #tpu.memory_space<vmem>>, vector<32x128xf32>
    %67 = arith.addf %65, %66 : vector<32x128xf32>
    %c0_51 = arith.constant 0 : index
    %c0_52 = arith.constant 0 : index
    %68 = vector.load %arg10[%c0_51, %c0_52] : memref<32x128xf32, #tpu.memory_space<vmem>>, vector<32x128xf32>
    tpu.vector_store %arg10[%c0_51, %c0_52], %67 {strides = array<i32>} : memref<32x128xf32, #tpu.memory_space<vmem>>, vector<32x128xf32>,
    return
  }
  func.func @transform_0(%arg0: i32) -> (i32, i32) {
    %c0_i32 = arith.constant 0 : i32
    %c0_i32_0 = arith.constant 0 : i32
    %c0_i32_1 = arith.constant 0 : i32
    return %c0_i32, %c0_i32_0 : i32, i32
  }
  func.func @transform_1(%arg0: i32) -> (i32, i32, i32) {
    %c0_i32 = arith.constant 0 : i32
    %c0_i32_0 = arith.constant 0 : i32
    %c0_i32_1 = arith.constant 0 : i32
    %c0_i32_2 = arith.constant 0 : i32
    return %c0_i32, %c0_i32_0, %c0_i32_1 : i32, i32, i32
  }
  func.func @transform_2(%arg0: i32) -> (i32, i32) {
    %c0_i32 = arith.constant 0 : i32
    %c0_i32_0 = arith.constant 0 : i32
    %c0_i32_1 = arith.constant 0 : i32
    return %c0_i32, %c0_i32_0 : i32, i32
  }
  func.func @transform_3(%arg0: i32) -> (i32, i32) {
    %c0_i32 = arith.constant 0 : i32
    %c0_i32_0 = arith.constant 0 : i32
    %c0_i32_1 = arith.constant 0 : i32
    return %c0_i32, %c0_i32_0 : i32, i32
  }
  func.func @transform_4(%arg0: i32) -> (i32, i32) {
    %c0_i32 = arith.constant 0 : i32
    %c0_i32_0 = arith.constant 0 : i32
    %c0_i32_1 = arith.constant 0 : i32
    return %c0_i32, %c0_i32_0 : i32, i32
  }
  func.func @transform_5(%arg0: i32) -> (i32, i32) {
    %c0_i32 = arith.constant 0 : i32
    %c0_i32_0 = arith.constant 0 : i32
    %c0_i32_1 = arith.constant 0 : i32
    return %c0_i32, %c0_i32_0 : i32, i32
  }
  func.func @transform_6(%arg0: i32) -> (i32, i32) {
    %c0_i32 = arith.constant 0 : i32
    %c0_i32_0 = arith.constant 0 : i32
    %c0_i32_1 = arith.constant 0 : i32
    return %c0_i32, %c0_i32_0 : i32, i32
  }
  func.func @transform_7(%arg0: i32) -> (i32, i32) {
    %c0_i32 = arith.constant 0 : i32
    %c0_i32_0 = arith.constant 0 : i32
    %c0_i32_1 = arith.constant 0 : i32
    return %c0_i32, %c0_i32_0 : i32, i32
  }
  func.func @transform_8(%arg0: i32) -> (i32, i32) {
    %c0_i32 = arith.constant 0 : i32
    %c0_i32_0 = arith.constant 0 : i32
    %c0_i32_1 = arith.constant 0 : i32
    return %c0_i32, %c0_i32_0 : i32, i32
  }
  func.func @transform_9(%arg0: i32) -> (i32, i32) {
    %c0_i32 = arith.constant 0 : i32
    %c0_i32_0 = arith.constant 0 : i32
    %c0_i32_1 = arith.constant 0 : i32
    return %c0_i32, %c0_i32_0 : i32, i32
  }
}

module attributes {stable_mosaic.version = 11 : i64} {
  func.func @kernel(%arg0: i32, %arg1: memref<32x128xf32, #tpu.memory_space<vmem>>, %arg2: memref<32x128xf32, #tpu.memory_space<vmem>>, %arg3: memref<32x128xf32, #tpu.memory_space<vmem>>, %arg4: memref<32x128xf32, #tpu.memory_space<vmem>>, %arg5: memref<32x128xf32, #tpu.memory_space<vmem>>, %arg6: memref<5x128x256xbf16, #tpu.memory_space<vmem>>, %arg7: memref<1x256xf32, #tpu.memory_space<vmem>>, %arg8: memref<1x256xf32, #tpu.memory_space<vmem>>, %arg9: memref<32x256xf32, #tpu.memory_space<vmem>>) attributes {dimension_semantics = [#tpu.dimension_semantics<arbitrary>], iteration_bounds = array<i64: 1>, scalar_prefetch = 0 : i64, scratch_operands = 0 : i64, tpu.core_type = #tpu.core_type<tc>, window_params = [{pipeline_mode = #tpu.pipeline_mode<synchronous>, transform_indices = @transform_0, window_bounds = array<i64: 32, 128>}, {pipeline_mode = #tpu.pipeline_mode<synchronous>, transform_indices = @transform_1, window_bounds = array<i64: 32, 128>}, {pipeline_mode = #tpu.pipeline_mode<synchronous>, transform_indices = @transform_2, window_bounds = array<i64: 32, 128>}, {pipeline_mode = #tpu.pipeline_mode<synchronous>, transform_indices = @transform_3, window_bounds = array<i64: 32, 128>}, {pipeline_mode = #tpu.pipeline_mode<synchronous>, transform_indices = @transform_4, window_bounds = array<i64: 32, 128>}, {pipeline_mode = #tpu.pipeline_mode<synchronous>, transform_indices = @transform_5, window_bounds = array<i64: 5, 128, 256>}, {pipeline_mode = #tpu.pipeline_mode<synchronous>, transform_indices = @transform_6, window_bounds = array<i64: 1, 256>}, {pipeline_mode = #tpu.pipeline_mode<synchronous>, transform_indices = @transform_7, window_bounds = array<i64: 1, 256>}, {pipeline_mode = #tpu.pipeline_mode<synchronous>, transform_indices = @transform_8, window_bounds = array<i64: 32, 256>}]} {
    %c0 = arith.constant 0 : index
    %c0_0 = arith.constant 0 : index
    %0 = vector.load %arg1[%c0, %c0_0] : memref<32x128xf32, #tpu.memory_space<vmem>>, vector<32x128xf32>
    %cst = arith.constant 0.000000e+00 : f32
    %1 = vector.broadcast %cst : f32 to vector<32x128xf32>
    %2 = arith.maximumf %0, %1 : vector<32x128xf32>
    %3 = arith.truncf %2 : vector<32x128xf32> to vector<32x128xbf16>
    %c0_1 = arith.constant 0 : index
    %c0_2 = arith.constant 0 : index
    %c0_3 = arith.constant 0 : index
    %4 = vector.load %arg6[%c0_1, %c0_2, %c0_3] : memref<5x128x256xbf16, #tpu.memory_space<vmem>>, vector<1x128x256xbf16>
    %5 = vector.shape_cast %4 : vector<1x128x256xbf16> to vector<128x256xbf16>
    %cst_4 = arith.constant dense<0.000000e+00> : vector<32x256xf32>
    %6 = tpu.matmul %3, %5, %cst_4 {dimension_numbers = #tpu.dot_dimension_numbers<[1], [0], [0], [1], [0, 0, 1, 1], [], []>} : vector<32x128xbf16>, vector<128x256xbf16>, vector<32x256xf32> -> vector<32x256xf32>
    %c0_5 = arith.constant 0 : index
    %c0_6 = arith.constant 0 : index
    %7 = vector.load %arg2[%c0_5, %c0_6] : memref<32x128xf32, #tpu.memory_space<vmem>>, vector<32x128xf32>
    %cst_7 = arith.constant 0.000000e+00 : f32
    %8 = vector.broadcast %cst_7 : f32 to vector<32x128xf32>
    %9 = arith.maximumf %7, %8 : vector<32x128xf32>
    %10 = arith.truncf %9 : vector<32x128xf32> to vector<32x128xbf16>
    %c1 = arith.constant 1 : index
    %c0_8 = arith.constant 0 : index
    %c0_9 = arith.constant 0 : index
    %11 = vector.load %arg6[%c1, %c0_8, %c0_9] : memref<5x128x256xbf16, #tpu.memory_space<vmem>>, vector<1x128x256xbf16>
    %12 = vector.shape_cast %11 : vector<1x128x256xbf16> to vector<128x256xbf16>
    %cst_10 = arith.constant dense<0.000000e+00> : vector<32x256xf32>
    %13 = tpu.matmul %10, %12, %cst_10 {dimension_numbers = #tpu.dot_dimension_numbers<[1], [0], [0], [1], [0, 0, 1, 1], [], []>} : vector<32x128xbf16>, vector<128x256xbf16>, vector<32x256xf32> -> vector<32x256xf32>
    %14 = arith.addf %6, %13 : vector<32x256xf32>
    %c0_11 = arith.constant 0 : index
    %c0_12 = arith.constant 0 : index
    %15 = vector.load %arg3[%c0_11, %c0_12] : memref<32x128xf32, #tpu.memory_space<vmem>>, vector<32x128xf32>
    %cst_13 = arith.constant 0.000000e+00 : f32
    %16 = vector.broadcast %cst_13 : f32 to vector<32x128xf32>
    %17 = arith.maximumf %15, %16 : vector<32x128xf32>
    %18 = arith.truncf %17 : vector<32x128xf32> to vector<32x128xbf16>
    %c2 = arith.constant 2 : index
    %c0_14 = arith.constant 0 : index
    %c0_15 = arith.constant 0 : index
    %19 = vector.load %arg6[%c2, %c0_14, %c0_15] : memref<5x128x256xbf16, #tpu.memory_space<vmem>>, vector<1x128x256xbf16>
    %20 = vector.shape_cast %19 : vector<1x128x256xbf16> to vector<128x256xbf16>
    %cst_16 = arith.constant dense<0.000000e+00> : vector<32x256xf32>
    %21 = tpu.matmul %18, %20, %cst_16 {dimension_numbers = #tpu.dot_dimension_numbers<[1], [0], [0], [1], [0, 0, 1, 1], [], []>} : vector<32x128xbf16>, vector<128x256xbf16>, vector<32x256xf32> -> vector<32x256xf32>
    %22 = arith.addf %14, %21 : vector<32x256xf32>
    %c0_17 = arith.constant 0 : index
    %c0_18 = arith.constant 0 : index
    %23 = vector.load %arg4[%c0_17, %c0_18] : memref<32x128xf32, #tpu.memory_space<vmem>>, vector<32x128xf32>
    %cst_19 = arith.constant 0.000000e+00 : f32
    %24 = vector.broadcast %cst_19 : f32 to vector<32x128xf32>
    %25 = arith.maximumf %23, %24 : vector<32x128xf32>
    %26 = arith.truncf %25 : vector<32x128xf32> to vector<32x128xbf16>
    %c3 = arith.constant 3 : index
    %c0_20 = arith.constant 0 : index
    %c0_21 = arith.constant 0 : index
    %27 = vector.load %arg6[%c3, %c0_20, %c0_21] : memref<5x128x256xbf16, #tpu.memory_space<vmem>>, vector<1x128x256xbf16>
    %28 = vector.shape_cast %27 : vector<1x128x256xbf16> to vector<128x256xbf16>
    %cst_22 = arith.constant dense<0.000000e+00> : vector<32x256xf32>
    %29 = tpu.matmul %26, %28, %cst_22 {dimension_numbers = #tpu.dot_dimension_numbers<[1], [0], [0], [1], [0, 0, 1, 1], [], []>} : vector<32x128xbf16>, vector<128x256xbf16>, vector<32x256xf32> -> vector<32x256xf32>
    %30 = arith.addf %22, %29 : vector<32x256xf32>
    %c0_23 = arith.constant 0 : index
    %c0_24 = arith.constant 0 : index
    %31 = vector.load %arg5[%c0_23, %c0_24] : memref<32x128xf32, #tpu.memory_space<vmem>>, vector<32x128xf32>
    %cst_25 = arith.constant 0.000000e+00 : f32
    %32 = vector.broadcast %cst_25 : f32 to vector<32x128xf32>
    %33 = arith.maximumf %31, %32 : vector<32x128xf32>
    %34 = arith.truncf %33 : vector<32x128xf32> to vector<32x128xbf16>
    %c4 = arith.constant 4 : index
    %c0_26 = arith.constant 0 : index
    %c0_27 = arith.constant 0 : index
    %35 = vector.load %arg6[%c4, %c0_26, %c0_27] : memref<5x128x256xbf16, #tpu.memory_space<vmem>>, vector<1x128x256xbf16>
    %36 = vector.shape_cast %35 : vector<1x128x256xbf16> to vector<128x256xbf16>
    %cst_28 = arith.constant dense<0.000000e+00> : vector<32x256xf32>
    %37 = tpu.matmul %34, %36, %cst_28 {dimension_numbers = #tpu.dot_dimension_numbers<[1], [0], [0], [1], [0, 0, 1, 1], [], []>} : vector<32x128xbf16>, vector<128x256xbf16>, vector<32x256xf32> -> vector<32x256xf32>
    %38 = arith.addf %30, %37 : vector<32x256xf32>
    %c0_29 = arith.constant 0 : index
    %c0_30 = arith.constant 0 : index
    %39 = vector.load %arg7[%c0_29, %c0_30] : memref<1x256xf32, #tpu.memory_space<vmem>>, vector<1x256xf32>
    %40 = vector.broadcast %39 : vector<1x256xf32> to vector<32x256xf32>
    %41 = arith.mulf %38, %40 : vector<32x256xf32>
    %c0_31 = arith.constant 0 : index
    %c0_32 = arith.constant 0 : index
    %42 = vector.load %arg8[%c0_31, %c0_32] : memref<1x256xf32, #tpu.memory_space<vmem>>, vector<1x256xf32>
    %43 = vector.broadcast %42 : vector<1x256xf32> to vector<32x256xf32>
    %44 = arith.addf %41, %43 : vector<32x256xf32>
    %c0_33 = arith.constant 0 : index
    %c0_34 = arith.constant 0 : index
    %45 = vector.load %arg9[%c0_33, %c0_34] : memref<32x256xf32, #tpu.memory_space<vmem>>, vector<32x256xf32>
    tpu.vector_store %arg9[%c0_33, %c0_34], %44 {strides = array<i32>} : memref<32x256xf32, #tpu.memory_space<vmem>>, vector<32x256xf32>,
    return
  }
  func.func @transform_0(%arg0: i32) -> (i32, i32) {
    %c0_i32 = arith.constant 0 : i32
    %c0_i32_0 = arith.constant 0 : i32
    %c0_i32_1 = arith.constant 0 : i32
    return %c0_i32, %c0_i32_0 : i32, i32
  }
  func.func @transform_1(%arg0: i32) -> (i32, i32) {
    %c0_i32 = arith.constant 0 : i32
    %c0_i32_0 = arith.constant 0 : i32
    %c0_i32_1 = arith.constant 0 : i32
    return %c0_i32, %c0_i32_0 : i32, i32
  }
  func.func @transform_2(%arg0: i32) -> (i32, i32) {
    %c0_i32 = arith.constant 0 : i32
    %c0_i32_0 = arith.constant 0 : i32
    %c0_i32_1 = arith.constant 0 : i32
    return %c0_i32, %c0_i32_0 : i32, i32
  }
  func.func @transform_3(%arg0: i32) -> (i32, i32) {
    %c0_i32 = arith.constant 0 : i32
    %c0_i32_0 = arith.constant 0 : i32
    %c0_i32_1 = arith.constant 0 : i32
    return %c0_i32, %c0_i32_0 : i32, i32
  }
  func.func @transform_4(%arg0: i32) -> (i32, i32) {
    %c0_i32 = arith.constant 0 : i32
    %c0_i32_0 = arith.constant 0 : i32
    %c0_i32_1 = arith.constant 0 : i32
    return %c0_i32, %c0_i32_0 : i32, i32
  }
  func.func @transform_5(%arg0: i32) -> (i32, i32, i32) {
    %c0_i32 = arith.constant 0 : i32
    %c0_i32_0 = arith.constant 0 : i32
    %c0_i32_1 = arith.constant 0 : i32
    %c0_i32_2 = arith.constant 0 : i32
    return %c0_i32, %c0_i32_0, %c0_i32_1 : i32, i32, i32
  }
  func.func @transform_6(%arg0: i32) -> (i32, i32) {
    %c0_i32 = arith.constant 0 : i32
    %c0_i32_0 = arith.constant 0 : i32
    %c0_i32_1 = arith.constant 0 : i32
    return %c0_i32, %c0_i32_0 : i32, i32
  }
  func.func @transform_7(%arg0: i32) -> (i32, i32) {
    %c0_i32 = arith.constant 0 : i32
    %c0_i32_0 = arith.constant 0 : i32
    %c0_i32_1 = arith.constant 0 : i32
    return %c0_i32, %c0_i32_0 : i32, i32
  }
  func.func @transform_8(%arg0: i32) -> (i32, i32) {
    %c0_i32 = arith.constant 0 : i32
    %c0_i32_0 = arith.constant 0 : i32
    %c0_i32_1 = arith.constant 0 : i32
    return %c0_i32, %c0_i32_0 : i32, i32
  }
}

</mosaic_0001>

<bundles_post_ra>
// kernel: fused_head_cell.4
= control target key start
LH: loop header
LB: loop body
LE: loop exit
PB: predicated region body
PF: predicated region fallthrough
CT: control target
= control target key end

     0   :  { %s766_s4 = inlined_call_operand.vmem [shape: bf16[128,128], index: 4, kind: input, shape index: {}]   ;;  %s767_s5 = inlined_call_operand.vmem [shape: bf16[128,128], index: 5, kind: input, shape index: {}]   ;;  %s768_s3 = inlined_call_operand.vmem [shape: bf16[128,128], index: 3, kind: input, shape index: {}]   ;;  %s769_s7 = inlined_call_operand.vmem [shape: f32[1,128], index: 7, kind: input, shape index: {}]   ;;  %s770_s10 = inlined_call_operand.vmem [shape: f32[1,128], index: 10, kind: input, shape index: {}]   ;;  %s771_s1 = inlined_call_operand.vmem [shape: f32[32,128], index: 1, kind: input, shape index: {}]   ;;  %s772_s2 = inlined_call_operand.vmem [shape: f32[32,128], index: 2, kind: input, shape index: {}]   ;;  %s773_s0 = inlined_call_operand.vmem [shape: f32[32,128], index: 0, kind: input, shape index: {}]   ;;  %s774_s8 = inlined_call_operand.vmem [shape: f32[1,128], index: 8, kind: input, shape index: {}]   ;;  %s775_s11 = inlined_call_operand.vmem [shape: f32[1,128], index: 11, kind: input, shape index: {}]   ;;  %s776_s6 = inlined_call_operand.vmem [shape: f32[1,128], index: 6, kind: input, shape index: {}]   ;;  %s777_s9 = inlined_call_operand.vmem [shape: f32[1,128], index: 9, kind: input, shape index: {}]   ;;  %s778_s13 = inlined_call_operand.vmem [shape: f32[32,128], index: 13, kind: output, shape index: {1}]   ;;  %s779_s12 = inlined_call_operand.vmem [shape: f32[32,128], index: 12, kind: output, shape index: {0}]   ;;  %s780_s14 = inlined_call_operand.vmem [shape: f32[32,128], index: 14, kind: output, shape index: {2}]  }
   0x1   :  { %v506_v0 = vld [vmem:[%s766_s4 + $0x38] sm:$0xff]  ;;  %v505_v3 = vld [vmem:[%s766_s4 + $0x30] sm:$0xff]  ;;  %v504_v6 = vld [vmem:[%s766_s4 + $0x28] sm:$0xff] }
   0x2   :  { %v514_v1 = vld [vmem:[%s767_s5 + $0x38] sm:$0xff]  ;;  %231 = vmatpush.bf16.msra.mxu1 %v506_v0  ;;  %v513_v4 = vld [vmem:[%s767_s5 + $0x30] sm:$0xff]  ;;  %v512_v7 = vld [vmem:[%s767_s5 + $0x28] sm:$0xff] }
   0x3   :  { %v498_v2 = vld [vmem:[%s768_s3 + $0x38] sm:$0xff]  ;;  %344 = vmatpush.bf16.msra.mxu2 %v514_v1  ;;  %v497_v5 = vld [vmem:[%s768_s3 + $0x30] sm:$0xff]  ;;  %v496_v8 = vld [vmem:[%s768_s3 + $0x28] sm:$0xff] }
   0x4   :  { %515 = vmatpush.bf16.msra.mxu3 %v498_v2  ;;  %118 = vmatpush.bf16.msra.mxu0 %v498_v2  ;;  %v503_v9 = vld [vmem:[%s766_s4 + $0x20] sm:$0xff]  ;;  %v502_v12 = vld [vmem:[%s766_s4 + $0x18] sm:$0xff]  ;;  %v501_v15 = vld [vmem:[%s766_s4 + $0x10] sm:$0xff] }
   0x5   :  { %v511_v10 = vld [vmem:[%s767_s5 + $0x20] sm:$0xff]  ;;  %v510_v13 = vld [vmem:[%s767_s5 + $0x18] sm:$0xff]  ;;  %v509_v16 = vld [vmem:[%s767_s5 + $0x10] sm:$0xff] }
   0x6   :  { %232 = vmatpush.bf16.msra.mxu1 %v505_v3  ;;  %v495_v11 = vld [vmem:[%s768_s3 + $0x20] sm:$0xff]  ;;  %v494_v14 = vld [vmem:[%s768_s3 + $0x18] sm:$0xff]  ;;  %v493_v17 = vld [vmem:[%s768_s3 + $0x10] sm:$0xff] }
   0x7   :  { %345 = vmatpush.bf16.msra.mxu2 %v513_v4  ;;  %v500_v18 = vld [vmem:[%s766_s4 + $0x8] sm:$0xff]  ;;  %v157_v20 = vld [vmem:[%s771_s1] sm:$0xff]  ;;  %v46_v25 = vld [vmem:[%s773_s0 + $0x10] sm:$0xff] }
   0x8   :  { %516 = vmatpush.bf16.msra.mxu3 %v497_v5  ;;  %119 = vmatpush.bf16.msra.mxu0 %v497_v5  ;;  %v508_v19 = vld [vmem:[%s767_s5 + $0x8] sm:$0xff]  ;;  %v270_v22 = vld [vmem:[%s772_s2] sm:$0xff]  ;;  %v47_v26 = vld [vmem:[%s773_s0 + $0x18] sm:$0xff]  ;;  %v161_v29 = vmax.f32 %v157_v20, 0.0  ;;  %v50_v35 = vmax.f32 %v46_v25, 0.0 }
   0x9   :  { %v158_v21 = vld [vmem:[%s771_s1 + $0x8] sm:$0xff]  ;;  %v44_v27 = vld [vmem:[%s773_s0] sm:$0xff]  ;;  %v274_v31 = vmax.f32 %v270_v22, 0.0  ;;  %v51_v36 = vmax.f32 %v47_v26, 0.0  ;;  %v159_v44 = vld [vmem:[%s771_s1 + $0x10] sm:$0xff] }
   0xa   :  { %233 = vmatpush.bf16.msra.mxu1 %v504_v6  ;;  %v271_v23 = vld [vmem:[%s772_s2 + $0x8] sm:$0xff]  ;;  %v162_v30 = vmax.f32 %v158_v21, 0.0  ;;  %v499_v33 = vld [vmem:[%s766_s4] sm:$0xff]  ;;  %v48_v37 = vmax.f32 %v44_v27, 0.0  ;;  %v160_v45 = vld [vmem:[%s771_s1 + $0x18] sm:$0xff]  ;;  %v163_v48 = vmax.f32 %v159_v44, 0.0 }
   0xb   :  { %346 = vmatpush.bf16.msra.mxu2 %v512_v7  ;;  %v492_v24 = vld [vmem:[%s768_s3 + $0x8] sm:$0xff]  ;;  %v275_v32 = vmax.f32 %v271_v23, 0.0  ;;  %v507_v34 = vld [vmem:[%s767_s5] sm:$0xff]  ;;  %v53_v42 = vpack.c.bf16 %v51_v36, %v50_v35  ;;  %v272_v46 = vld [vmem:[%s772_s2 + $0x10] sm:$0xff]  ;;  %v164_v49 = vmax.f32 %v160_v45, 0.0 }
   0xc   :  { %517 = vmatpush.bf16.msra.mxu3 %v496_v8  ;;  %120 = vmatpush.bf16.msra.mxu0 %v496_v8  ;;  %v45_v28 = vld [vmem:[%s773_s0 + $0x8] sm:$0xff]  ;;  %v491_v39 = vld [vmem:[%s768_s3] sm:$0xff]  ;;  %v165_v40 = vpack.c.bf16 %v162_v30, %v161_v29  ;;  %v273_v47 = vld [vmem:[%s772_s2 + $0x18] sm:$0xff]  ;;  %v276_v50 = vmax.f32 %v272_v46, 0.0 }
   0xd   :  { %v49_v38 = vmax.f32 %v45_v28, 0.0  ;;  %v278_v41 = vpack.c.bf16 %v275_v32, %v274_v31  ;;  %v277_v51 = vmax.f32 %v273_v47, 0.0  ;;  %v166_v52 = vpack.c.bf16 %v164_v49, %v163_v48  ;;  %v523_v54 = vld [vmem:[%s769_s7] ss:$0 sm:$0xff] }
   0xe   :  { %234 = vmatpush.bf16.msra.mxu1 %v503_v9  ;;  %v527_v55 = vld [vmem:[%s776_s6] ss:$0 sm:$0xff] }
   0xf   :  { %347 = vmatpush.bf16.msra.mxu2 %v511_v10  ;;  %v52_v43 = vpack.c.bf16 %v49_v38, %v48_v37  ;;  %v279_v53 = vpack.c.bf16 %v277_v51, %v276_v50  ;;  %v524_v56 = vld [vmem:[%s770_s10] ss:$0 sm:$0xff] }
  0x10   :  { %518 = vmatpush.bf16.msra.mxu3 %v495_v11  ;;  %121 = vmatpush.bf16.msra.mxu0 %v495_v11  ;;  %v528_v58 = vld [vmem:[%s777_s9] ss:$0 sm:$0xff] }
  0x11   :  { %v525_v63 = vld [vmem:[%s774_s8] ss:$0 sm:$0xff] }
  0x12   :  { %235 = vmatpush.bf16.msra.mxu1 %v502_v12  ;;  %v526_v1 = vld [vmem:[%s775_s11] ss:$0 sm:$0xff] }
  0x13   :  { %348 = vmatpush.bf16.msra.mxu2 %v510_v13 }
  0x14   :  { %519 = vmatpush.bf16.msra.mxu3 %v494_v14  ;;  %122 = vmatpush.bf16.msra.mxu0 %v494_v14 }
  0x16   :  { %236 = vmatpush.bf16.msra.mxu1 %v501_v15 }
  0x17   :  { %349 = vmatpush.bf16.msra.mxu2 %v509_v16 }
  0x18   :  { %520 = vmatpush.bf16.msra.mxu3 %v493_v17  ;;  %123 = vmatpush.bf16.msra.mxu0 %v493_v17 }
  0x1a   :  { %237 = vmatpush.bf16.msra.mxu1 %v500_v18 }
  0x1b   :  { %350 = vmatpush.bf16.msra.mxu2 %v508_v19 }
  0x1c   :  { %521 = vmatpush.bf16.msra.mxu3 %v492_v24  ;;  %124 = vmatpush.bf16.msra.mxu0 %v492_v24 }
  0x1e   :  { %238 = vmatpush.bf16.msra.mxu1 %v499_v33 }
  0x1f   :  { %351 = vmatpush.bf16.msra.mxu2 %v507_v34 }
  0x20   :  { %522 = vmatpush.bf16.msra.mxu3 %v491_v39  ;;  %125 = vmatpush.bf16.msra.mxu0 %v491_v39 }
  0x21   :  { %239 = vmatmul.bf16.vlgmr.msra.gmra.mxu1 %v165_v40 }
  0x22   :  { %352 = vmatmul.bf16.vlgmr.msra.gmra.mxu2 %v278_v41 }
  0x23   :  { %131 = vmatmul.bf16.vlgmr.msra.gmra.mxu3 %v53_v42  ;;  %126 = vmatmul.bf16.vlgmr.msra.gmra.mxu0 %v52_v43 }
  0x31   :  { %244 = vmatmul.bf16.gmra.mxu1 %v166_v52 }
  0x32   :  { %357 = vmatmul.bf16.gmra.mxu2 %v279_v53 }
  0x9e   :  { %v240_v57 = vpop.f32.mrf.mxu1 }
  0x9f   :  { %v254_v59 = vmul.f32 %v523_v54, %v240_v57 }
  0xa0   :  { %v127_v60 = vpop.f32.mrf.mxu0 }
  0xa1   :  { %v141_v61 = vmul.f32 %v527_v55, %v127_v60  ;;  %v262_v62 = vadd.f32 %v524_v56, %v254_v59 }
  0xa3   :  { %v149_v0 = vadd.f32 %v528_v58, %v141_v61  ;;  %266 = vst [vmem:[%s778_s13] sm:$0xff] %v262_v62 }
  0xa5   :  { %v353_v2 = vpop.f32.mrf.mxu2  ;;  %153 = vst [vmem:[%s779_s12] sm:$0xff] %v149_v0 }
  0xa6   :  { %v367_v3 = vmul.f32 %v525_v63, %v353_v2  ;;  %v132_v4 = vpop.f32.mrf.mxu3  ;;  %v242_v5 = vpop.f32.mrf.mxu1 }
  0xa7   :  { %v143_v6 = vmul.f32 %v527_v55, %v132_v4  ;;  %v255_v8 = vmul.f32 %v523_v54, %v242_v5 }
  0xa8   :  { %v375_v7 = vadd.f32 %v526_v1, %v367_v3  ;;  %v129_v9 = vpop.f32.mrf.mxu0 }
  0xa9   :  { %v151_v10 = vadd.f32 %v528_v58, %v143_v6  ;;  %v142_v11 = vmul.f32 %v527_v55, %v129_v9  ;;  %v263_v12 = vadd.f32 %v524_v56, %v255_v8 }
  0xaa   :  { %379 = vst [vmem:[%s780_s14] sm:$0xff] %v375_v7 }
  0xab   :  { %155 = vst [vmem:[%s779_s12 + $0x10] sm:$0xff] %v151_v10  ;;  %v150_v13 = vadd.f32 %v528_v58, %v142_v11 }
  0xac   :  { %267 = vst [vmem:[%s778_s13 + $0x8] sm:$0xff] %v263_v12 }
  0xad   :  { %v355_v14 = vpop.f32.mrf.mxu2  ;;  %154 = vst [vmem:[%s779_s12 + $0x8] sm:$0xff] %v150_v13 }
  0xae   :  { %v368_v15 = vmul.f32 %v525_v63, %v355_v14  ;;  %v134_v16 = vpop.f32.mrf.mxu3  ;;  %v245_v17 = vpop.f32.mrf.mxu1 }
  0xaf   :  { %v144_v18 = vmul.f32 %v527_v55, %v134_v16  ;;  %v256_v20 = vmul.f32 %v523_v54, %v245_v17 }
  0xb0   :  { %v376_v19 = vadd.f32 %v526_v1, %v368_v15 }
  0xb1   :  { %v152_v21 = vadd.f32 %v528_v58, %v144_v18  ;;  %v264_v22 = vadd.f32 %v524_v56, %v256_v20 }
  0xb2   :  { %380 = vst [vmem:[%s780_s14 + $0x8] sm:$0xff] %v376_v19 }
  0xb3   :  { %156 = vst [vmem:[%s779_s12 + $0x18] sm:$0xff] %v152_v21 }
  0xb4   :  { %268 = vst [vmem:[%s778_s13 + $0x10] sm:$0xff] %v264_v22 }
  0xb5   :  { %v358_v23 = vpop.f32.mrf.mxu2 }
  0xb6   :  { %v369_v24 = vmul.f32 %v525_v63, %v358_v23  ;;  %v247_v25 = vpop.f32.mrf.mxu1 }
  0xb7   :  { %v257_v27 = vmul.f32 %v523_v54, %v247_v25 }
  0xb8   :  { %v377_v26 = vadd.f32 %v526_v1, %v369_v24 }
  0xb9   :  { %v265_v28 = vadd.f32 %v524_v56, %v257_v27 }
  0xba   :  { %381 = vst [vmem:[%s780_s14 + $0x10] sm:$0xff] %v377_v26 }
  0xbb   :  { %269 = vst [vmem:[%s778_s13 + $0x18] sm:$0xff] %v265_v28 }
  0xbd   :  { %v360_v29 = vpop.f32.mrf.mxu2 }
  0xbe   :  { %v370_v30 = vmul.f32 %v525_v63, %v360_v29 }
  0xc0   :  { %v378_v31 = vadd.f32 %v526_v1, %v370_v30 }
  0xc2   :  { %382 = vst [vmem:[%s780_s14 + $0x18] sm:$0xff] %v378_v31 }

// kernel: fused_head_cell.5
= control target key start
LH: loop header
LB: loop body
LE: loop exit
PB: predicated region body
PF: predicated region fallthrough
CT: control target
= control target key end

     0   :  { %vm209_vm0 = vsmask.f32 7424  ;;  %vm289_vm1 = vcmask 130048   ;;  %vm441_vm2 = vcmask 1046528   ;;  %vm564_vm3 = vsmask.f32 6400  ;;  %s1405_s1 = inlined_call_operand.vmem [shape: bf16[128,128], index: 1, kind: input, shape index: {}]   ;;  %s1406_s6 = inlined_call_operand.vmem [shape: bf16[3,144,128], index: 6, kind: input, shape index: {}]   ;;  %s1407_s5 = inlined_call_operand.vmem [shape: f32[36,144], index: 5, kind: input, shape index: {}]   ;;  %s1408_s0 = inlined_call_operand.vmem [shape: f32[32,128], index: 0, kind: input, shape index: {}]   ;;  %s1409_s2 = inlined_call_operand.vmem [shape: f32[1,128], index: 2, kind: input, shape index: {}]   ;;  %s1410_s3 = inlined_call_operand.vmem [shape: f32[1,128], index: 3, kind: input, shape index: {}]   ;;  %s1411_s7 = inlined_call_operand.vmem [shape: f32[1,128], index: 7, kind: input, shape index: {}]   ;;  %s1412_s8 = inlined_call_operand.vmem [shape: f32[1,128], index: 8, kind: input, shape index: {}]   ;;  %s1413_s4 = inlined_call_operand.vmem [shape: f32[32,128], index: 4, kind: input, shape index: {}]   ;;  %s1414_s9 = inlined_call_operand.vmem [shape: f32[32,128], index: 9, kind: output, shape index: {}]  }
   0x1   :  { %v947_v0 = vld [vmem:[%s1405_s1 + $0x38] sm:$0xff]  ;;  %v1035_v1 = vld [vmem:[%s1406_s6 + $0x80] sm:$0xff]  ;;  %v1040_v2 = vld [vmem:[%s1406_s6 + $0x88] sm:$0xff]  ;;  %vm689_vm4 = vcmask 1045504  }
   0x2   :  { %v1045_v3 = vld [vmem:[%s1406_s6 + $0x38] sm:$0xff]  ;;  %v946_v4 = vld [vmem:[%s1405_s1 + $0x30] sm:$0xff]  ;;  %107 = vmatpush.bf16.msra.mxu0 %v947_v0  ;;  %293 = vmatpush.bf16.msra.mxu1 %v1035_v1  ;;  %v1059_v6 = vld [vmem:[%s1406_s6 + $0x40] sm:$0xff] }
   0x3   :  { %v1054_v5 = vld [vmem:[%s1406_s6 + $0x78] sm:$0xff]  ;;  %v1064_v7 = vld [vmem:[%s1406_s6 + $0xc8] sm:$0xff]  ;;  %314 = vmatpush.bf16.msra.mxu3 %v1040_v2  ;;  %399 = vmatpush.bf16.msra.mxu2 %v1059_v6  ;;  %v1072_v8 = vld [vmem:[%s1406_s6 + $0x30] sm:$0xff] }
   0x4   :  { %v945_v9 = vld [vmem:[%s1405_s1 + $0x28] sm:$0xff]  ;;  %v1081_v10 = vld [vmem:[%s1406_s6 + $0xc0] sm:$0xff]  ;;  %v1087_v11 = vld [vmem:[%s1406_s6 + $0x70] sm:$0xff] }
   0x5   :  { %v153_v12 = vld [vmem:[%s1407_s5 + $0x18] sm:$0xff]  ;;  %v179_v13 = vld [vmem:[%s1407_s5 + $0x8] sm:$0xfe]  ;;  %v181_v15 = vld [vmem:[%s1407_s5 + $0x28] sm:$0x1] }
   0x6   :  { %108 = vmatpush.bf16.msra.mxu0 %v946_v4  ;;  %294 = vmatpush.bf16.msra.mxu1 %v1054_v5  ;;  %v1095_v14 = vmax.f32 %v153_v12, 0.0  ;;  %v183_v16 = vmax.f32 %v179_v13, 0.0  ;;  %v1104_v17 = vld [vmem:[%s1406_s6 + $0x28] sm:$0xff]  ;;  %v185_v18 = vmax.f32 %v181_v15, 0.0  ;;  %v1110_v19 = vld [vmem:[%s1406_s6 + $0xb8] sm:$0xff]  ;;  %v944_v21 = vld [vmem:[%s1405_s1 + $0x20] sm:$0xff] }
   0x7   :  { %378 = vmatpush.bf16.msrb.mxu3 %v1045_v3  ;;  %506 = vmatpush.bf16.msrb.mxu2 %v1064_v7  ;;  %v1120_v22 = vld [vmem:[%s1406_s6 + $0x68] sm:$0xff]  ;;  %v1129_v28 = vld [vmem:[%s1406_s6 + $0x20] sm:$0xff]  ;;  %v943_v29 = vld [vmem:[%s1405_s1 + $0x18] sm:$0xff] }
   0x8   :  { %v187_v20 = vpack.c.bf16 %v1095_v14, %v183_v16  ;;  %v189_v23 = vpack.c.bf16 %v185_v18, %v185_v18  ;;  %v151_v24 = vld [vmem:[%s1407_s5 + $0x8] sm:$0xff]  ;;  %v1138_v32 = vld [vmem:[%s1406_s6 + $0xb0] sm:$0xff]  ;;  %v178_v35 = vld [vmem:[%s1407_s5] sm:$0xfe] }
   0x9   :  { %v155_v27 = vmax.f32 %v151_v24, 0.0  ;;  %v152_v34 = vld [vmem:[%s1407_s5 + $0x10] sm:$0xff]  ;;  %v1151_v36 = vld [vmem:[%s1406_s6 + $0x60] sm:$0xff]  ;;  %v182_v40 = vmax.f32 %v178_v35, 0.0  ;;  %v1163_v43 = vld [vmem:[%s1406_s6 + $0x18] sm:$0xff] }
   0xa   :  { %109 = vmatpush.bf16.msra.mxu0 %v945_v9  ;;  %295 = vmatpush.bf16.msra.mxu1 %v1087_v11  ;;  %v223_v25 = vshrl.u32 %v187_v20, 16  ;;  %v225_v26 = vshll.u32 %v187_v20, 16  ;;  %v230_v30 = vshll.u32 %v189_v23, 16  ;;  %v1153_v38 = vmax.f32 %v152_v34, 0.0  ;;  %v180_v39 = vld [vmem:[%s1407_s5 + $0x20] sm:$0x1] }
   0xb   :  { %379 = vmatpush.bf16.msrb.mxu3 %v1072_v8  ;;  %507 = vmatpush.bf16.msrb.mxu2 %v1081_v10  ;;  %v159_v33 = vpack.c.bf16 %v1095_v14, %v155_v27  ;;  %v184_v42 = vmax.f32 %v180_v39, 0.0  ;;  %v1171_v46 = vld [vmem:[%s1406_s6 + $0xa8] sm:$0xff]  ;;  %v942_v47 = vld [vmem:[%s1405_s1 + $0x10] sm:$0xff]  ;;  %v1180_v48 = vld [vmem:[%s1406_s6 + $0x58] sm:$0xff] }
   0xc   :  { %v227_v31 = vrot.slane %v225_v26, 1  ;;  %v232_v37 = vrot.slane %v230_v30, 1  ;;  %v186_v44 = vpack.c.bf16 %v1153_v38, %v182_v40  ;;  %v406_v51 = vld [vmem:[%s1407_s5] sm:$0xfc]  ;;  %v408_v52 = vld [vmem:[%s1407_s5 + $0x20] sm:$0x3] }
   0xd   :  { %881 = vmatmul.msk.bf16.vlgmr.msra.gmra.mxu2 %vm289_vm1, %v159_v33  ;;  %v188_v49 = vpack.c.bf16 %v184_v42, %v184_v42  ;;  %v1193_v53 = vld [vmem:[%s1406_s6 + $0x10] sm:$0xff]  ;;  %v941_v54 = vld [vmem:[%s1405_s1 + $0x8] sm:$0xff]  ;;  %v1202_v55 = vld [vmem:[%s1406_s6 + $0xa0] sm:$0xff]  ;;  %v410_v57 = vmax.f32 %v406_v51, 0.0  ;;  %v412_v63 = vmax.f32 %v408_v52, 0.0 }
   0xe   :  { %110 = vmatpush.bf16.msra.mxu0 %v944_v21  ;;  %296 = vmatpush.bf16.msra.mxu1 %v1120_v22  ;;  %v228_v41 = vor.u32 %v227_v31, %v223_v25  ;;  %v213_v50 = vshll.u32 %v186_v44, 16  ;;  %v33_v56 = vld [vmem:[%s1408_s0] sm:$0xff]  ;;  %v1211_v58 = vld [vmem:[%s1406_s6 + $0x50] sm:$0xff]  ;;  %v34_v59 = vld [vmem:[%s1408_s0 + $0x8] sm:$0xff]  ;;  %v211_v60 = vshrl.u32 %v186_v44, 16 }
   0xf   :  { %380 = vmatpush.bf16.msrb.mxu3 %v1104_v17  ;;  %508 = vmatpush.bf16.msrb.mxu2 %v1110_v19  ;;  %v218_v62 = vshll.u32 %v188_v49, 16  ;;  %v1220_v0 = vld [vmem:[%s1406_s6 + $0x8] sm:$0xff]  ;;  %v1225_v4 = vld [vmem:[%s1406_s6 + $0x98] sm:$0xff]  ;;  %v37_v9 = vmax.f32 %v33_v56, 0.0  ;;  %v150_v12 = vld [vmem:[%s1407_s5] sm:$0xff]  ;;  %v38_v13 = vmax.f32 %v34_v59, 0.0  ;;  %v414_v25 = vpack.c.bf16 %v1153_v38, %v410_v57 }
  0x10   :  { %v233_v45 = vsel %vm209_vm0, %v228_v41, %v232_v37  ;;  %v215_v61 = vrot.slane %v213_v50, 1  ;;  %v539_v15 = vld [vmem:[%s1407_s5 + $0x38] sm:$0xff]  ;;  %v553_v16 = vld [vmem:[%s1407_s5 + $0x28] sm:$0xf8]  ;;  %v555_v18 = vld [vmem:[%s1407_s5 + $0x48] sm:$0x7]  ;;  %v416_v26 = vpack.c.bf16 %v412_v63, %v412_v63 }
  0x11   :  { %844 = vmatmul.msk.bf16.vlgmr.msra.gmra.mxu3 %vm289_vm1, %v233_v45  ;;  %v940_v20 = vld [vmem:[%s1405_s1] sm:$0xff]  ;;  %v1247_v21 = vld [vmem:[%s1406_s6 + $0x48] sm:$0xff]  ;;  %v220_v24 = vrot.slane %v218_v62, 1  ;;  %v154_v27 = vmax.f32 %v150_v12, 0.0  ;;  %v1261_v31 = vmax.f32 %v539_v15, 0.0  ;;  %v557_v33 = vmax.f32 %v553_v16, 0.0 }
  0x12   :  { %111 = vmatpush.bf16.msra.mxu0 %v943_v29  ;;  %297 = vmatpush.bf16.msra.mxu1 %v1151_v36  ;;  %v216_v23 = vor.u32 %v215_v61, %v211_v60  ;;  %v1253_v29 = vld [vmem:[%s1406_s6 + $0xd0] sm:$0xff]  ;;  %v1259_v30 = vld [vmem:[%s1406_s6] sm:$0xff]  ;;  %v559_v34 = vmax.f32 %v555_v18, 0.0  ;;  %v41_v35 = vpack.c.bf16 %v38_v13, %v37_v9  ;;  %v442_v40 = vrot.slane %v414_v25, 1  ;;  %v407_v44 = vld [vmem:[%s1407_s5 + $0x8] sm:$0xfc] }
  0x13   :  { %381 = vmatpush.bf16.msrb.mxu3 %v1129_v28  ;;  %509 = vmatpush.bf16.msrb.mxu2 %v1138_v32  ;;  %v1269_v39 = vld [vmem:[%s1406_s6 + $0x90] sm:$0xff]  ;;  %v443_v41 = vrot.slane %v416_v26, 1  ;;  %v158_v42 = vpack.c.bf16 %v1153_v38, %v154_v27  ;;  %v409_v45 = vld [vmem:[%s1407_s5 + $0x28] sm:$0x3]  ;;  %v411_v38 = vmax.f32 %v407_v44, 0.0 }
  0x14   :  { %v221_v37 = vsel %vm209_vm0, %v216_v23, %v220_v24  ;;  %v563_v49 = vpack.c.bf16 %v559_v34, %v559_v34  ;;  %v413_v50 = vmax.f32 %v409_v45, 0.0  ;;  %v538_v57 = vld [vmem:[%s1407_s5 + $0x30] sm:$0xff]  ;;  %v552_v59 = vld [vmem:[%s1407_s5 + $0x20] sm:$0xf8]  ;;  %v537_v27 = vld [vmem:[%s1407_s5 + $0x28] sm:$0xfc] }
  0x15   :  { %v544_v9 = vmax.f32 %v538_v57, 0.0  ;;  %v556_v12 = vmax.f32 %v552_v59, 0.0 }
  0x16   :  { %112 = vmatpush.bf16.msra.mxu0 %v942_v47  ;;  %298 = vmatpush.bf16.msra.mxu1 %v1180_v48  ;;  %v561_v47 = vpack.c.bf16 %v1261_v31, %v557_v33  ;;  %v594_v56 = vshll.u32 %v563_v49, 16 }
  0x17   :  { %382 = vmatpush.bf16.msrb.mxu3 %v1163_v43  ;;  %510 = vmatpush.bf16.msrb.mxu2 %v1171_v46 }
  0x18   :  { %v583_v51 = vshrl.u32 %v561_v47, 16  ;;  %v586_v52 = vshll.u32 %v561_v47, 16  ;;  %v596_v61 = vrot.slane %v594_v56, 2 }
  0x1a   :  { %113 = vmatpush.bf16.msra.mxu0 %v941_v54  ;;  %299 = vmatpush.bf16.msra.mxu1 %v1211_v58  ;;  %v591_v54 = vshrl.u32 %v563_v49, 16  ;;  %v588_v60 = vrot.slane %v586_v52, 2 }
  0x1b   :  { %383 = vmatpush.bf16.msrb.mxu3 %v1193_v53  ;;  %511 = vmatpush.bf16.msrb.mxu2 %v1202_v55 }
  0x1e   :  { %114 = vmatpush.bf16.msra.mxu0 %v940_v20  ;;  %300 = vmatpush.bf16.msra.mxu1 %v1247_v21  ;;  %v560_v20 = vpack.c.bf16 %v544_v9, %v556_v12 }
  0x1f   :  { %384 = vmatpush.bf16.msrb.mxu3 %v1220_v0  ;;  %512 = vmatpush.bf16.msrb.mxu2 %v1225_v4 }
  0x20   :  { %v566_v25 = vshrl.u32 %v560_v20, 16  ;;  %v569_v26 = vshll.u32 %v560_v20, 16 }
  0x21   :  { %115 = vmatmul.bf16.vlgmr.msra.gmra.mxu0 %v41_v35  ;;  %301 = vmatmul.bf16.vlgmr.msra.gmra.mxu1 %v221_v37 }
  0x22   :  { %603 = vmatpush.bf16.msrb.mxu0 %v1035_v1  ;;  %527 = vmatpush.bf16.msrb.mxu1 %v1253_v29  ;;  %v444_v1 = vsel %vm441_vm2, %v442_v40, %v443_v41  ;;  %v568_v45 = vrot.slane %v566_v25, 1  ;;  %v571_v47 = vrot.slane %v569_v26, 2 }
  0x23   :  { %385 = vmatpush.bf16.msrb.mxu3 %v1259_v30  ;;  %513 = vmatpush.bf16.msrb.mxu2 %v1269_v39 }
  0x26   :  { %645 = vmatpush.bf16.msra.mxu1 %v1045_v3  ;;  %386 = vmatmul.bf16.vlgmr.msrb.gmra.mxu3 %v158_v42  ;;  %v35_v3 = vld [vmem:[%s1408_s0 + $0x10] sm:$0xff]  ;;  %v543_v42 = vmax.f32 %v537_v27, 0.0 }
  0x27   :  { %700 = vmatpush.bf16.msra.mxu2 %v1064_v7  ;;  %604 = vmatpush.bf16.msrb.mxu0 %v1054_v5  ;;  %v36_v7 = vld [vmem:[%s1408_s0 + $0x18] sm:$0xff]  ;;  %v415_v5 = vpack.c.bf16 %v1095_v14, %v411_v38  ;;  %v593_v14 = vrot.slane %v591_v54, 1  ;;  %v39_v62 = vmax.f32 %v35_v3, 0.0 }
  0x28   :  { %624 = vmatpush.bf16.msra.mxu3 %v1040_v2  ;;  %514 = vmatmul.bf16.vlgmr.msrb.gmra.mxu2 %v444_v1  ;;  %v417_v2 = vpack.c.bf16 %v413_v50, %v413_v50  ;;  %v40_v63 = vmax.f32 %v36_v7, 0.0 }
  0x29   :  { %v445_v13 = vrot.slane %v415_v5, 1  ;;  %v597_v18 = vor.u32 %v596_v61, %v593_v14 }
  0x2a   :  { %646 = vmatpush.bf16.msra.mxu1 %v1072_v8  ;;  %v585_v8 = vrot.slane %v583_v51, 1  ;;  %v446_v15 = vrot.slane %v417_v2, 1 }
  0x2b   :  { %701 = vmatpush.bf16.msra.mxu2 %v1081_v10  ;;  %605 = vmatpush.bf16.msrb.mxu0 %v1087_v11  ;;  %v42_v11 = vpack.c.bf16 %v40_v63, %v39_v62 }
  0x2c   :  { %666 = vmatpush.bf16.msrb.mxu3 %v1059_v6  ;;  %v554_v6 = vld [vmem:[%s1407_s5 + $0x40] sm:$0x7]  ;;  %v589_v10 = vor.u32 %v588_v60, %v585_v8  ;;  %v447_v23 = vsel %vm441_vm2, %v445_v13, %v446_v15 }
  0x2d   :  { %v558_v16 = vmax.f32 %v554_v6, 0.0 }
  0x2e   :  { %647 = vmatpush.bf16.msra.mxu1 %v1104_v17  ;;  %v536_v17 = vld [vmem:[%s1407_s5 + $0x20] sm:$0xfc] }
  0x2f   :  { %702 = vmatpush.bf16.msra.mxu2 %v1110_v19  ;;  %606 = vmatpush.bf16.msrb.mxu0 %v1120_v22  ;;  %v562_v24 = vpack.c.bf16 %v558_v16, %v558_v16  ;;  %v540_v19 = vld [vmem:[%s1407_s5 + $0x40] sm:$0x3]  ;;  %v598_v22 = vsel %vm564_vm3, %v589_v10, %v597_v18  ;;  %v542_v35 = vmax.f32 %v536_v17, 0.0 }
  0x30   :  { %v546_v37 = vmax.f32 %v540_v19, 0.0 }
  0x31   :  { %120 = vmatmul.bf16.gmra.mxu0 %v42_v11  ;;  %936 = vmatmul.msk.bf16.vlgmr.msrb.gmra.mxu1 %vm289_vm1, %v447_v23  ;;  %v574_v33 = vshrl.u32 %v562_v24, 16  ;;  %v577_v34 = vshll.u32 %v562_v24, 16  ;;  %v548_v1 = vpack.c.bf16 %v544_v9, %v542_v35  ;;  %v1369_v23 = vld [vmem:[%s1410_s3] ss:$0 sm:$0xff] }
  0x32   :  { %648 = vmatpush.bf16.msra.mxu1 %v1129_v28  ;;  %v673_v28 = vld [vmem:[%s1407_s5 + $0x20] sm:$0xf0]  ;;  %v550_v38 = vpack.c.bf16 %v546_v37, %v546_v37 }
  0x33   :  { %703 = vmatpush.bf16.msra.mxu2 %v1138_v32  ;;  %607 = vmatpush.bf16.msrb.mxu0 %v1151_v36  ;;  %v675_v32 = vld [vmem:[%s1407_s5 + $0x40] sm:$0xf]  ;;  %v541_v36 = vld [vmem:[%s1407_s5 + $0x48] sm:$0x3]  ;;  %v677_v40 = vmax.f32 %v673_v28, 0.0  ;;  %v576_v49 = vrot.slane %v574_v33, 1 }
  0x34   :  { %v679_v41 = vmax.f32 %v675_v32, 0.0  ;;  %v547_v44 = vmax.f32 %v541_v36, 0.0  ;;  %v635_v56 = vrot.slane %v548_v1, 1  ;;  %v636_v3 = vrot.slane %v550_v38, 1  ;;  %v977_v32 = vld [vmem:[%s1411_s7] ss:$0 sm:$0xff] }
  0x35   :  { %v681_v50 = vpack.c.bf16 %v544_v9, %v677_v40  ;;  %v978_v36 = vld [vmem:[%s1412_s8] ss:$0 sm:$0xff] }
  0x36   :  { %649 = vmatpush.bf16.msra.mxu1 %v1163_v43  ;;  %937 = vmatmul.msk.bf16.vlgmr.msra.gmra.mxu3 %vm289_vm1, %v598_v22  ;;  %v579_v43 = vrot.slane %v577_v34, 2  ;;  %v683_v51 = vpack.c.bf16 %v679_v41, %v679_v41  ;;  %v551_v52 = vpack.c.bf16 %v547_v44, %v547_v44  ;;  %v142_v33 = vld [vmem:[%s1413_s4] sm:$0xff] }
  0x37   :  { %704 = vmatpush.bf16.msra.mxu2 %v1171_v46  ;;  %608 = vmatpush.bf16.msrb.mxu0 %v1180_v48  ;;  %v549_v46 = vpack.c.bf16 %v1261_v31, %v543_v42  ;;  %v572_v48 = vor.u32 %v571_v47, %v568_v45 }
  0x38   :  { %v580_v54 = vor.u32 %v579_v43, %v576_v49  ;;  %v691_v7 = vrot.slane %v683_v51, 2  ;;  %v639_v5 = vrot.slane %v551_v52, 1  ;;  %v143_v51 = vld [vmem:[%s1413_s4 + $0x8] sm:$0xff] }
  0x3a   :  { %650 = vmatpush.bf16.msra.mxu1 %v1193_v53  ;;  %v690_v53 = vrot.slane %v681_v50, 2 }
  0x3b   :  { %705 = vmatpush.bf16.msra.mxu2 %v1202_v55  ;;  %609 = vmatpush.bf16.msrb.mxu0 %v1211_v58  ;;  %v638_v55 = vrot.slane %v549_v46, 1  ;;  %v581_v58 = vsel %vm564_vm3, %v572_v48, %v580_v54 }
  0x3c   :  { %v692_v2 = vsel %vm689_vm4, %v690_v53, %v691_v7 }
  0x3e   :  { %651 = vmatpush.bf16.msra.mxu1 %v1220_v0  ;;  %v637_v0 = vsel %vm441_vm2, %v635_v56, %v636_v3 }
  0x3f   :  { %706 = vmatpush.bf16.msra.mxu2 %v1225_v4  ;;  %610 = vmatpush.bf16.msrb.mxu0 %v1247_v21  ;;  %v674_v4 = vld [vmem:[%s1407_s5 + $0x28] sm:$0xf0]  ;;  %v676_v21 = vld [vmem:[%s1407_s5 + $0x48] sm:$0xf] }
  0x40   :  { %v680_v57 = vmax.f32 %v676_v21, 0.0 }
  0x42   :  { %652 = vmatpush.bf16.msra.mxu1 %v1259_v30  ;;  %611 = vmatmul.bf16.vlgmr.msrb.gmra.mxu0 %v581_v58  ;;  %v678_v30 = vmax.f32 %v674_v4, 0.0  ;;  %v684_v59 = vpack.c.bf16 %v680_v57, %v680_v57 }
  0x43   :  { %721 = vmatpush.bf16.msra.mxu0 %v1253_v29  ;;  %707 = vmatpush.bf16.msra.mxu2 %v1269_v39  ;;  %v640_v29 = vsel %vm441_vm2, %v638_v55, %v639_v5 }
  0x44   :  { %v682_v39 = vpack.c.bf16 %v1261_v31, %v678_v30  ;;  %v694_v8 = vrot.slane %v684_v59, 2  ;;  %v975_v31 = vld [vmem:[%s1409_s2] ss:$0 sm:$0xff]  ;;  %v144_v59 = vld [vmem:[%s1413_s4 + $0x10] sm:$0xff] }
  0x45   :  { %653 = vmatmul.bf16.vlgmr.msra.gmra.mxu1 %v637_v0 }
  0x46   :  { %708 = vmatmul.bf16.vlgmr.msra.gmra.mxu2 %v692_v2  ;;  %938 = vmatmul.msk.bf16.vlgmr.msrb.gmra.mxu3 %vm289_vm1, %v640_v29  ;;  %v693_v6 = vrot.slane %v682_v39, 2 }
  0x48   :  { %v695_v60 = vsel %vm689_vm4, %v693_v6, %v694_v8 }
  0x52   :  { %939 = vmatmul.msk.bf16.vlgmr.msra.gmra.mxu0 %vm289_vm1, %v695_v60 }
  0x90   :  { %v401_v61 = vpop.f32.mrf.mxu2 }
  0x94   :  { %v316_v14 = vpop.f32.mrf.mxu3 }
  0x98   :  { %v403_v12 = vpop.f32.mrf.mxu2 }
  0x9c   :  { %v318_v62 = vpop.f32.mrf.mxu3 }
  0x9e   :  { %v116_v63 = vpop.f32.mrf.mxu0  ;;  %v302_v9 = vpop.f32.mrf.mxu1 }
  0x9f   :  { %v317_v10 = vadd.f32 %v316_v14, %v302_v9  ;;  %v130_v20 = vmul.f32 %v975_v31, %v116_v63 }
  0xa1   :  { %v138_v25 = vadd.f32 %v1369_v23, %v130_v20 }
  0xa3   :  { %v146_v40 = vadd.f32 %v142_v33, %v138_v25 }
  0xa6   :  { %v118_v15 = vpop.f32.mrf.mxu0  ;;  %v304_v16 = vpop.f32.mrf.mxu1 }
  0xa7   :  { %v319_v26 = vadd.f32 %v318_v62, %v304_v16  ;;  %v131_v41 = vmul.f32 %v975_v31, %v118_v15 }
  0xa9   :  { %v387_v13 = vpop.f32.mrf.mxu3  ;;  %v139_v38 = vadd.f32 %v1369_v23, %v131_v41 }
  0xaa   :  { %v388_v11 = vadd.f32 %v387_v13, %v317_v10 }
  0xab   :  { %v515_v18 = vpop.f32.mrf.mxu2  ;;  %v147_v52 = vadd.f32 %v143_v51, %v139_v38 }
  0xac   :  { %v402_v22 = vadd.f32 %v401_v61, %v388_v11  ;;  %v145_v11 = vld [vmem:[%s1413_s4 + $0x18] sm:$0xff] }
  0xae   :  { %v121_v17 = vpop.f32.mrf.mxu0  ;;  %v529_v19 = vpop.f32.mrf.mxu1 }
  0xaf   :  { %v530_v28 = vadd.f32 %v529_v19, %v515_v18  ;;  %v132_v0 = vmul.f32 %v975_v31, %v121_v17 }
  0xb1   :  { %v389_v24 = vpop.f32.mrf.mxu3  ;;  %v534_v27 = vadd.f32 %v530_v28, %v402_v22  ;;  %v140_v30 = vadd.f32 %v1369_v23, %v132_v0 }
  0xb2   :  { %v390_v34 = vadd.f32 %v389_v24, %v319_v26 }
  0xb3   :  { %v734_v35 = vmul.f32 %v977_v32, %v534_v27  ;;  %v517_v37 = vpop.f32.mrf.mxu2  ;;  %v148_v14 = vadd.f32 %v144_v59, %v140_v30 }
  0xb4   :  { %v404_v49 = vadd.f32 %v403_v12, %v390_v34 }
  0xb5   :  { %v742_v42 = vadd.f32 %v978_v36, %v734_v35 }
  0xb6   :  { %v123_v45 = vpop.f32.mrf.mxu0  ;;  %v531_v47 = vpop.f32.mrf.mxu1 }
  0xb7   :  { %v746_v43 = vadd.f32 %v742_v42, %v146_v40  ;;  %v532_v1 = vadd.f32 %v531_v47, %v517_v37  ;;  %v133_v61 = vmul.f32 %v975_v31, %v123_v45 }
  0xb9   :  { %v626_v44 = vpop.f32.mrf.mxu3  ;;  %750 = vst [vmem:[%s1414_s9] sm:$0xff] %v746_v43  ;;  %v535_v50 = vadd.f32 %v532_v1, %v404_v49  ;;  %v141_v10 = vadd.f32 %v1369_v23, %v133_v61 }
  0xbb   :  { %v735_v46 = vmul.f32 %v977_v32, %v535_v50  ;;  %v149_v31 = vadd.f32 %v145_v11, %v141_v10 }
  0xbd   :  { %v743_v48 = vadd.f32 %v978_v36, %v735_v46 }
  0xbf   :  { %v612_v54 = vpop.f32.mrf.mxu0  ;;  %v747_v56 = vadd.f32 %v743_v48, %v147_v52 }
  0xc0   :  { %v627_v55 = vadd.f32 %v626_v44, %v612_v54 }
  0xc1   :  { %v628_v3 = vpop.f32.mrf.mxu3  ;;  %751 = vst [vmem:[%s1414_s9 + $0x8] sm:$0xff] %v747_v56 }
  0xc2   :  { %v654_v7 = vpop.f32.mrf.mxu1 }
  0xc3   :  { %v655_v2 = vadd.f32 %v654_v7, %v627_v55 }
  0xc7   :  { %v614_v53 = vpop.f32.mrf.mxu0 }
  0xc8   :  { %v629_v57 = vadd.f32 %v628_v3, %v614_v53 }
  0xc9   :  { %v668_v5 = vpop.f32.mrf.mxu3  ;;  %v709_v58 = vpop.f32.mrf.mxu2 }
  0xca   :  { %v669_v21 = vadd.f32 %v668_v5, %v655_v2  ;;  %v656_v6 = vpop.f32.mrf.mxu1 }
  0xcb   :  { %v657_v62 = vadd.f32 %v656_v6, %v629_v57 }
  0xcf   :  { %v723_v4 = vpop.f32.mrf.mxu0 }
  0xd0   :  { %v724_v29 = vadd.f32 %v723_v4, %v709_v58 }
  0xd1   :  { %v670_v60 = vpop.f32.mrf.mxu3  ;;  %v711_v9 = vpop.f32.mrf.mxu2 }
  0xd2   :  { %v728_v39 = vadd.f32 %v724_v29, %v669_v21  ;;  %v671_v13 = vadd.f32 %v670_v60, %v657_v62 }
  0xd4   :  { %v736_v8 = vmul.f32 %v977_v32, %v728_v39 }
  0xd6   :  { %v744_v63 = vadd.f32 %v978_v36, %v736_v8 }
  0xd7   :  { %v725_v12 = vpop.f32.mrf.mxu0 }
  0xd8   :  { %v748_v15 = vadd.f32 %v744_v63, %v148_v14  ;;  %v726_v16 = vadd.f32 %v725_v12, %v711_v9 }
  0xda   :  { %752 = vst [vmem:[%s1414_s9 + $0x10] sm:$0xff] %v748_v15  ;;  %v729_v18 = vadd.f32 %v726_v16, %v671_v13 }
  0xdc   :  { %v737_v20 = vmul.f32 %v977_v32, %v729_v18 }
  0xde   :  { %v745_v24 = vadd.f32 %v978_v36, %v737_v20 }
  0xe0   :  { %v749_v17 = vadd.f32 %v745_v24, %v149_v31 }
  0xe2   :  { %753 = vst [vmem:[%s1414_s9 + $0x18] sm:$0xff] %v749_v17 }

// kernel: fused_head_cell.6
= control target key start
LH: loop header
LB: loop body
LE: loop exit
PB: predicated region body
PF: predicated region fallthrough
CT: control target
= control target key end

     0   :  { %vm324_vm0 = vcmask 1046528   ;;  %vm92_vm1 = vsmask.f32 7424  ;;  %vm172_vm2 = vcmask 130048   ;;  %vm447_vm3 = vsmask.f32 6400  ;;  %s1366_s1 = inlined_call_operand.vmem [shape: bf16[3,144,128], index: 1, kind: input, shape index: {}]   ;;  %s1367_s0 = inlined_call_operand.vmem [shape: f32[36,144], index: 0, kind: input, shape index: {}]   ;;  %s1368_s5 = inlined_call_operand.vmem [shape: bf16[128,128], index: 5, kind: input, shape index: {}]   ;;  %s1369_s2 = inlined_call_operand.vmem [shape: f32[1,128], index: 2, kind: input, shape index: {}]   ;;  %s1370_s4 = inlined_call_operand.vmem [shape: f32[32,128], index: 4, kind: input, shape index: {}]   ;;  %s1371_s3 = inlined_call_operand.vmem [shape: f32[1,128], index: 3, kind: input, shape index: {}]   ;;  %s1372_s6 = inlined_call_operand.vmem [shape: f32[1,128], index: 6, kind: input, shape index: {}]   ;;  %s1373_s7 = inlined_call_operand.vmem [shape: f32[1,128], index: 7, kind: input, shape index: {}]   ;;  %s1374_s8 = inlined_call_operand.vmem [shape: f32[32,128], index: 8, kind: input, shape index: {}]   ;;  %s1375_s9 = inlined_call_operand.vmem [shape: f32[32,128], index: 9, kind: output, shape index: {}]  }
   0x1   :  { %v956_v0 = vld [vmem:[%s1366_s1 + $0x80] sm:$0xff]  ;;  %v1035_v1 = vld [vmem:[%s1366_s1 + $0x88] sm:$0xff]  ;;  %v1040_v2 = vld [vmem:[%s1366_s1 + $0x38] sm:$0xff]  ;;  %vm572_vm4 = vcmask 1045504  }
   0x2   :  { %v1045_v3 = vld [vmem:[%s1366_s1 + $0xd0] sm:$0xff]  ;;  %v1050_v4 = vld [vmem:[%s1366_s1 + $0xc8] sm:$0xff]  ;;  %176 = vmatpush.bf16.msra.mxu0 %v956_v0  ;;  %197 = vmatpush.bf16.msra.mxu1 %v1035_v1  ;;  %v955_v5 = vld [vmem:[%s1366_s1 + $0x78] sm:$0xff] }
   0x3   :  { %261 = vmatpush.bf16.msra.mxu2 %v1040_v2  ;;  %410 = vmatpush.bf16.msra.mxu3 %v1045_v3  ;;  %v1061_v6 = vld [vmem:[%s1366_s1 + $0x30] sm:$0xff]  ;;  %v1067_v7 = vld [vmem:[%s1366_s1 + $0xc0] sm:$0xff]  ;;  %v36_v8 = vld [vmem:[%s1367_s0 + $0x18] sm:$0xff] }
   0x4   :  { %v62_v9 = vld [vmem:[%s1367_s0 + $0x8] sm:$0xfe]  ;;  %v64_v10 = vld [vmem:[%s1367_s0 + $0x28] sm:$0x1]  ;;  %v954_v11 = vld [vmem:[%s1366_s1 + $0x70] sm:$0xff]  ;;  %v1081_v12 = vmax.f32 %v36_v8, 0.0 }
   0x5   :  { %v66_v13 = vmax.f32 %v62_v9, 0.0  ;;  %v68_v14 = vmax.f32 %v64_v10, 0.0  ;;  %v1087_v15 = vld [vmem:[%s1366_s1 + $0x28] sm:$0xff]  ;;  %v1096_v17 = vld [vmem:[%s1366_s1 + $0xb8] sm:$0xff]  ;;  %v35_v28 = vld [vmem:[%s1367_s0 + $0x10] sm:$0xff] }
   0x6   :  { %389 = vmatpush.bf16.msrb.mxu1 %v1050_v4  ;;  %177 = vmatpush.bf16.msra.mxu0 %v955_v5  ;;  %v290_v16 = vld [vmem:[%s1367_s0 + $0x8] sm:$0xfc]  ;;  %v292_v20 = vld [vmem:[%s1367_s0 + $0x28] sm:$0x3]  ;;  %v1113_v29 = vld [vmem:[%s1366_s1 + $0x20] sm:$0xff]  ;;  %v1115_v31 = vmax.f32 %v35_v28, 0.0 }
   0x7   :  { %486 = vmatpush.bf16.msrb.mxu3 %v956_v0  ;;  %262 = vmatpush.bf16.msra.mxu2 %v1061_v6  ;;  %v70_v18 = vpack.c.bf16 %v1081_v12, %v66_v13  ;;  %v72_v19 = vpack.c.bf16 %v68_v14, %v68_v14  ;;  %v294_v21 = vmax.f32 %v290_v16, 0.0  ;;  %v296_v22 = vmax.f32 %v292_v20, 0.0  ;;  %v953_v23 = vld [vmem:[%s1366_s1 + $0x68] sm:$0xff]  ;;  %v61_v32 = vld [vmem:[%s1367_s0] sm:$0xfe]  ;;  %v1127_v34 = vld [vmem:[%s1366_s1 + $0xb0] sm:$0xff] }
   0x8   :  { %v63_v33 = vld [vmem:[%s1367_s0 + $0x20] sm:$0x1]  ;;  %v65_v38 = vmax.f32 %v61_v32, 0.0  ;;  %v421_v40 = vld [vmem:[%s1367_s0 + $0x30] sm:$0xff]  ;;  %v435_v45 = vld [vmem:[%s1367_s0 + $0x20] sm:$0xf8] }
   0x9   :  { %v106_v24 = vshrl.u32 %v70_v18, 16  ;;  %v108_v25 = vshll.u32 %v70_v18, 16  ;;  %v113_v26 = vshll.u32 %v72_v19, 16  ;;  %v298_v27 = vpack.c.bf16 %v1081_v12, %v294_v21  ;;  %v952_v41 = vld [vmem:[%s1366_s1 + $0x60] sm:$0xff]  ;;  %v1143_v46 = vld [vmem:[%s1366_s1 + $0x18] sm:$0xff]  ;;  %v1156_v51 = vld [vmem:[%s1366_s1 + $0xa8] sm:$0xff] }
   0xa   :  { %390 = vmatpush.bf16.msrb.mxu1 %v1067_v7  ;;  %178 = vmatpush.bf16.msra.mxu0 %v954_v11  ;;  %v300_v30 = vpack.c.bf16 %v296_v22, %v296_v22  ;;  %v67_v43 = vmax.f32 %v63_v33, 0.0  ;;  %v69_v44 = vpack.c.bf16 %v1115_v31, %v65_v38  ;;  %v1146_v48 = vmax.f32 %v421_v40, 0.0  ;;  %v437_v49 = vld [vmem:[%s1367_s0 + $0x40] sm:$0x7]  ;;  %v951_v56 = vld [vmem:[%s1366_s1 + $0x58] sm:$0xff]  ;;  %v1173_v59 = vld [vmem:[%s1366_s1 + $0x10] sm:$0xff] }
   0xb   :  { %487 = vmatpush.bf16.msrb.mxu3 %v955_v5  ;;  %263 = vmatpush.bf16.msra.mxu2 %v1087_v15  ;;  %v110_v35 = vrot.slane %v108_v25, 1  ;;  %v115_v36 = vrot.slane %v113_v26, 1  ;;  %v328_v37 = vrot.slane %v298_v27, 1  ;;  %v289_v52 = vld [vmem:[%s1367_s0] sm:$0xfc]  ;;  %v439_v54 = vmax.f32 %v435_v45, 0.0 }
   0xc   :  { %v329_v39 = vrot.slane %v300_v30, 1  ;;  %v291_v53 = vld [vmem:[%s1367_s0 + $0x20] sm:$0x3]  ;;  %v441_v55 = vmax.f32 %v437_v49, 0.0  ;;  %v71_v57 = vpack.c.bf16 %v67_v43, %v67_v43  ;;  %v96_v58 = vshll.u32 %v69_v44, 16  ;;  %v950_v13 = vld [vmem:[%s1366_s1 + $0x50] sm:$0xff] }
   0xd   :  { %v111_v42 = vor.u32 %v110_v35, %v106_v24  ;;  %v443_v60 = vpack.c.bf16 %v1146_v48, %v439_v54  ;;  %v1180_v62 = vld [vmem:[%s1366_s1 + $0xa0] sm:$0xff]  ;;  %v293_v63 = vmax.f32 %v289_v52, 0.0  ;;  %v295_v0 = vmax.f32 %v291_v53, 0.0  ;;  %v1195_v20 = vld [vmem:[%s1366_s1 + $0x8] sm:$0xff] }
   0xe   :  { %391 = vmatpush.bf16.msrb.mxu1 %v1096_v17  ;;  %179 = vmatpush.bf16.msra.mxu0 %v953_v23  ;;  %v330_v47 = vsel %vm324_vm0, %v328_v37, %v329_v39  ;;  %v445_v61 = vpack.c.bf16 %v441_v55, %v441_v55  ;;  %v33_v5 = vld [vmem:[%s1367_s0] sm:$0xff]  ;;  %v94_v14 = vshrl.u32 %v69_v44, 16  ;;  %v98_v16 = vrot.slane %v96_v58, 1  ;;  %v436_v21 = vld [vmem:[%s1367_s0 + $0x28] sm:$0xf8]  ;;  %v974_v44 = vld [vmem:[%s1368_s5 + $0x38] sm:$0xff] }
   0xf   :  { %488 = vmatpush.bf16.msrb.mxu3 %v954_v11  ;;  %264 = vmatpush.bf16.msra.mxu2 %v1113_v29  ;;  %v116_v50 = vsel %vm92_vm1, %v111_v42, %v115_v36  ;;  %v449_v8 = vshrl.u32 %v443_v60, 16  ;;  %v452_v9 = vshll.u32 %v443_v60, 16  ;;  %v422_v11 = vld [vmem:[%s1367_s0 + $0x38] sm:$0xff]  ;;  %v101_v18 = vshll.u32 %v71_v57, 16  ;;  %v438_v22 = vld [vmem:[%s1367_s0 + $0x48] sm:$0x7] }
  0x10   :  { %812 = vmatmul.msk.bf16.vlgmr.msra.gmra.mxu1 %vm172_vm2, %v116_v50  ;;  %904 = vmatmul.msk.bf16.vlgmr.msra.gmra.mxu3 %vm172_vm2, %v330_v47  ;;  %v457_v10 = vshrl.u32 %v445_v61, 16  ;;  %v460_v19 = vshll.u32 %v445_v61, 16  ;;  %v37_v24 = vmax.f32 %v33_v5, 0.0  ;;  %v297_v25 = vpack.c.bf16 %v1115_v31, %v293_v63  ;;  %v949_v35 = vld [vmem:[%s1366_s1 + $0x48] sm:$0xff]  ;;  %v1219_v40 = vld [vmem:[%s1366_s1] sm:$0xff] }
  0x11   :  { %v299_v26 = vpack.c.bf16 %v295_v0, %v295_v0  ;;  %v1210_v27 = vmax.f32 %v422_v11, 0.0  ;;  %v451_v28 = vrot.slane %v449_v8, 1  ;;  %v454_v30 = vrot.slane %v452_v9, 2  ;;  %v948_v54 = vld [vmem:[%s1366_s1 + $0x40] sm:$0xff]  ;;  %v420_v57 = vld [vmem:[%s1367_s0 + $0x28] sm:$0xfc] }
  0x12   :  { %392 = vmatpush.bf16.msrb.mxu1 %v1127_v34  ;;  %180 = vmatpush.bf16.msra.mxu0 %v952_v41  ;;  %v459_v32 = vrot.slane %v457_v10, 1  ;;  %v462_v33 = vrot.slane %v460_v19, 2  ;;  %v99_v36 = vor.u32 %v98_v16, %v94_v14  ;;  %v103_v37 = vrot.slane %v101_v18, 1  ;;  %v972_v8 = vld [vmem:[%s1368_s5 + $0x28] sm:$0xff] }
  0x13   :  { %489 = vmatpush.bf16.msrb.mxu3 %v953_v23  ;;  %265 = vmatpush.bf16.msra.mxu2 %v1143_v46  ;;  %v1207_v23 = vld [vmem:[%s1366_s1 + $0x98] sm:$0xff]  ;;  %v440_v38 = vmax.f32 %v436_v21, 0.0  ;;  %v442_v39 = vmax.f32 %v438_v22, 0.0  ;;  %v325_v42 = vrot.slane %v297_v25, 1  ;;  %v326_v43 = vrot.slane %v299_v26, 1 }
  0x14   :  { %v455_v45 = vor.u32 %v454_v30, %v451_v28  ;;  %v463_v47 = vor.u32 %v462_v33, %v459_v32  ;;  %v104_v49 = vsel %vm92_vm1, %v99_v36, %v103_v37  ;;  %v41_v50 = vpack.c.bf16 %v1115_v31, %v37_v24  ;;  %v973_v31 = vld [vmem:[%s1368_s5 + $0x30] sm:$0xff]  ;;  %v556_v25 = vld [vmem:[%s1367_s0 + $0x20] sm:$0xf0]  ;;  %v423_v26 = vld [vmem:[%s1367_s0 + $0x40] sm:$0x3] }
  0x15   :  { %v444_v52 = vpack.c.bf16 %v1210_v27, %v440_v38  ;;  %v446_v53 = vpack.c.bf16 %v442_v39, %v442_v39  ;;  %v327_v55 = vsel %vm324_vm0, %v325_v42, %v326_v43  ;;  %v426_v0 = vmax.f32 %v420_v57, 0.0  ;;  %v559_v28 = vld [vmem:[%s1367_s0 + $0x48] sm:$0xf]  ;;  %v629_v33 = vld [vmem:[%s1370_s4] sm:$0xff]  ;;  %v632_v57 = vld [vmem:[%s1370_s4 + $0x18] sm:$0xff] }
  0x16   :  { %393 = vmatpush.bf16.msrb.mxu1 %v1156_v51  ;;  %181 = vmatpush.bf16.msra.mxu0 %v951_v56  ;;  %v560_v30 = vmax.f32 %v556_v25, 0.0  ;;  %v429_v37 = vmax.f32 %v423_v26, 0.0  ;;  %v563_v39 = vmax.f32 %v559_v28, 0.0  ;;  %v633_v43 = vmax.f32 %v629_v33, 0.0  ;;  %v978_v28 = vld [vmem:[%s1373_s7] ss:$0 sm:$0xff] }
  0x17   :  { %490 = vmatpush.bf16.msrb.mxu3 %v952_v41  ;;  %266 = vmatpush.bf16.msra.mxu2 %v1173_v59  ;;  %v1225_v41 = vld [vmem:[%s1366_s1 + $0x90] sm:$0xff]  ;;  %v466_v58 = vshrl.u32 %v444_v52, 16  ;;  %v469_v60 = vshll.u32 %v444_v52, 16  ;;  %v474_v61 = vshrl.u32 %v446_v53, 16  ;;  %v477_v63 = vshll.u32 %v446_v53, 16  ;;  %v967_v52 = vld [vmem:[%s1368_s5] sm:$0xff] }
  0x19   :  { %v471_v9 = vrot.slane %v469_v60, 2  ;;  %v476_v10 = vrot.slane %v474_v61, 1  ;;  %v479_v11 = vrot.slane %v477_v63, 2 }
  0x1a   :  { %394 = vmatpush.bf16.msrb.mxu1 %v1180_v62  ;;  %182 = vmatpush.bf16.msra.mxu0 %v950_v13 }
  0x1b   :  { %491 = vmatpush.bf16.msrb.mxu3 %v951_v56  ;;  %267 = vmatpush.bf16.msra.mxu2 %v1195_v20  ;;  %v464_v56 = vsel %vm447_vm3, %v455_v45, %v463_v47  ;;  %v480_v19 = vor.u32 %v479_v11, %v476_v10  ;;  %v433_v47 = vpack.c.bf16 %v429_v37, %v429_v37 }
  0x1e   :  { %395 = vmatpush.bf16.msrb.mxu1 %v1207_v23  ;;  %183 = vmatpush.bf16.msra.mxu0 %v949_v35 }
  0x1f   :  { %492 = vmatpush.bf16.msrb.mxu3 %v950_v13  ;;  %268 = vmatpush.bf16.msra.mxu2 %v1219_v40  ;;  %v432_v13 = vpack.c.bf16 %v1210_v27, %v426_v0 }
  0x21   :  { %184 = vmatmul.bf16.vlgmr.msra.gmra.mxu0 %v104_v49 }
  0x22   :  { %507 = vmatpush.bf16.msrb.mxu0 %v1035_v1  ;;  %396 = vmatpush.bf16.msrb.mxu1 %v1225_v41  ;;  %v424_v1 = vld [vmem:[%s1367_s0 + $0x48] sm:$0x3] }
  0x23   :  { %493 = vmatpush.bf16.msrb.mxu3 %v949_v35  ;;  %269 = vmatmul.bf16.vlgmr.msra.gmra.mxu2 %v41_v50  ;;  %v430_v5 = vmax.f32 %v424_v1, 0.0  ;;  %v630_v35 = vld [vmem:[%s1370_s4 + $0x8] sm:$0xff]  ;;  %v567_v50 = vpack.c.bf16 %v563_v39, %v563_v39  ;;  %v636_v1 = vmax.f32 %v632_v57, 0.0 }
  0x24   :  { %282 = vmatpush.bf16.msrb.mxu2 %v948_v54 }
  0x25   :  { %397 = vmatmul.bf16.vlgmr.msrb.gmra.mxu1 %v327_v55  ;;  %v434_v14 = vpack.c.bf16 %v430_v5, %v430_v5  ;;  %v519_v55 = vrot.slane %v433_v47, 1 }
  0x26   :  { %583 = vmatpush.bf16.msra.mxu0 %v1050_v4  ;;  %494 = vmatmul.bf16.vlgmr.msrb.gmra.mxu3 %v464_v56  ;;  %v468_v4 = vrot.slane %v466_v58, 1 }
  0x27   :  { %703 = vmatpush.bf16.msra.mxu3 %v974_v44  ;;  %549 = vmatpush.bf16.msra.mxu1 %v948_v54  ;;  %v522_v21 = vrot.slane %v434_v14, 1  ;;  %v634_v44 = vmax.f32 %v630_v35, 0.0 }
  0x28   :  { %528 = vmatpush.bf16.msra.mxu2 %v1040_v2  ;;  %v34_v2 = vld [vmem:[%s1367_s0 + $0x8] sm:$0xff]  ;;  %v472_v18 = vor.u32 %v471_v9, %v468_v4 }
  0x29   :  { %v38_v16 = vmax.f32 %v34_v2, 0.0  ;;  %v637_v54 = vpack.c.bf16 %v634_v44, %v633_v43 }
  0x2a   :  { %584 = vmatpush.bf16.msra.mxu0 %v1067_v7  ;;  %v971_v7 = vld [vmem:[%s1368_s5 + $0x20] sm:$0xff]  ;;  %v481_v24 = vsel %vm447_vm3, %v472_v18, %v480_v19 }
  0x2b   :  { %704 = vmatpush.bf16.msra.mxu3 %v973_v31  ;;  %604 = vmatpush.bf16.msrb.mxu1 %v1045_v3  ;;  %v521_v3 = vrot.slane %v432_v13, 1  ;;  %v42_v22 = vpack.c.bf16 %v1081_v12, %v38_v16  ;;  %v577_v31 = vrot.slane %v567_v50, 2 }
  0x2c   :  { %529 = vmatpush.bf16.msra.mxu2 %v1061_v6  ;;  %v970_v6 = vld [vmem:[%s1368_s5 + $0x18] sm:$0xff] }
  0x2d   :  { %v523_v12 = vsel %vm324_vm0, %v521_v3, %v522_v21 }
  0x2e   :  { %585 = vmatpush.bf16.msra.mxu0 %v1096_v17  ;;  %v969_v17 = vld [vmem:[%s1368_s5 + $0x10] sm:$0xff] }
  0x2f   :  { %705 = vmatpush.bf16.msra.mxu3 %v972_v8 }
  0x30   :  { %530 = vmatpush.bf16.msra.mxu2 %v1087_v15  ;;  %v558_v15 = vld [vmem:[%s1367_s0 + $0x40] sm:$0xf] }
  0x31   :  { %905 = vmatmul.msk.bf16.vlgmr.msrb.gmra.mxu0 %vm172_vm2, %v481_v24  ;;  %v562_v32 = vmax.f32 %v558_v15, 0.0  ;;  %v975_v15 = vld [vmem:[%s1369_s2] ss:$0 sm:$0xff] }
  0x32   :  { %586 = vmatpush.bf16.msra.mxu0 %v1127_v34  ;;  %v419_v34 = vld [vmem:[%s1367_s0 + $0x20] sm:$0xfc] }
  0x33   :  { %706 = vmatpush.bf16.msra.mxu3 %v971_v7  ;;  %849 = vmatmul.msk.bf16.vlgmr.msrb.gmra.mxu2 %vm172_vm2, %v42_v22  ;;  %v425_v36 = vmax.f32 %v419_v34, 0.0  ;;  %v566_v42 = vpack.c.bf16 %v562_v32, %v562_v32 }
  0x34   :  { %531 = vmatpush.bf16.msra.mxu2 %v1113_v29  ;;  %v557_v29 = vld [vmem:[%s1367_s0 + $0x28] sm:$0xf0] }
  0x35   :  { %906 = vmatmul.msk.bf16.vlgmr.msra.gmra.mxu1 %vm172_vm2, %v523_v12  ;;  %v561_v38 = vmax.f32 %v557_v29, 0.0  ;;  %v431_v45 = vpack.c.bf16 %v1146_v48, %v425_v36  ;;  %v574_v53 = vrot.slane %v566_v42, 2  ;;  %v977_v12 = vld [vmem:[%s1372_s6] ss:$0 sm:$0xff] }
  0x36   :  { %587 = vmatpush.bf16.msra.mxu0 %v1156_v51  ;;  %v968_v51 = vld [vmem:[%s1368_s5 + $0x8] sm:$0xff]  ;;  %v976_v29 = vld [vmem:[%s1371_s3] ss:$0 sm:$0xff] }
  0x37   :  { %707 = vmatpush.bf16.msra.mxu3 %v970_v6  ;;  %v565_v49 = vpack.c.bf16 %v1210_v27, %v561_v38  ;;  %v742_v42 = vld [vmem:[%s1374_s8] sm:$0xff] }
  0x38   :  { %532 = vmatpush.bf16.msra.mxu2 %v1143_v46  ;;  %v564_v46 = vpack.c.bf16 %v1146_v48, %v560_v30 }
  0x39   :  { %v576_v48 = vrot.slane %v565_v49, 2 }
  0x3a   :  { %588 = vmatpush.bf16.msra.mxu0 %v1180_v62  ;;  %v573_v62 = vrot.slane %v564_v46, 2 }
  0x3b   :  { %708 = vmatpush.bf16.msra.mxu3 %v969_v17 }
  0x3c   :  { %533 = vmatpush.bf16.msra.mxu2 %v1173_v59  ;;  %v518_v59 = vrot.slane %v431_v45, 1  ;;  %v575_v27 = vsel %vm572_vm4, %v573_v62, %v574_v53 }
  0x3e   :  { %589 = vmatpush.bf16.msra.mxu0 %v1207_v23  ;;  %v520_v56 = vsel %vm324_vm0, %v518_v59, %v519_v55  ;;  %v578_v23 = vsel %vm572_vm4, %v576_v48, %v577_v31  ;;  %v743_v31 = vld [vmem:[%s1374_s8 + $0x8] sm:$0xff] }
  0x3f   :  { %709 = vmatpush.bf16.msra.mxu3 %v968_v51 }
  0x40   :  { %534 = vmatpush.bf16.msra.mxu2 %v1195_v20  ;;  %v631_v20 = vld [vmem:[%s1370_s4 + $0x10] sm:$0xff] }
  0x42   :  { %590 = vmatpush.bf16.msra.mxu0 %v1225_v41  ;;  %v635_v41 = vmax.f32 %v631_v20, 0.0 }
  0x43   :  { %710 = vmatpush.bf16.msra.mxu3 %v967_v52 }
  0x44   :  { %535 = vmatpush.bf16.msra.mxu2 %v1219_v40  ;;  %v638_v58 = vpack.c.bf16 %v636_v1, %v635_v41 }
  0x45   :  { %591 = vmatmul.bf16.vlgmr.msra.gmra.mxu0 %v575_v27  ;;  %907 = vmatmul.msk.bf16.vlgmr.msrb.gmra.mxu1 %vm172_vm2, %v578_v23 }
  0x46   :  { %711 = vmatmul.bf16.vlgmr.msra.gmra.mxu3 %v637_v54 }
  0x47   :  { %536 = vmatmul.bf16.vlgmr.msra.gmra.mxu2 %v520_v56 }
  0x56   :  { %716 = vmatmul.bf16.gmra.mxu3 %v638_v58 }
  0x8d   :  { %v199_v40 = vpop.f32.mrf.mxu1 }
  0x93   :  { %v412_v61 = vpop.f32.mrf.mxu3 }
  0x95   :  { %v201_v60 = vpop.f32.mrf.mxu1 }
  0x9b   :  { %v414_v8 = vpop.f32.mrf.mxu3 }
  0x9e   :  { %v185_v63 = vpop.f32.mrf.mxu0 }
  0x9f   :  { %v200_v7 = vadd.f32 %v199_v40, %v185_v63 }
  0xa2   :  { %v398_v0 = vpop.f32.mrf.mxu1 }
  0xa3   :  { %v413_v21 = vadd.f32 %v412_v61, %v398_v0 }
  0xa6   :  { %v270_v5 = vpop.f32.mrf.mxu2  ;;  %v187_v4 = vpop.f32.mrf.mxu0 }
  0xa7   :  { %v271_v16 = vadd.f32 %v270_v5, %v200_v7  ;;  %v202_v24 = vadd.f32 %v201_v60, %v187_v4  ;;  %v744_v5 = vld [vmem:[%s1374_s8 + $0x10] sm:$0xff] }
  0xa9   :  { %v495_v11 = vpop.f32.mrf.mxu3 }
  0xaa   :  { %v400_v9 = vpop.f32.mrf.mxu1 }
  0xab   :  { %v415_v32 = vadd.f32 %v414_v8, %v400_v9 }
  0xae   :  { %v272_v10 = vpop.f32.mrf.mxu2  ;;  %v509_v13 = vpop.f32.mrf.mxu0 }
  0xaf   :  { %v273_v17 = vadd.f32 %v272_v10, %v202_v24  ;;  %v510_v35 = vadd.f32 %v509_v13, %v495_v11 }
  0xb1   :  { %v497_v19 = vpop.f32.mrf.mxu3 }
  0xb2   :  { %v551_v2 = vpop.f32.mrf.mxu1 }
  0xb6   :  { %v284_v14 = vpop.f32.mrf.mxu2  ;;  %v511_v6 = vpop.f32.mrf.mxu0 }
  0xb7   :  { %v285_v18 = vadd.f32 %v284_v14, %v271_v16  ;;  %v512_v53 = vadd.f32 %v511_v6, %v497_v19  ;;  %v745_v14 = vld [vmem:[%s1374_s8 + $0x18] sm:$0xff] }
  0xb9   :  { %v417_v25 = vadd.f32 %v413_v21, %v285_v18 }
  0xba   :  { %v553_v3 = vpop.f32.mrf.mxu1 }
  0xbb   :  { %v617_v34 = vmul.f32 %v975_v15, %v417_v25 }
  0xbd   :  { %v625_v39 = vadd.f32 %v976_v29, %v617_v34 }
  0xbe   :  { %v286_v22 = vpop.f32.mrf.mxu2 }
  0xbf   :  { %v287_v26 = vadd.f32 %v286_v22, %v273_v17 }
  0xc1   :  { %v418_v38 = vadd.f32 %v415_v32, %v287_v26 }
  0xc2   :  { %v592_v36 = vpop.f32.mrf.mxu0  ;;  %v606_v37 = vpop.f32.mrf.mxu1 }
  0xc3   :  { %v618_v45 = vmul.f32 %v975_v15, %v418_v38  ;;  %v607_v50 = vadd.f32 %v606_v37, %v592_v36 }
  0xc5   :  { %v626_v59 = vadd.f32 %v976_v29, %v618_v45 }
  0xc9   :  { %v712_v30 = vpop.f32.mrf.mxu3 }
  0xca   :  { %v726_v33 = vmul.f32 %v977_v12, %v712_v30  ;;  %v537_v46 = vpop.f32.mrf.mxu2  ;;  %v594_v56 = vpop.f32.mrf.mxu0 }
  0xcb   :  { %v538_v43 = vadd.f32 %v537_v46, %v510_v35  ;;  %v608_v23 = vpop.f32.mrf.mxu1 }
  0xcc   :  { %v734_v51 = vadd.f32 %v978_v28, %v726_v33  ;;  %v609_v58 = vadd.f32 %v608_v23, %v594_v56 }
  0xcd   :  { %v552_v49 = vadd.f32 %v551_v2, %v538_v43 }
  0xce   :  { %v738_v44 = vadd.f32 %v734_v51, %v625_v39 }
  0xcf   :  { %v611_v54 = vadd.f32 %v607_v50, %v552_v49 }
  0xd0   :  { %v746_v47 = vadd.f32 %v742_v42, %v738_v44 }
  0xd1   :  { %v714_v52 = vpop.f32.mrf.mxu3  ;;  %v619_v57 = vmul.f32 %v975_v15, %v611_v54 }
  0xd2   :  { %750 = vst [vmem:[%s1375_s9] sm:$0xff] %v746_v47  ;;  %v727_v62 = vmul.f32 %v977_v12, %v714_v52  ;;  %v539_v48 = vpop.f32.mrf.mxu2 }
  0xd3   :  { %v540_v27 = vadd.f32 %v539_v48, %v512_v53  ;;  %v627_v63 = vadd.f32 %v976_v29, %v619_v57 }
  0xd4   :  { %v735_v55 = vadd.f32 %v978_v28, %v727_v62 }
  0xd5   :  { %v554_v1 = vadd.f32 %v553_v3, %v540_v27 }
  0xd6   :  { %v739_v20 = vadd.f32 %v735_v55, %v626_v59 }
  0xd7   :  { %v612_v61 = vadd.f32 %v609_v58, %v554_v1 }
  0xd8   :  { %v747_v41 = vadd.f32 %v743_v31, %v739_v20 }
  0xd9   :  { %v717_v40 = vpop.f32.mrf.mxu3  ;;  %v620_v4 = vmul.f32 %v975_v15, %v612_v61 }
  0xda   :  { %751 = vst [vmem:[%s1375_s9 + $0x8] sm:$0xff] %v747_v41  ;;  %v728_v60 = vmul.f32 %v977_v12, %v717_v40 }
  0xdb   :  { %v628_v2 = vadd.f32 %v976_v29, %v620_v4 }
  0xdc   :  { %v736_v0 = vadd.f32 %v978_v28, %v728_v60 }
  0xde   :  { %v740_v8 = vadd.f32 %v736_v0, %v627_v63 }
  0xe0   :  { %v748_v9 = vadd.f32 %v744_v5, %v740_v8 }
  0xe1   :  { %v719_v10 = vpop.f32.mrf.mxu3 }
  0xe2   :  { %752 = vst [vmem:[%s1375_s9 + $0x10] sm:$0xff] %v748_v9  ;;  %v729_v11 = vmul.f32 %v977_v12, %v719_v10 }
  0xe4   :  { %v737_v13 = vadd.f32 %v978_v28, %v729_v11 }
  0xe6   :  { %v741_v7 = vadd.f32 %v737_v13, %v628_v2 }
  0xe8   :  { %v749_v16 = vadd.f32 %v745_v14, %v741_v7 }
  0xea   :  { %753 = vst [vmem:[%s1375_s9 + $0x18] sm:$0xff] %v749_v16 }

// kernel: fused_head_cell.7
= control target key start
LH: loop header
LB: loop body
LE: loop exit
PB: predicated region body
PF: predicated region fallthrough
CT: control target
= control target key end

     0   :  { %s1918_s5 = inlined_call_operand.vmem [shape: bf16[5,128,256], index: 5, kind: input, shape index: {}]   ;;  %s1919_s1 = inlined_call_operand.vmem [shape: f32[32,128], index: 1, kind: input, shape index: {}]   ;;  %s1920_s0 = inlined_call_operand.vmem [shape: f32[32,128], index: 0, kind: input, shape index: {}]   ;;  %s1921_s2 = inlined_call_operand.vmem [shape: f32[32,128], index: 2, kind: input, shape index: {}]   ;;  %s1922_s3 = inlined_call_operand.vmem [shape: f32[32,128], index: 3, kind: input, shape index: {}]   ;;  %s1923_s4 = inlined_call_operand.vmem [shape: f32[32,128], index: 4, kind: input, shape index: {}]   ;;  %s1924_s6 = inlined_call_operand.vmem [shape: f32[1,256], index: 6, kind: input, shape index: {}]   ;;  %s1925_s7 = inlined_call_operand.vmem [shape: f32[1,256], index: 7, kind: input, shape index: {}]   ;;  %s1926_s8 = inlined_call_operand.vmem [shape: f32[32,256], index: 8, kind: output, shape index: {}]  }
   0x1   :  { %v891_v0 = vld [vmem:[%s1918_s5 + $0xf0] sm:$0xf]  ;;  %v1232_v1 = vld [vmem:[%s1918_s5 + $0xf4] sm:$0xf0]  ;;  %v1231_v2 = vld [vmem:[%s1918_s5 + $0xf4] sm:$0xf] }
   0x2   :  { %v892_v3 = vor.u32 %v1232_v1, %v891_v0  ;;  %v893_v4 = vld [vmem:[%s1918_s5 + $0xf8] sm:$0xf0]  ;;  %v955_v5 = vld [vmem:[%s1918_s5 + $0x70] sm:$0xf]  ;;  %v1216_v6 = vld [vmem:[%s1918_s5 + $0x74] sm:$0xf0] }
   0x3   :  { %v896_v7 = vor.u32 %v1231_v2, %v893_v4  ;;  %v956_v8 = vor.u32 %v1216_v6, %v955_v5  ;;  %v1215_v9 = vld [vmem:[%s1918_s5 + $0x74] sm:$0xf]  ;;  %v957_v10 = vld [vmem:[%s1918_s5 + $0x78] sm:$0xf0]  ;;  %v883_v11 = vld [vmem:[%s1918_s5 + $0xe0] sm:$0xf] }
   0x4   :  { %162 = vmatpush.bf16.msra.mxu0 %v892_v3  ;;  %v960_v12 = vor.u32 %v1215_v9, %v957_v10  ;;  %v1230_v13 = vld [vmem:[%s1918_s5 + $0xe4] sm:$0xf0]  ;;  %v1229_v14 = vld [vmem:[%s1918_s5 + $0xe4] sm:$0xf]  ;;  %v885_v15 = vld [vmem:[%s1918_s5 + $0xe8] sm:$0xf0] }
   0x5   :  { %181 = vmatpush.bf16.msra.mxu1 %v896_v7  ;;  %280 = vmatpush.bf16.msra.mxu2 %v956_v8  ;;  %v884_v16 = vor.u32 %v1230_v13, %v883_v11  ;;  %v888_v17 = vor.u32 %v1229_v14, %v885_v15  ;;  %v947_v18 = vld [vmem:[%s1918_s5 + $0x60] sm:$0xf]  ;;  %v1214_v19 = vld [vmem:[%s1918_s5 + $0x64] sm:$0xf0]  ;;  %v1213_v20 = vld [vmem:[%s1918_s5 + $0x64] sm:$0xf] }
   0x6   :  { %299 = vmatpush.bf16.msra.mxu3 %v960_v12  ;;  %v948_v21 = vor.u32 %v1214_v19, %v947_v18  ;;  %v949_v22 = vld [vmem:[%s1918_s5 + $0x68] sm:$0xf0]  ;;  %v875_v23 = vld [vmem:[%s1918_s5 + $0xd0] sm:$0xf]  ;;  %v1228_v24 = vld [vmem:[%s1918_s5 + $0xd4] sm:$0xf0] }
   0x7   :  { %v952_v25 = vor.u32 %v1213_v20, %v949_v22  ;;  %v1227_v26 = vld [vmem:[%s1918_s5 + $0xd4] sm:$0xf]  ;;  %v877_v27 = vld [vmem:[%s1918_s5 + $0xd8] sm:$0xf0]  ;;  %v939_v28 = vld [vmem:[%s1918_s5 + $0x50] sm:$0xf]  ;;  %v876_v29 = vor.u32 %v1228_v24, %v875_v23 }
   0x8   :  { %163 = vmatpush.bf16.msra.mxu0 %v884_v16  ;;  %v1212_v30 = vld [vmem:[%s1918_s5 + $0x54] sm:$0xf0]  ;;  %v1211_v31 = vld [vmem:[%s1918_s5 + $0x54] sm:$0xf]  ;;  %v941_v32 = vld [vmem:[%s1918_s5 + $0x58] sm:$0xf0]  ;;  %v880_v33 = vor.u32 %v1227_v26, %v877_v27 }
   0x9   :  { %182 = vmatpush.bf16.msra.mxu1 %v888_v17  ;;  %281 = vmatpush.bf16.msra.mxu2 %v948_v21  ;;  %v940_v34 = vor.u32 %v1212_v30, %v939_v28  ;;  %v867_v35 = vld [vmem:[%s1918_s5 + $0xc0] sm:$0xf]  ;;  %v1226_v36 = vld [vmem:[%s1918_s5 + $0xc4] sm:$0xf0]  ;;  %v1225_v37 = vld [vmem:[%s1918_s5 + $0xc4] sm:$0xf]  ;;  %v944_v38 = vor.u32 %v1211_v31, %v941_v32 }
   0xa   :  { %300 = vmatpush.bf16.msra.mxu3 %v952_v25  ;;  %v869_v39 = vld [vmem:[%s1918_s5 + $0xc8] sm:$0xf0]  ;;  %v931_v40 = vld [vmem:[%s1918_s5 + $0x40] sm:$0xf]  ;;  %v1210_v41 = vld [vmem:[%s1918_s5 + $0x44] sm:$0xf0]  ;;  %v868_v44 = vor.u32 %v1226_v36, %v867_v35 }
   0xb   :  { %v1209_v42 = vld [vmem:[%s1918_s5 + $0x44] sm:$0xf]  ;;  %v933_v43 = vld [vmem:[%s1918_s5 + $0x48] sm:$0xf0]  ;;  %v872_v45 = vor.u32 %v1225_v37, %v869_v39  ;;  %v932_v46 = vor.u32 %v1210_v41, %v931_v40  ;;  %v859_v47 = vld [vmem:[%s1918_s5 + $0xb0] sm:$0xf] }
   0xc   :  { %164 = vmatpush.bf16.msra.mxu0 %v876_v29  ;;  %v1224_v48 = vld [vmem:[%s1918_s5 + $0xb4] sm:$0xf0]  ;;  %v1223_v49 = vld [vmem:[%s1918_s5 + $0xb4] sm:$0xf]  ;;  %v936_v50 = vor.u32 %v1209_v42, %v933_v43  ;;  %v861_v51 = vld [vmem:[%s1918_s5 + $0xb8] sm:$0xf0] }
   0xd   :  { %183 = vmatpush.bf16.msra.mxu1 %v880_v33  ;;  %282 = vmatpush.bf16.msra.mxu2 %v940_v34  ;;  %v923_v52 = vld [vmem:[%s1918_s5 + $0x30] sm:$0xf]  ;;  %v1208_v53 = vld [vmem:[%s1918_s5 + $0x34] sm:$0xf0]  ;;  %v1207_v54 = vld [vmem:[%s1918_s5 + $0x34] sm:$0xf]  ;;  %v860_v56 = vor.u32 %v1224_v48, %v859_v47  ;;  %v864_v57 = vor.u32 %v1223_v49, %v861_v51 }
   0xe   :  { %301 = vmatpush.bf16.msra.mxu3 %v944_v38  ;;  %v925_v55 = vld [vmem:[%s1918_s5 + $0x38] sm:$0xf0]  ;;  %v924_v58 = vor.u32 %v1208_v53, %v923_v52  ;;  %v851_v59 = vld [vmem:[%s1918_s5 + $0xa0] sm:$0xf]  ;;  %v1222_v60 = vld [vmem:[%s1918_s5 + $0xa4] sm:$0xf0] }
   0xf   :  { %v1221_v61 = vld [vmem:[%s1918_s5 + $0xa4] sm:$0xf]  ;;  %v928_v62 = vor.u32 %v1207_v54, %v925_v55  ;;  %v853_v63 = vld [vmem:[%s1918_s5 + $0xa8] sm:$0xf0]  ;;  %v915_v0 = vld [vmem:[%s1918_s5 + $0x20] sm:$0xf]  ;;  %v852_v4 = vor.u32 %v1222_v60, %v851_v59 }
  0x10   :  { %165 = vmatpush.bf16.msra.mxu0 %v868_v44  ;;  %v1206_v1 = vld [vmem:[%s1918_s5 + $0x24] sm:$0xf0]  ;;  %v1205_v2 = vld [vmem:[%s1918_s5 + $0x24] sm:$0xf]  ;;  %v917_v3 = vld [vmem:[%s1918_s5 + $0x28] sm:$0xf0]  ;;  %v856_v6 = vor.u32 %v1221_v61, %v853_v63 }
  0x11   :  { %184 = vmatpush.bf16.msra.mxu1 %v872_v45  ;;  %283 = vmatpush.bf16.msra.mxu2 %v932_v46  ;;  %v843_v5 = vld [vmem:[%s1918_s5 + $0x90] sm:$0xf]  ;;  %v916_v7 = vor.u32 %v1206_v1, %v915_v0  ;;  %v1220_v8 = vld [vmem:[%s1918_s5 + $0x94] sm:$0xf0]  ;;  %v1219_v9 = vld [vmem:[%s1918_s5 + $0x94] sm:$0xf]  ;;  %v920_v11 = vor.u32 %v1205_v2, %v917_v3 }
  0x12   :  { %302 = vmatpush.bf16.msra.mxu3 %v936_v50  ;;  %v845_v10 = vld [vmem:[%s1918_s5 + $0x98] sm:$0xf0]  ;;  %v907_v12 = vld [vmem:[%s1918_s5 + $0x10] sm:$0xf]  ;;  %v1204_v13 = vld [vmem:[%s1918_s5 + $0x14] sm:$0xf0]  ;;  %v844_v18 = vor.u32 %v1220_v8, %v843_v5 }
  0x13   :  { %v1203_v14 = vld [vmem:[%s1918_s5 + $0x14] sm:$0xf]  ;;  %v909_v15 = vld [vmem:[%s1918_s5 + $0x18] sm:$0xf0]  ;;  %v835_v16 = vld [vmem:[%s1918_s5 + $0x80] sm:$0xf]  ;;  %v848_v23 = vor.u32 %v1219_v9, %v845_v10  ;;  %v908_v24 = vor.u32 %v1204_v13, %v907_v12 }
  0x14   :  { %166 = vmatpush.bf16.msra.mxu0 %v860_v56  ;;  %v1218_v17 = vld [vmem:[%s1918_s5 + $0x84] sm:$0xf0]  ;;  %v1217_v19 = vld [vmem:[%s1918_s5 + $0x84] sm:$0xf]  ;;  %v837_v20 = vld [vmem:[%s1918_s5 + $0x88] sm:$0xf0]  ;;  %v912_v28 = vor.u32 %v1203_v14, %v909_v15 }
  0x15   :  { %185 = vmatpush.bf16.msra.mxu1 %v864_v57  ;;  %284 = vmatpush.bf16.msra.mxu2 %v924_v58  ;;  %v55_v21 = vld [vmem:[%s1919_s1] sm:$0xff]  ;;  %v56_v22 = vld [vmem:[%s1919_s1 + $0x8] sm:$0xff]  ;;  %v1115_v34 = vld [vmem:[%s1918_s5 + $0x1f0] sm:$0xf]  ;;  %v836_v36 = vor.u32 %v1218_v17, %v835_v16  ;;  %v840_v41 = vor.u32 %v1217_v19, %v837_v20 }
  0x16   :  { %303 = vmatpush.bf16.msra.mxu3 %v928_v62  ;;  %v899_v25 = vld [vmem:[%s1918_s5] sm:$0xf]  ;;  %v30_v27 = vld [vmem:[%s1920_s0 + $0x8] sm:$0xff]  ;;  %v1201_v30 = vld [vmem:[%s1918_s5 + $0x4] sm:$0xf]  ;;  %v59_v32 = vmax.f32 %v55_v21, 0.0 }
  0x17   :  { %v29_v26 = vld [vmem:[%s1920_s0] sm:$0xff]  ;;  %v1202_v29 = vld [vmem:[%s1918_s5 + $0x4] sm:$0xf0]  ;;  %v901_v31 = vld [vmem:[%s1918_s5 + $0x8] sm:$0xf0]  ;;  %v60_v33 = vmax.f32 %v56_v22, 0.0 }
  0x18   :  { %167 = vmatpush.bf16.msra.mxu0 %v852_v4  ;;  %v1264_v35 = vld [vmem:[%s1918_s5 + $0x1f4] sm:$0xf0]  ;;  %v33_v37 = vmax.f32 %v29_v26, 0.0  ;;  %v34_v38 = vmax.f32 %v30_v27, 0.0  ;;  %v1263_v39 = vld [vmem:[%s1918_s5 + $0x1f4] sm:$0xf]  ;;  %v900_v42 = vor.u32 %v1202_v29, %v899_v25  ;;  %v904_v43 = vor.u32 %v1201_v30, %v901_v31 }
  0x19   :  { %186 = vmatpush.bf16.msra.mxu1 %v856_v6  ;;  %285 = vmatpush.bf16.msra.mxu2 %v916_v7  ;;  %v1117_v40 = vld [vmem:[%s1918_s5 + $0x1f8] sm:$0xf0]  ;;  %v1116_v44 = vor.u32 %v1264_v35, %v1115_v34  ;;  %v1035_v45 = vld [vmem:[%s1918_s5 + $0x170] sm:$0xf]  ;;  %v1248_v46 = vld [vmem:[%s1918_s5 + $0x174] sm:$0xf0]  ;;  %v63_v48 = vpack.c.bf16 %v60_v33, %v59_v32 }
  0x1a   :  { %304 = vmatpush.bf16.msra.mxu3 %v920_v11  ;;  %v1247_v47 = vld [vmem:[%s1918_s5 + $0x174] sm:$0xf]  ;;  %v1120_v49 = vor.u32 %v1263_v39, %v1117_v40  ;;  %v1037_v50 = vld [vmem:[%s1918_s5 + $0x178] sm:$0xf0]  ;;  %v1107_v51 = vld [vmem:[%s1918_s5 + $0x1e0] sm:$0xf]  ;;  %v37_v53 = vpack.c.bf16 %v34_v38, %v33_v37  ;;  %v1036_v56 = vor.u32 %v1248_v46, %v1035_v45 }
  0x1b   :  { %v1262_v52 = vld [vmem:[%s1918_s5 + $0x1e4] sm:$0xf0]  ;;  %v1261_v54 = vld [vmem:[%s1918_s5 + $0x1e4] sm:$0xf]  ;;  %v1109_v55 = vld [vmem:[%s1918_s5 + $0x1e8] sm:$0xf0]  ;;  %v1040_v57 = vor.u32 %v1247_v47, %v1037_v50 }
  0x1c   :  { %168 = vmatpush.bf16.msra.mxu0 %v844_v18  ;;  %v1108_v58 = vor.u32 %v1262_v52, %v1107_v51  ;;  %v1027_v59 = vld [vmem:[%s1918_s5 + $0x160] sm:$0xf]  ;;  %v1246_v60 = vld [vmem:[%s1918_s5 + $0x164] sm:$0xf0]  ;;  %v1245_v61 = vld [vmem:[%s1918_s5 + $0x164] sm:$0xf]  ;;  %v1112_v62 = vor.u32 %v1261_v54, %v1109_v55 }
  0x1d   :  { %187 = vmatpush.bf16.msra.mxu1 %v848_v23  ;;  %286 = vmatpush.bf16.msra.mxu2 %v908_v24  ;;  %v1029_v63 = vld [vmem:[%s1918_s5 + $0x168] sm:$0xf0]  ;;  %v1099_v0 = vld [vmem:[%s1918_s5 + $0x1d0] sm:$0xf]  ;;  %v1260_v1 = vld [vmem:[%s1918_s5 + $0x1d4] sm:$0xf0]  ;;  %v1028_v4 = vor.u32 %v1246_v60, %v1027_v59 }
  0x1e   :  { %305 = vmatpush.bf16.msra.mxu3 %v912_v28  ;;  %v1259_v2 = vld [vmem:[%s1918_s5 + $0x1d4] sm:$0xf]  ;;  %v1101_v3 = vld [vmem:[%s1918_s5 + $0x1d8] sm:$0xf0]  ;;  %v1019_v5 = vld [vmem:[%s1918_s5 + $0x150] sm:$0xf]  ;;  %v1032_v6 = vor.u32 %v1245_v61, %v1029_v63  ;;  %v1100_v7 = vor.u32 %v1260_v1, %v1099_v0 }
  0x1f   :  { %v1244_v8 = vld [vmem:[%s1918_s5 + $0x154] sm:$0xf0]  ;;  %v1243_v9 = vld [vmem:[%s1918_s5 + $0x154] sm:$0xf]  ;;  %v1021_v10 = vld [vmem:[%s1918_s5 + $0x158] sm:$0xf0]  ;;  %v1104_v11 = vor.u32 %v1259_v2, %v1101_v3 }
  0x20   :  { %169 = vmatpush.bf16.msra.mxu0 %v836_v36  ;;  %v1091_v12 = vld [vmem:[%s1918_s5 + $0x1c0] sm:$0xf]  ;;  %v1258_v13 = vld [vmem:[%s1918_s5 + $0x1c4] sm:$0xf0]  ;;  %v1257_v14 = vld [vmem:[%s1918_s5 + $0x1c4] sm:$0xf]  ;;  %v1020_v18 = vor.u32 %v1244_v8, %v1019_v5  ;;  %v1024_v22 = vor.u32 %v1243_v9, %v1021_v10 }
  0x21   :  { %188 = vmatpush.bf16.msra.mxu1 %v840_v41  ;;  %287 = vmatpush.bf16.msra.mxu2 %v900_v42  ;;  %v1093_v15 = vld [vmem:[%s1918_s5 + $0x1c8] sm:$0xf0]  ;;  %v57_v16 = vld [vmem:[%s1919_s1 + $0x10] sm:$0xff]  ;;  %v58_v17 = vld [vmem:[%s1919_s1 + $0x18] sm:$0xff]  ;;  %v1092_v23 = vor.u32 %v1258_v13, %v1091_v12 }
  0x22   :  { %306 = vmatpush.bf16.msra.mxu3 %v904_v43  ;;  %v1011_v19 = vld [vmem:[%s1918_s5 + $0x140] sm:$0xf]  ;;  %v31_v20 = vld [vmem:[%s1920_s0 + $0x10] sm:$0xff]  ;;  %v32_v21 = vld [vmem:[%s1920_s0 + $0x18] sm:$0xff]  ;;  %v1096_v27 = vor.u32 %v1257_v14, %v1093_v15  ;;  %v61_v28 = vmax.f32 %v57_v16, 0.0  ;;  %v62_v29 = vmax.f32 %v58_v17, 0.0 }
  0x23   :  { %170 = vmatmul.bf16.vlgmr.msra.gmra.mxu0 %v63_v48  ;;  %v1242_v24 = vld [vmem:[%s1918_s5 + $0x144] sm:$0xf0]  ;;  %v1241_v25 = vld [vmem:[%s1918_s5 + $0x144] sm:$0xf]  ;;  %v1013_v26 = vld [vmem:[%s1918_s5 + $0x148] sm:$0xf0] }
  0x24   :  { %189 = vmatmul.bf16.vlgmr.msra.gmra.mxu1 %v63_v48  ;;  %288 = vmatmul.bf16.vlgmr.msra.gmra.mxu2 %v37_v53  ;;  %v1083_v30 = vld [vmem:[%s1918_s5 + $0x1b0] sm:$0xf]  ;;  %v1256_v31 = vld [vmem:[%s1918_s5 + $0x1b4] sm:$0xf0]  ;;  %v35_v32 = vmax.f32 %v31_v20, 0.0  ;;  %v36_v33 = vmax.f32 %v32_v21, 0.0  ;;  %v1012_v36 = vor.u32 %v1242_v24, %v1011_v19  ;;  %v1016_v37 = vor.u32 %v1241_v25, %v1013_v26 }
  0x25   :  { %578 = vmatpush.bf16.msrb.mxu2 %v1116_v44  ;;  %307 = vmatmul.bf16.vlgmr.msra.gmra.mxu3 %v37_v53  ;;  %v1255_v34 = vld [vmem:[%s1918_s5 + $0x1b4] sm:$0xf]  ;;  %v1085_v35 = vld [vmem:[%s1918_s5 + $0x1b8] sm:$0xf0]  ;;  %v1084_v38 = vor.u32 %v1256_v31, %v1083_v30  ;;  %v1003_v39 = vld [vmem:[%s1918_s5 + $0x130] sm:$0xf]  ;;  %v64_v42 = vpack.c.bf16 %v62_v29, %v61_v28 }
  0x26   :  { %597 = vmatpush.bf16.msrb.mxu3 %v1120_v49  ;;  %425 = vmatpush.bf16.msrb.mxu0 %v1036_v56  ;;  %v1240_v40 = vld [vmem:[%s1918_s5 + $0x134] sm:$0xf0]  ;;  %v1239_v41 = vld [vmem:[%s1918_s5 + $0x134] sm:$0xf]  ;;  %v1088_v43 = vor.u32 %v1255_v34, %v1085_v35  ;;  %v1005_v44 = vld [vmem:[%s1918_s5 + $0x138] sm:$0xf0]  ;;  %v38_v47 = vpack.c.bf16 %v36_v33, %v35_v32 }
  0x27   :  { %444 = vmatpush.bf16.msrb.mxu1 %v1040_v57  ;;  %v1075_v45 = vld [vmem:[%s1918_s5 + $0x1a0] sm:$0xf]  ;;  %v1254_v46 = vld [vmem:[%s1918_s5 + $0x1a4] sm:$0xf0]  ;;  %v1253_v48 = vld [vmem:[%s1918_s5 + $0x1a4] sm:$0xf]  ;;  %v1004_v50 = vor.u32 %v1240_v40, %v1003_v39  ;;  %v1008_v51 = vor.u32 %v1239_v41, %v1005_v44 }
  0x28   :  { %v1077_v49 = vld [vmem:[%s1918_s5 + $0x1a8] sm:$0xf0]  ;;  %v1076_v52 = vor.u32 %v1254_v46, %v1075_v45  ;;  %v995_v53 = vld [vmem:[%s1918_s5 + $0x120] sm:$0xf]  ;;  %v1238_v54 = vld [vmem:[%s1918_s5 + $0x124] sm:$0xf0] }
  0x29   :  { %579 = vmatpush.bf16.msrb.mxu2 %v1108_v58  ;;  %v1237_v55 = vld [vmem:[%s1918_s5 + $0x124] sm:$0xf]  ;;  %v1080_v56 = vor.u32 %v1253_v48, %v1077_v49  ;;  %v997_v57 = vld [vmem:[%s1918_s5 + $0x128] sm:$0xf0]  ;;  %v1067_v58 = vld [vmem:[%s1918_s5 + $0x190] sm:$0xf] }
  0x2a   :  { %598 = vmatpush.bf16.msrb.mxu3 %v1112_v62  ;;  %426 = vmatpush.bf16.msrb.mxu0 %v1028_v4  ;;  %v1252_v59 = vld [vmem:[%s1918_s5 + $0x194] sm:$0xf0]  ;;  %v1251_v60 = vld [vmem:[%s1918_s5 + $0x194] sm:$0xf]  ;;  %v1069_v61 = vld [vmem:[%s1918_s5 + $0x198] sm:$0xf0]  ;;  %v996_v62 = vor.u32 %v1238_v54, %v995_v53  ;;  %v1000_v2 = vor.u32 %v1237_v55, %v997_v57 }
  0x2b   :  { %445 = vmatpush.bf16.msrb.mxu1 %v1032_v6  ;;  %v987_v63 = vld [vmem:[%s1918_s5 + $0x110] sm:$0xf]  ;;  %v1236_v0 = vld [vmem:[%s1918_s5 + $0x114] sm:$0xf0]  ;;  %v1235_v1 = vld [vmem:[%s1918_s5 + $0x114] sm:$0xf]  ;;  %v1068_v3 = vor.u32 %v1252_v59, %v1067_v58  ;;  %v1072_v8 = vor.u32 %v1251_v60, %v1069_v61 }
  0x2c   :  { %v989_v4 = vld [vmem:[%s1918_s5 + $0x118] sm:$0xf0]  ;;  %v1059_v5 = vld [vmem:[%s1918_s5 + $0x180] sm:$0xf]  ;;  %v1250_v6 = vld [vmem:[%s1918_s5 + $0x184] sm:$0xf0]  ;;  %v988_v15 = vor.u32 %v1236_v0, %v987_v63 }
  0x2d   :  { %580 = vmatpush.bf16.msrb.mxu2 %v1100_v7  ;;  %v318_v7 = vld [vmem:[%s1921_s2] sm:$0xff]  ;;  %v1061_v10 = vld [vmem:[%s1918_s5 + $0x188] sm:$0xf0]  ;;  %v1195_v13 = vld [vmem:[%s1918_s5 + $0x270] sm:$0xf]  ;;  %v992_v19 = vor.u32 %v1235_v1, %v989_v4  ;;  %v1060_v20 = vor.u32 %v1250_v6, %v1059_v5 }
  0x2e   :  { %599 = vmatpush.bf16.msrb.mxu3 %v1104_v11  ;;  %427 = vmatpush.bf16.msrb.mxu0 %v1020_v18  ;;  %v1249_v9 = vld [vmem:[%s1918_s5 + $0x184] sm:$0xf]  ;;  %v319_v11 = vld [vmem:[%s1921_s2 + $0x8] sm:$0xff]  ;;  %v1280_v14 = vld [vmem:[%s1918_s5 + $0x274] sm:$0xf0]  ;;  %v322_v26 = vmax.f32 %v318_v7, 0.0 }
  0x2f   :  { %446 = vmatpush.bf16.msrb.mxu1 %v1024_v22  ;;  %v471_v12 = vld [vmem:[%s1922_s3] sm:$0xff]  ;;  %v472_v16 = vld [vmem:[%s1922_s3 + $0x8] sm:$0xff]  ;;  %v1279_v17 = vld [vmem:[%s1918_s5 + $0x274] sm:$0xf]  ;;  %v1196_v28 = vor.u32 %v1280_v14, %v1195_v13 }
  0x30   :  { %v1197_v18 = vld [vmem:[%s1918_s5 + $0x278] sm:$0xf0]  ;;  %v979_v21 = vld [vmem:[%s1918_s5 + $0x100] sm:$0xf]  ;;  %v1234_v22 = vld [vmem:[%s1918_s5 + $0x104] sm:$0xf0] }
  0x31   :  { %581 = vmatpush.bf16.msrb.mxu2 %v1092_v23  ;;  %v1064_v23 = vor.u32 %v1249_v9, %v1061_v10  ;;  %v1233_v24 = vld [vmem:[%s1918_s5 + $0x104] sm:$0xf]  ;;  %v981_v25 = vld [vmem:[%s1918_s5 + $0x108] sm:$0xf0]  ;;  %v475_v29 = vmax.f32 %v471_v12, 0.0  ;;  %v476_v30 = vmax.f32 %v472_v16, 0.0  ;;  %v1200_v31 = vor.u32 %v1279_v17, %v1197_v18 }
  0x32   :  { %600 = vmatpush.bf16.msrb.mxu3 %v1096_v27  ;;  %428 = vmatpush.bf16.msrb.mxu0 %v1012_v36  ;;  %v323_v27 = vmax.f32 %v319_v11, 0.0  ;;  %v1187_v32 = vld [vmem:[%s1918_s5 + $0x260] sm:$0xf]  ;;  %v1278_v33 = vld [vmem:[%s1918_s5 + $0x264] sm:$0xf0]  ;;  %v980_v34 = vor.u32 %v1234_v22, %v979_v21  ;;  %v984_v35 = vor.u32 %v1233_v24, %v981_v25  ;;  %v320_v53 = vld [vmem:[%s1921_s2 + $0x10] sm:$0xff] }
  0x33   :  { %447 = vmatpush.bf16.msrb.mxu1 %v1016_v37  ;;  %175 = vmatmul.bf16.gmra.mxu0 %v64_v42  ;;  %v1188_v36 = vor.u32 %v1278_v33, %v1187_v32  ;;  %v1277_v37 = vld [vmem:[%s1918_s5 + $0x264] sm:$0xf]  ;;  %v479_v40 = vpack.c.bf16 %v476_v30, %v475_v29  ;;  %v1179_v41 = vld [vmem:[%s1918_s5 + $0x250] sm:$0xf]  ;;  %v1275_v45 = vld [vmem:[%s1918_s5 + $0x254] sm:$0xf] }
  0x34   :  { %194 = vmatmul.bf16.gmra.mxu1 %v64_v42  ;;  %293 = vmatmul.bf16.gmra.mxu2 %v38_v47  ;;  %v326_v39 = vpack.c.bf16 %v323_v27, %v322_v26  ;;  %v1276_v42 = vld [vmem:[%s1918_s5 + $0x254] sm:$0xf0]  ;;  %v1181_v46 = vld [vmem:[%s1918_s5 + $0x258] sm:$0xf0]  ;;  %v1274_v48 = vld [vmem:[%s1918_s5 + $0x244] sm:$0xf0] }
  0x35   :  { %582 = vmatpush.bf16.msrb.mxu2 %v1084_v38  ;;  %312 = vmatmul.bf16.gmra.mxu3 %v38_v47  ;;  %v1189_v38 = vld [vmem:[%s1918_s5 + $0x268] sm:$0xf0]  ;;  %v1180_v44 = vor.u32 %v1276_v42, %v1179_v41  ;;  %v1171_v47 = vld [vmem:[%s1918_s5 + $0x240] sm:$0xf]  ;;  %v1184_v49 = vor.u32 %v1275_v45, %v1181_v46  ;;  %v321_v54 = vld [vmem:[%s1921_s2 + $0x18] sm:$0xff]  ;;  %v324_v60 = vmax.f32 %v320_v53, 0.0 }
  0x36   :  { %601 = vmatpush.bf16.msrb.mxu3 %v1088_v43  ;;  %429 = vmatpush.bf16.msrb.mxu0 %v1004_v50  ;;  %v1192_v43 = vor.u32 %v1277_v37, %v1189_v38  ;;  %v1172_v50 = vor.u32 %v1274_v48, %v1171_v47  ;;  %v1163_v55 = vld [vmem:[%s1918_s5 + $0x230] sm:$0xf]  ;;  %v474_v58 = vld [vmem:[%s1922_s3 + $0x18] sm:$0xff]  ;;  %v325_v61 = vmax.f32 %v321_v54, 0.0  ;;  %v1271_v63 = vld [vmem:[%s1918_s5 + $0x234] sm:$0xf] }
  0x37   :  { %448 = vmatpush.bf16.msrb.mxu1 %v1008_v51  ;;  %v1273_v51 = vld [vmem:[%s1918_s5 + $0x244] sm:$0xf]  ;;  %v473_v57 = vld [vmem:[%s1922_s3 + $0x10] sm:$0xff]  ;;  %v1165_v0 = vld [vmem:[%s1918_s5 + $0x238] sm:$0xf0] }
  0x38   :  { %v477_v1 = vmax.f32 %v473_v57, 0.0  ;;  %v1270_v4 = vld [vmem:[%s1918_s5 + $0x224] sm:$0xf0]  ;;  %v1168_v5 = vor.u32 %v1271_v63, %v1165_v0  ;;  %v1269_v7 = vld [vmem:[%s1918_s5 + $0x224] sm:$0xf]  ;;  %v327_v9 = vpack.c.bf16 %v325_v61, %v324_v60  ;;  %v626_v25 = vld [vmem:[%s1923_s4 + $0x10] sm:$0xff] }
  0x39   :  { %583 = vmatpush.bf16.msrb.mxu2 %v1076_v52  ;;  %v1173_v52 = vld [vmem:[%s1918_s5 + $0x248] sm:$0xf0]  ;;  %v1147_v11 = vld [vmem:[%s1918_s5 + $0x210] sm:$0xf]  ;;  %v1268_v12 = vld [vmem:[%s1918_s5 + $0x214] sm:$0xf0] }
  0x3a   :  { %602 = vmatpush.bf16.msrb.mxu3 %v1080_v56  ;;  %430 = vmatpush.bf16.msrb.mxu0 %v996_v62  ;;  %v1272_v56 = vld [vmem:[%s1918_s5 + $0x234] sm:$0xf0]  ;;  %v1176_v59 = vor.u32 %v1273_v51, %v1173_v52  ;;  %v1148_v14 = vor.u32 %v1268_v12, %v1147_v11  ;;  %v1149_v16 = vld [vmem:[%s1918_s5 + $0x218] sm:$0xf0]  ;;  %v1139_v17 = vld [vmem:[%s1918_s5 + $0x200] sm:$0xf] }
  0x3b   :  { %449 = vmatpush.bf16.msrb.mxu1 %v1000_v2  ;;  %v1164_v62 = vor.u32 %v1272_v56, %v1163_v55  ;;  %v478_v2 = vmax.f32 %v474_v58, 0.0  ;;  %v1266_v18 = vld [vmem:[%s1918_s5 + $0x204] sm:$0xf0]  ;;  %v1265_v21 = vld [vmem:[%s1918_s5 + $0x204] sm:$0xf]  ;;  %v627_v26 = vld [vmem:[%s1923_s4 + $0x18] sm:$0xff] }
  0x3c   :  { %v1141_v22 = vld [vmem:[%s1918_s5 + $0x208] sm:$0xf0]  ;;  %v630_v30 = vmax.f32 %v626_v25, 0.0 }
  0x3d   :  { %584 = vmatpush.bf16.msrb.mxu2 %v1068_v3  ;;  %v1155_v3 = vld [vmem:[%s1918_s5 + $0x220] sm:$0xf]  ;;  %v480_v10 = vpack.c.bf16 %v478_v2, %v477_v1  ;;  %v625_v24 = vld [vmem:[%s1923_s4 + $0x8] sm:$0xff]  ;;  %v1144_v27 = vor.u32 %v1265_v21, %v1141_v22 }
  0x3e   :  { %603 = vmatpush.bf16.msrb.mxu3 %v1072_v8  ;;  %431 = vmatpush.bf16.msrb.mxu0 %v988_v15  ;;  %v1156_v6 = vor.u32 %v1270_v4, %v1155_v3  ;;  %v1157_v8 = vld [vmem:[%s1918_s5 + $0x228] sm:$0xf0]  ;;  %v1267_v15 = vld [vmem:[%s1918_s5 + $0x214] sm:$0xf]  ;;  %v629_v29 = vmax.f32 %v625_v24, 0.0 }
  0x3f   :  { %450 = vmatpush.bf16.msrb.mxu1 %v992_v19  ;;  %v1160_v13 = vor.u32 %v1269_v7, %v1157_v8  ;;  %v1152_v19 = vor.u32 %v1267_v15, %v1149_v16  ;;  %v777_v2 = vld [vmem:[%s1924_s6] sm:$0x3] }
  0x40   :  { %v780_v12 = vperm.slane %v777_v2, 1 }
  0x41   :  { %585 = vmatpush.bf16.msrb.mxu2 %v1060_v20  ;;  %v1140_v20 = vor.u32 %v1266_v18, %v1139_v17 }
  0x42   :  { %604 = vmatpush.bf16.msrb.mxu3 %v1064_v23  ;;  %432 = vmatpush.bf16.msrb.mxu0 %v980_v34  ;;  %v624_v23 = vld [vmem:[%s1923_s4] sm:$0xff] }
  0x43   :  { %451 = vmatpush.bf16.msrb.mxu1 %v984_v35 }
  0x44   :  { %586 = vmatmul.bf16.vlgmr.msrb.gmra.mxu2 %v479_v40 }
  0x45   :  { %1281 = vmatpush.bf16.msra.mxu2 %v1196_v28  ;;  %433 = vmatmul.bf16.vlgmr.msrb.gmra.mxu0 %v326_v39 }
  0x46   :  { %1289 = vmatpush.bf16.msra.mxu3 %v1200_v31  ;;  %731 = vmatpush.bf16.msra.mxu0 %v1196_v28  ;;  %v628_v28 = vmax.f32 %v624_v23, 0.0 }
  0x47   :  { %750 = vmatpush.bf16.msra.mxu1 %v1200_v31  ;;  %605 = vmatmul.bf16.vlgmr.msrb.gmra.mxu3 %v479_v40  ;;  %v631_v31 = vmax.f32 %v627_v26, 0.0 }
  0x48   :  { %452 = vmatmul.bf16.vlgmr.msrb.gmra.mxu1 %v326_v39  ;;  %v632_v32 = vpack.c.bf16 %v629_v29, %v628_v28 }
  0x49   :  { %1282 = vmatpush.bf16.msra.mxu2 %v1188_v36  ;;  %v633_v33 = vpack.c.bf16 %v631_v31, %v630_v30 }
  0x4a   :  { %1290 = vmatpush.bf16.msra.mxu3 %v1192_v43  ;;  %732 = vmatpush.bf16.msra.mxu0 %v1188_v36 }
  0x4b   :  { %751 = vmatpush.bf16.msra.mxu1 %v1192_v43 }
  0x4d   :  { %1283 = vmatpush.bf16.msra.mxu2 %v1180_v44 }
  0x4e   :  { %1291 = vmatpush.bf16.msra.mxu3 %v1184_v49  ;;  %733 = vmatpush.bf16.msra.mxu0 %v1180_v44 }
  0x4f   :  { %752 = vmatpush.bf16.msra.mxu1 %v1184_v49 }
  0x51   :  { %1284 = vmatpush.bf16.msra.mxu2 %v1172_v50 }
  0x52   :  { %1292 = vmatpush.bf16.msra.mxu3 %v1176_v59  ;;  %734 = vmatpush.bf16.msra.mxu0 %v1172_v50 }
  0x53   :  { %753 = vmatpush.bf16.msra.mxu1 %v1176_v59 }
  0x54   :  { %591 = vmatmul.bf16.gmra.mxu2 %v480_v10 }
  0x55   :  { %1285 = vmatpush.bf16.msra.mxu2 %v1164_v62  ;;  %438 = vmatmul.bf16.gmra.mxu0 %v327_v9 }
  0x56   :  { %1293 = vmatpush.bf16.msra.mxu3 %v1168_v5  ;;  %735 = vmatpush.bf16.msra.mxu0 %v1164_v62 }
  0x57   :  { %754 = vmatpush.bf16.msra.mxu1 %v1168_v5  ;;  %610 = vmatmul.bf16.gmra.mxu3 %v480_v10 }
  0x58   :  { %457 = vmatmul.bf16.gmra.mxu1 %v327_v9  ;;  %v779_v9 = vperm.slane %v777_v2, 0 }
  0x59   :  { %1286 = vmatpush.bf16.msra.mxu2 %v1156_v6 }
  0x5a   :  { %1294 = vmatpush.bf16.msra.mxu3 %v1160_v13  ;;  %736 = vmatpush.bf16.msra.mxu0 %v1156_v6  ;;  %v791_v6 = vld [vmem:[%s1925_s7] sm:$0x3] }
  0x5b   :  { %755 = vmatpush.bf16.msra.mxu1 %v1160_v13  ;;  %v793_v15 = vperm.slane %v791_v6, 0 }
  0x5d   :  { %1287 = vmatpush.bf16.msra.mxu2 %v1148_v14 }
  0x5e   :  { %1295 = vmatpush.bf16.msra.mxu3 %v1152_v19  ;;  %737 = vmatpush.bf16.msra.mxu0 %v1148_v14 }
  0x5f   :  { %756 = vmatpush.bf16.msra.mxu1 %v1152_v19  ;;  %v794_v19 = vperm.slane %v791_v6, 1 }
  0x61   :  { %1288 = vmatpush.bf16.msra.mxu2 %v1140_v20 }
  0x62   :  { %1296 = vmatpush.bf16.msra.mxu3 %v1144_v27  ;;  %738 = vmatpush.bf16.msra.mxu0 %v1140_v20 }
  0x63   :  { %757 = vmatpush.bf16.msra.mxu1 %v1144_v27 }
  0x64   :  { %744 = vmatmul.bf16.vlgmr.msra.gmra.mxu2 %v633_v33 }
  0x65   :  { %739 = vmatmul.bf16.vlgmr.msra.gmra.mxu0 %v632_v32 }
  0x67   :  { %763 = vmatmul.bf16.vlgmr.msra.gmra.mxu3 %v633_v33 }
  0x68   :  { %758 = vmatmul.bf16.vlgmr.msra.gmra.mxu1 %v632_v32 }
  0xa0   :  { %v171_v34 = vpop.f32.mrf.mxu0 }
  0xa1   :  { %v190_v35 = vpop.f32.mrf.mxu1 }
  0xa7   :  { %v289_v36 = vpop.f32.mrf.mxu2 }
  0xa8   :  { %v308_v37 = vpop.f32.mrf.mxu3  ;;  %v173_v38 = vpop.f32.mrf.mxu0  ;;  %v290_v0 = vadd.f32 %v289_v36, %v171_v34 }
  0xa9   :  { %v192_v39 = vpop.f32.mrf.mxu1  ;;  %v309_v1 = vadd.f32 %v308_v37, %v190_v35 }
  0xaf   :  { %v291_v40 = vpop.f32.mrf.mxu2 }
  0xb0   :  { %v310_v41 = vpop.f32.mrf.mxu3  ;;  %v176_v42 = vpop.f32.mrf.mxu0  ;;  %v292_v20 = vadd.f32 %v291_v40, %v173_v38 }
  0xb1   :  { %v195_v43 = vpop.f32.mrf.mxu1  ;;  %v311_v23 = vadd.f32 %v310_v41, %v192_v39 }
  0xb7   :  { %v294_v44 = vpop.f32.mrf.mxu2 }
  0xb8   :  { %v313_v45 = vpop.f32.mrf.mxu3  ;;  %v178_v46 = vpop.f32.mrf.mxu0  ;;  %v295_v13 = vadd.f32 %v294_v44, %v176_v42 }
  0xb9   :  { %v1882_v47 = vpop.f32.mrf.mxu1  ;;  %v314_v17 = vadd.f32 %v313_v45, %v195_v43 }
  0xbf   :  { %v296_v48 = vpop.f32.mrf.mxu2 }
  0xc0   :  { %v1884_v49 = vpop.f32.mrf.mxu3  ;;  %v297_v39 = vadd.f32 %v296_v48, %v178_v46 }
  0xc1   :  { %v316_v43 = vadd.f32 %v1884_v49, %v1882_v47 }
  0xc2   :  { %v434_v50 = vpop.f32.mrf.mxu0 }
  0xc3   :  { %v463_v3 = vadd.f32 %v434_v50, %v290_v0 }
  0xc5   :  { %v453_v51 = vpop.f32.mrf.mxu1 }
  0xc6   :  { %v464_v4 = vadd.f32 %v453_v51, %v309_v1 }
  0xc7   :  { %v587_v52 = vpop.f32.mrf.mxu2 }
  0xc8   :  { %v616_v7 = vadd.f32 %v587_v52, %v463_v3 }
  0xca   :  { %v606_v53 = vpop.f32.mrf.mxu3  ;;  %v436_v54 = vpop.f32.mrf.mxu0 }
  0xcb   :  { %v617_v10 = vadd.f32 %v606_v53, %v464_v4  ;;  %v465_v26 = vadd.f32 %v436_v54, %v292_v20 }
  0xcd   :  { %v455_v55 = vpop.f32.mrf.mxu1 }
  0xce   :  { %v466_v29 = vadd.f32 %v455_v55, %v311_v23 }
  0xcf   :  { %v589_v56 = vpop.f32.mrf.mxu2 }
  0xd0   :  { %v618_v33 = vadd.f32 %v589_v56, %v465_v26 }
  0xd2   :  { %v608_v57 = vpop.f32.mrf.mxu3  ;;  %v439_v58 = vpop.f32.mrf.mxu0 }
  0xd3   :  { %v467_v21 = vadd.f32 %v439_v58, %v295_v13  ;;  %v619_v36 = vadd.f32 %v608_v57, %v466_v29 }
  0xd5   :  { %v458_v59 = vpop.f32.mrf.mxu1 }
  0xd6   :  { %v468_v24 = vadd.f32 %v458_v59, %v314_v17 }
  0xd7   :  { %v592_v60 = vpop.f32.mrf.mxu2 }
  0xd8   :  { %v620_v27 = vadd.f32 %v592_v60, %v467_v21 }
  0xda   :  { %v611_v61 = vpop.f32.mrf.mxu3  ;;  %v441_v62 = vpop.f32.mrf.mxu0 }
  0xdb   :  { %v621_v30 = vadd.f32 %v611_v61, %v468_v24  ;;  %v469_v50 = vadd.f32 %v441_v62, %v297_v39 }
  0xdd   :  { %v460_v63 = vpop.f32.mrf.mxu1 }
  0xde   :  { %v470_v53 = vadd.f32 %v460_v63, %v316_v43 }
  0xdf   :  { %v594_v5 = vpop.f32.mrf.mxu2 }
  0xe0   :  { %v622_v56 = vadd.f32 %v594_v5, %v469_v50 }
  0xe2   :  { %v613_v8 = vpop.f32.mrf.mxu3  ;;  %v740_v11 = vpop.f32.mrf.mxu0 }
  0xe3   :  { %v769_v14 = vadd.f32 %v740_v11, %v616_v7  ;;  %v623_v48 = vadd.f32 %v613_v8, %v470_v53 }
  0xe5   :  { %v759_v16 = vpop.f32.mrf.mxu1  ;;  %v783_v22 = vmul.f32 %v779_v9, %v769_v14 }
  0xe6   :  { %v770_v18 = vadd.f32 %v759_v16, %v617_v10 }
  0xe7   :  { %v797_v28 = vadd.f32 %v793_v15, %v783_v22  ;;  %v745_v32 = vpop.f32.mrf.mxu2 }
  0xe8   :  { %v784_v25 = vmul.f32 %v780_v12, %v770_v18  ;;  %v773_v34 = vadd.f32 %v745_v32, %v620_v27 }
  0xe9   :  { %805 = vst [vmem:[%s1926_s8] sm:$0xff] %v797_v28 }
  0xea   :  { %v798_v31 = vadd.f32 %v794_v19, %v784_v25  ;;  %v764_v35 = vpop.f32.mrf.mxu3  ;;  %v742_v38 = vpop.f32.mrf.mxu0  ;;  %v787_v40 = vmul.f32 %v779_v9, %v773_v34 }
  0xeb   :  { %v774_v37 = vadd.f32 %v764_v35, %v621_v30  ;;  %v771_v41 = vadd.f32 %v742_v38, %v618_v33 }
  0xec   :  { %806 = vst [vmem:[%s1926_s8 + $0x8] sm:$0xff] %v798_v31  ;;  %v801_v51 = vadd.f32 %v793_v15, %v787_v40 }
  0xed   :  { %v761_v42 = vpop.f32.mrf.mxu1  ;;  %v788_v44 = vmul.f32 %v780_v12, %v774_v37  ;;  %v785_v52 = vmul.f32 %v779_v9, %v771_v41 }
  0xee   :  { %v772_v45 = vadd.f32 %v761_v42, %v619_v36  ;;  %809 = vst [vmem:[%s1926_s8 + $0x20] sm:$0xff] %v801_v51 }
  0xef   :  { %v802_v54 = vadd.f32 %v794_v19, %v788_v44  ;;  %v799_v46 = vadd.f32 %v793_v15, %v785_v52  ;;  %v747_v49 = vpop.f32.mrf.mxu2 }
  0xf0   :  { %v786_v55 = vmul.f32 %v780_v12, %v772_v45  ;;  %v775_v57 = vadd.f32 %v747_v49, %v622_v56 }
  0xf1   :  { %810 = vst [vmem:[%s1926_s8 + $0x28] sm:$0xff] %v802_v54 }
  0xf2   :  { %v800_v47 = vadd.f32 %v794_v19, %v786_v55  ;;  %807 = vst [vmem:[%s1926_s8 + $0x10] sm:$0xff] %v799_v46  ;;  %v766_v58 = vpop.f32.mrf.mxu3  ;;  %v789_v60 = vmul.f32 %v779_v9, %v775_v57 }
  0xf3   :  { %v776_v59 = vadd.f32 %v766_v58, %v623_v48 }
  0xf4   :  { %808 = vst [vmem:[%s1926_s8 + $0x18] sm:$0xff] %v800_v47  ;;  %v803_v62 = vadd.f32 %v793_v15, %v789_v60 }
  0xf5   :  { %v790_v61 = vmul.f32 %v780_v12, %v776_v59 }
  0xf6   :  { %811 = vst [vmem:[%s1926_s8 + $0x30] sm:$0xff] %v803_v62 }
  0xf7   :  { %v804_v63 = vadd.f32 %v794_v19, %v790_v61 }
  0xf9   :  { %812 = vst [vmem:[%s1926_s8 + $0x38] sm:$0xff] %v804_v63 }

</bundles_post_ra>
